<compile_context>
chip_gen: v7x
topology: tpu7x:2x2x1
jax: 0.10.0
libtpu: 0.0.40
codegen_flags: <defaults>
</compile_context>

<pallas_src>
import functools

import jax
import jax.numpy as jnp
from jax.experimental import pallas as pl
from jax.experimental.pallas import tpu as pltpu


def _gelu_exact(x):
    # nn.GELU() default = exact erf-based GELU
    return 0.5 * x * (1.0 + jax.lax.erf(x * 0.7071067811865476))


def mlp_classifier_kernel(
    x_ref,        # [TB, D]  f32
    w_in_ref,     # [D, H]   (bf16 or f32)
    b_in_ref,     # [1, H]   f32
    gammas_ref,   # [NB, H]  f32
    betas_ref,    # [NB, H]  f32
    w1s_ref,      # [NB, H, H] (bf16 or f32)
    b1s_ref,      # [NB, H]  f32
    w2s_ref,      # [NB, H, H] (bf16 or f32)
    b2s_ref,      # [NB, H]  f32
    w_out_ref,    # [1, H]   f32
    b_out_ref,    # [1, 1]   f32
    out_ref,      # [1, TB]  f32 (lane-dense)
    *, num_blocks, eps,
):
    w_dtype = w_in_ref.dtype
    x = x_ref[...]                                   # f32, no redundant cast

    # input projection + GELU (MXU matmul, f32 accumulation)
    h = jnp.dot(x.astype(w_dtype), w_in_ref[...],
                preferred_element_type=jnp.float32) + b_in_ref[...]
    h = _gelu_exact(h)

    inv_dim = 1.0 / h.shape[-1]

    # residual blocks (pre-LayerNorm), statically unrolled
    for i in range(num_blocks):
        gamma = gammas_ref[i]                        # [H]
        beta = betas_ref[i]                          # [H]

        # fused LayerNorm stats: one sweep for sum and sum-of-squares
        s1 = jnp.sum(h, axis=-1, keepdims=True)
        s2 = jnp.sum(h * h, axis=-1, keepdims=True)
        mean = s1 * inv_dim
        var = jnp.maximum(s2 * inv_dim - mean * mean, 0.0)   # biased, like torch LN
        n = (h - mean) * jax.lax.rsqrt(var + eps) * gamma + beta

        t = jnp.dot(n.astype(w_dtype), w1s_ref[i],
                    preferred_element_type=jnp.float32) + b1s_ref[i]
        t = _gelu_exact(t)
        # dropout: identity in eval mode
        t = jnp.dot(t.astype(w_dtype), w2s_ref[i],
                    preferred_element_type=jnp.float32) + b2s_ref[i]
        h = h + t

    # output head: VPU reduction instead of an [H,1] MXU matmul; lane-dense store
    logits = jnp.sum(h * w_out_ref[...], axis=-1)    # [TB]
    out_ref[...] = (logits[None, :] + b_out_ref[...]).astype(out_ref.dtype)


def mlp_classifier_forward(x, params, *, num_blocks, eps=1e-5, tb=None,
                           weights_dtype=jnp.bfloat16):
    B, D = x.shape
    H = params["w_in"].shape[1]

    if tb is None:
        tb = 128 if B <= 128 else 256                # lane-dense output slab (>=128)
    n_tiles = pl.cdiv(B, tb)
    b_pad = n_tiles * tb
    if b_pad != B:
        x = jnp.pad(x, ((0, b_pad - B), (0, 0)))

    wdt = jnp.dtype(weights_dtype)
    w_in = params["w_in"].astype(wdt)
    w1s = params["w1s"].astype(wdt)
    w2s = params["w2s"].astype(wdt)
    b_in = params["b_in"].reshape(1, H).astype(jnp.float32)
    gammas = params["gammas"].astype(jnp.float32)
    betas = params["betas"].astype(jnp.float32)
    b1s = params["b1s"].astype(jnp.float32)
    b2s = params["b2s"].astype(jnp.float32)
    w_out = params["w_out"].reshape(1, H).astype(jnp.float32)
    b_out = params["b_out"].reshape(1, 1).astype(jnp.float32)

    args = (x, w_in, b_in, gammas, betas, w1s, b1s, w2s, b2s, w_out, b_out)

    def resident_spec(a):
        nd = a.ndim
        return pl.BlockSpec(a.shape, lambda i, _nd=nd: (0,) * _nd)   # resident in VMEM

    in_specs = [pl.BlockSpec((tb, D), lambda i: (i, 0))] + \
               [resident_spec(a) for a in args[1:]]
    out_specs = pl.BlockSpec((1, tb), lambda i: (0, i))              # lane-dense slab

    # Explicit VMEM budget: resident weights + double-buffered x/out tiles +
    # per-step f32 activations, plus headroom; capped at v7x's 64 MiB physical.
    resident_bytes = sum(int(a.size) * a.dtype.itemsize for a in args[1:])
    io_bytes = 2 * (tb * D * x.dtype.itemsize + tb * 4)
    act_bytes = 8 * tb * H * 4
    vmem_limit = resident_bytes + io_bytes + act_bytes + (8 << 20)
    vmem_limit = int(min(max(vmem_limit, 32 << 20), 64 << 20))
    # NOTE: for hidden sizes where resident weights alone exceed ~48 MiB, stream
    # w1s/w2s over a second ("arbitrary") grid axis instead of keeping them resident.

    out = pl.pallas_call(
        functools.partial(mlp_classifier_kernel, num_blocks=num_blocks, eps=eps),
        out_shape=jax.ShapeDtypeStruct((1, b_pad), jnp.float32),
        grid_spec=pltpu.PrefetchScalarGridSpec(
            num_scalar_prefetch=0,
            grid=(n_tiles,),
            in_specs=in_specs,
            out_specs=out_specs,
        ),
        compiler_params=pltpu.CompilerParams(
            dimension_semantics=("parallel",),
            vmem_limit_bytes=vmem_limit,
        ),
    )(*args)
    return out[0, :B]                                # .squeeze(1) equivalent


def init_params(key, input_dim, hidden, num_blocks):
    ks = jax.random.split(key, 8)
    scale = 0.05
    return {
        "w_in": scale * jax.random.normal(ks[0], (input_dim, hidden), jnp.float32),
        "b_in": scale * jax.random.normal(ks[1], (1, hidden), jnp.float32),
        "gammas": jnp.ones((num_blocks, hidden), jnp.float32),
        "betas": jnp.zeros((num_blocks, hidden), jnp.float32),
        "w1s": scale * jax.random.normal(ks[2], (num_blocks, hidden, hidden), jnp.float32),
        "b1s": scale * jax.random.normal(ks[3], (num_blocks, hidden), jnp.float32),
        "w2s": scale * jax.random.normal(ks[4], (num_blocks, hidden, hidden), jnp.float32),
        "b2s": scale * jax.random.normal(ks[5], (num_blocks, hidden), jnp.float32),
        "w_out": scale * jax.random.normal(ks[6], (hidden, 1), jnp.float32),
        "b_out": scale * jax.random.normal(ks[7], (1, 1), jnp.float32),
    }


def reference_forward(x, params, *, num_blocks, eps=1e-5):
    # Pure-JAX reference mirroring the PyTorch module (eval mode, f32).
    h = jax.nn.gelu(x @ params["w_in"] + params["b_in"], approximate=False)
    for i in range(num_blocks):
        mean = jnp.mean(h, axis=-1, keepdims=True)
        var = jnp.mean((h - mean) ** 2, axis=-1, keepdims=True)
        n = (h - mean) / jnp.sqrt(var + eps) * params["gammas"][i] + params["betas"][i]
        t = jax.nn.gelu(n @ params["w1s"][i] + params["b1s"][i], approximate=False)
        t = t @ params["w2s"][i] + params["b2s"][i]
        h = h + t
    return (h @ params["w_out"] + params["b_out"])[:, 0]


if __name__ == "__main__":
    B, INPUT_DIM, HIDDEN, NUM_BLOCKS = 8, 64, 32, 4

    key = jax.random.PRNGKey(0)
    k_x, k_p = jax.random.split(key)
    x = jax.random.normal(k_x, (B, INPUT_DIM), jnp.float32)
    params = init_params(k_p, INPUT_DIM, HIDDEN, NUM_BLOCKS)

    ref = reference_forward(x, params, num_blocks=NUM_BLOCKS)

    # 1) f32-weight path: tight check of the kernel math vs the pure-JAX reference.
    out_f32 = jax.block_until_ready(
        mlp_classifier_forward(x, params, num_blocks=NUM_BLOCKS,
                               weights_dtype=jnp.float32))
    assert out_f32.shape == (B,)
    assert jnp.allclose(out_f32, ref, atol=1e-3, rtol=1e-3), (out_f32, ref)

    # 2) bf16-weight fast path (MXU-friendly, f32 accumulation): looser tolerance.
    out_bf16 = jax.block_until_ready(
        mlp_classifier_forward(x, params, num_blocks=NUM_BLOCKS,
                               weights_dtype=jnp.bfloat16))
    assert out_bf16.shape == (B,)
    assert jnp.allclose(out_bf16, ref, atol=3e-2, rtol=3e-2), (out_bf16, ref)

    # 3) multi-tile batch grid (several grid steps, padded batch), bf16 weights.
    B2, D2, H2 = 300, 64, 128
    k_x2, k_p2 = jax.random.split(jax.random.PRNGKey(1))
    x2 = jax.random.normal(k_x2, (B2, D2), jnp.float32)
    params2 = init_params(k_p2, D2, H2, NUM_BLOCKS)
    out2 = jax.block_until_ready(
        mlp_classifier_forward(x2, params2, num_blocks=NUM_BLOCKS,
                               weights_dtype=jnp.bfloat16))
    ref2 = reference_forward(x2, params2, num_blocks=NUM_BLOCKS)
    assert out2.shape == (B2,)
    assert jnp.allclose(out2, ref2, atol=5e-2, rtol=5e-2), (out2, ref2)

    print("KERNEL_OK")
</pallas_src>

<mosaic_0001>
module attributes {stable_mosaic.version = 11 : i64} {
  func.func @mlp_classifier_kernel(%arg0: i32, %arg1: memref<128x64xf32, #tpu.memory_space<vmem>>, %arg2: memref<64x32xf32, #tpu.memory_space<vmem>>, %arg3: memref<1x32xf32, #tpu.memory_space<vmem>>, %arg4: memref<4x32xf32, #tpu.memory_space<vmem>>, %arg5: memref<4x32xf32, #tpu.memory_space<vmem>>, %arg6: memref<4x32x32xf32, #tpu.memory_space<vmem>>, %arg7: memref<4x32xf32, #tpu.memory_space<vmem>>, %arg8: memref<4x32x32xf32, #tpu.memory_space<vmem>>, %arg9: memref<4x32xf32, #tpu.memory_space<vmem>>, %arg10: memref<1x32xf32, #tpu.memory_space<vmem>>, %arg11: memref<1x1xf32, #tpu.memory_space<vmem>>, %arg12: memref<1x128xf32, #tpu.memory_space<vmem>>) attributes {dimension_semantics = [#tpu.dimension_semantics<parallel>], iteration_bounds = array<i64: 1>, scalar_prefetch = 0 : i64, scratch_operands = 0 : i64, tpu.core_type = #tpu.core_type<tc>, window_params = [{transform_indices = @transform_0, window_bounds = array<i64: 128, 64>}, {pipeline_mode = #tpu.pipeline_mode<synchronous>, transform_indices = @transform_1, window_bounds = array<i64: 64, 32>}, {pipeline_mode = #tpu.pipeline_mode<synchronous>, transform_indices = @transform_2, window_bounds = array<i64: 1, 32>}, {pipeline_mode = #tpu.pipeline_mode<synchronous>, transform_indices = @transform_3, window_bounds = array<i64: 4, 32>}, {pipeline_mode = #tpu.pipeline_mode<synchronous>, transform_indices = @transform_4, window_bounds = array<i64: 4, 32>}, {pipeline_mode = #tpu.pipeline_mode<synchronous>, transform_indices = @transform_5, window_bounds = array<i64: 4, 32, 32>}, {pipeline_mode = #tpu.pipeline_mode<synchronous>, transform_indices = @transform_6, window_bounds = array<i64: 4, 32>}, {pipeline_mode = #tpu.pipeline_mode<synchronous>, transform_indices = @transform_7, window_bounds = array<i64: 4, 32, 32>}, {pipeline_mode = #tpu.pipeline_mode<synchronous>, transform_indices = @transform_8, window_bounds = array<i64: 4, 32>}, {pipeline_mode = #tpu.pipeline_mode<synchronous>, transform_indices = @transform_9, window_bounds = array<i64: 1, 32>}, {pipeline_mode = #tpu.pipeline_mode<synchronous>, transform_indices = @transform_10, window_bounds = array<i64: 1, 1>}, {transform_indices = @transform_11, window_bounds = array<i64: 1, 128>}]} {
    %c0 = arith.constant 0 : index
    %c0_0 = arith.constant 0 : index
    %0 = vector.load %arg1[%c0, %c0_0] : memref<128x64xf32, #tpu.memory_space<vmem>>, vector<128x64xf32>
    %c0_1 = arith.constant 0 : index
    %c0_2 = arith.constant 0 : index
    %1 = vector.load %arg2[%c0_1, %c0_2] : memref<64x32xf32, #tpu.memory_space<vmem>>, vector<64x32xf32>
    %cst = arith.constant dense<0.000000e+00> : vector<128x32xf32>
    %2 = tpu.matmul %0, %1, %cst {dimension_numbers = #tpu.dot_dimension_numbers<[1], [0], [0], [1], [0, 0, 1, 1], [], []>} : vector<128x64xf32>, vector<64x32xf32>, vector<128x32xf32> -> vector<128x32xf32>
    %c0_3 = arith.constant 0 : index
    %c0_4 = arith.constant 0 : index
    %3 = vector.load %arg3[%c0_3, %c0_4] : memref<1x32xf32, #tpu.memory_space<vmem>>, vector<1x32xf32>
    %4 = vector.broadcast %3 : vector<1x32xf32> to vector<128x32xf32>
    %5 = arith.addf %2, %4 : vector<128x32xf32>
    %cst_5 = arith.constant 5.000000e-01 : f32
    %6 = vector.broadcast %cst_5 : f32 to vector<128x32xf32>
    %7 = arith.mulf %6, %5 : vector<128x32xf32>
    %cst_6 = arith.constant 0.707106769 : f32
    %8 = vector.broadcast %cst_6 : f32 to vector<128x32xf32>
    %9 = arith.mulf %5, %8 : vector<128x32xf32>
    %10 = math.erf %9 : vector<128x32xf32>
    %cst_7 = arith.constant 1.000000e+00 : f32
    %11 = vector.broadcast %cst_7 : f32 to vector<128x32xf32>
    %12 = arith.addf %11, %10 : vector<128x32xf32>
    %13 = arith.mulf %7, %12 : vector<128x32xf32>
    %c0_8 = arith.constant 0 : index
    %c0_9 = arith.constant 0 : index
    %14 = vector.load %arg4[%c0_8, %c0_9] : memref<4x32xf32, #tpu.memory_space<vmem>>, vector<1x32xf32>
    %15 = vector.shape_cast %14 : vector<1x32xf32> to vector<32xf32>
    %c0_10 = arith.constant 0 : index
    %c0_11 = arith.constant 0 : index
    %16 = vector.load %arg5[%c0_10, %c0_11] : memref<4x32xf32, #tpu.memory_space<vmem>>, vector<1x32xf32>
    %17 = vector.shape_cast %16 : vector<1x32xf32> to vector<32xf32>
    %cst_12 = arith.constant dense<0.000000e+00> : vector<128xf32>
    %18 = vector.multi_reduction <add>, %13, %cst_12 [1] : vector<128x32xf32> to vector<128xf32>
    %19 = vector.shape_cast %18 : vector<128xf32> to vector<128x1xf32>
    %20 = arith.mulf %13, %13 : vector<128x32xf32>
    %cst_13 = arith.constant dense<0.000000e+00> : vector<128xf32>
    %21 = vector.multi_reduction <add>, %20, %cst_13 [1] : vector<128x32xf32> to vector<128xf32>
    %22 = vector.shape_cast %21 : vector<128xf32> to vector<128x1xf32>
    %cst_14 = arith.constant 3.125000e-02 : f32
    %23 = vector.broadcast %cst_14 : f32 to vector<128x1xf32>
    %24 = arith.mulf %19, %23 : vector<128x1xf32>
    %cst_15 = arith.constant 3.125000e-02 : f32
    %25 = vector.broadcast %cst_15 : f32 to vector<128x1xf32>
    %26 = arith.mulf %22, %25 : vector<128x1xf32>
    %27 = arith.mulf %24, %24 : vector<128x1xf32>
    %28 = arith.subf %26, %27 : vector<128x1xf32>
    %cst_16 = arith.constant 0.000000e+00 : f32
    %29 = vector.broadcast %cst_16 : f32 to vector<128x1xf32>
    %30 = arith.maximumf %28, %29 : vector<128x1xf32>
    %31 = vector.broadcast %24 : vector<128x1xf32> to vector<128x32xf32>
    %32 = arith.subf %13, %31 : vector<128x32xf32>
    %cst_17 = arith.constant 9.99999974E-6 : f32
    %33 = vector.broadcast %cst_17 : f32 to vector<128x1xf32>
    %34 = arith.addf %30, %33 : vector<128x1xf32>
    %35 = math.rsqrt %34 : vector<128x1xf32>
    %36 = vector.broadcast %35 : vector<128x1xf32> to vector<128x32xf32>
    %37 = arith.mulf %32, %36 : vector<128x32xf32>
    %38 = vector.shape_cast %15 : vector<32xf32> to vector<1x32xf32>
    %39 = vector.broadcast %38 : vector<1x32xf32> to vector<128x32xf32>
    %40 = arith.mulf %37, %39 : vector<128x32xf32>
    %41 = vector.shape_cast %17 : vector<32xf32> to vector<1x32xf32>
    %42 = vector.broadcast %41 : vector<1x32xf32> to vector<128x32xf32>
    %43 = arith.addf %40, %42 : vector<128x32xf32>
    %c0_18 = arith.constant 0 : index
    %c0_19 = arith.constant 0 : index
    %c0_20 = arith.constant 0 : index
    %44 = vector.load %arg6[%c0_18, %c0_19, %c0_20] : memref<4x32x32xf32, #tpu.memory_space<vmem>>, vector<1x32x32xf32>
    %45 = vector.shape_cast %44 : vector<1x32x32xf32> to vector<32x32xf32>
    %cst_21 = arith.constant dense<0.000000e+00> : vector<128x32xf32>
    %46 = tpu.matmul %43, %45, %cst_21 {dimension_numbers = #tpu.dot_dimension_numbers<[1], [0], [0], [1], [0, 0, 1, 1], [], []>} : vector<128x32xf32>, vector<32x32xf32>, vector<128x32xf32> -> vector<128x32xf32>
    %c0_22 = arith.constant 0 : index
    %c0_23 = arith.constant 0 : index
    %47 = vector.load %arg7[%c0_22, %c0_23] : memref<4x32xf32, #tpu.memory_space<vmem>>, vector<1x32xf32>
    %48 = vector.shape_cast %47 : vector<1x32xf32> to vector<32xf32>
    %49 = vector.shape_cast %48 : vector<32xf32> to vector<1x32xf32>
    %50 = vector.broadcast %49 : vector<1x32xf32> to vector<128x32xf32>
    %51 = arith.addf %46, %50 : vector<128x32xf32>
    %cst_24 = arith.constant 5.000000e-01 : f32
    %52 = vector.broadcast %cst_24 : f32 to vector<128x32xf32>
    %53 = arith.mulf %52, %51 : vector<128x32xf32>
    %cst_25 = arith.constant 0.707106769 : f32
    %54 = vector.broadcast %cst_25 : f32 to vector<128x32xf32>
    %55 = arith.mulf %51, %54 : vector<128x32xf32>
    %56 = math.erf %55 : vector<128x32xf32>
    %cst_26 = arith.constant 1.000000e+00 : f32
    %57 = vector.broadcast %cst_26 : f32 to vector<128x32xf32>
    %58 = arith.addf %57, %56 : vector<128x32xf32>
    %59 = arith.mulf %53, %58 : vector<128x32xf32>
    %c0_27 = arith.constant 0 : index
    %c0_28 = arith.constant 0 : index
    %c0_29 = arith.constant 0 : index
    %60 = vector.load %arg8[%c0_27, %c0_28, %c0_29] : memref<4x32x32xf32, #tpu.memory_space<vmem>>, vector<1x32x32xf32>
    %61 = vector.shape_cast %60 : vector<1x32x32xf32> to vector<32x32xf32>
    %cst_30 = arith.constant dense<0.000000e+00> : vector<128x32xf32>
    %62 = tpu.matmul %59, %61, %cst_30 {dimension_numbers = #tpu.dot_dimension_numbers<[1], [0], [0], [1], [0, 0, 1, 1], [], []>} : vector<128x32xf32>, vector<32x32xf32>, vector<128x32xf32> -> vector<128x32xf32>
    %c0_31 = arith.constant 0 : index
    %c0_32 = arith.constant 0 : index
    %63 = vector.load %arg9[%c0_31, %c0_32] : memref<4x32xf32, #tpu.memory_space<vmem>>, vector<1x32xf32>
    %64 = vector.shape_cast %63 : vector<1x32xf32> to vector<32xf32>
    %65 = vector.shape_cast %64 : vector<32xf32> to vector<1x32xf32>
    %66 = vector.broadcast %65 : vector<1x32xf32> to vector<128x32xf32>
    %67 = arith.addf %62, %66 : vector<128x32xf32>
    %68 = arith.addf %13, %67 : vector<128x32xf32>
    %c1 = arith.constant 1 : index
    %c0_33 = arith.constant 0 : index
    %69 = vector.load %arg4[%c1, %c0_33] : memref<4x32xf32, #tpu.memory_space<vmem>>, vector<1x32xf32>
    %70 = vector.shape_cast %69 : vector<1x32xf32> to vector<32xf32>
    %c1_34 = arith.constant 1 : index
    %c0_35 = arith.constant 0 : index
    %71 = vector.load %arg5[%c1_34, %c0_35] : memref<4x32xf32, #tpu.memory_space<vmem>>, vector<1x32xf32>
    %72 = vector.shape_cast %71 : vector<1x32xf32> to vector<32xf32>
    %cst_36 = arith.constant dense<0.000000e+00> : vector<128xf32>
    %73 = vector.multi_reduction <add>, %68, %cst_36 [1] : vector<128x32xf32> to vector<128xf32>
    %74 = vector.shape_cast %73 : vector<128xf32> to vector<128x1xf32>
    %75 = arith.mulf %68, %68 : vector<128x32xf32>
    %cst_37 = arith.constant dense<0.000000e+00> : vector<128xf32>
    %76 = vector.multi_reduction <add>, %75, %cst_37 [1] : vector<128x32xf32> to vector<128xf32>
    %77 = vector.shape_cast %76 : vector<128xf32> to vector<128x1xf32>
    %cst_38 = arith.constant 3.125000e-02 : f32
    %78 = vector.broadcast %cst_38 : f32 to vector<128x1xf32>
    %79 = arith.mulf %74, %78 : vector<128x1xf32>
    %cst_39 = arith.constant 3.125000e-02 : f32
    %80 = vector.broadcast %cst_39 : f32 to vector<128x1xf32>
    %81 = arith.mulf %77, %80 : vector<128x1xf32>
    %82 = arith.mulf %79, %79 : vector<128x1xf32>
    %83 = arith.subf %81, %82 : vector<128x1xf32>
    %cst_40 = arith.constant 0.000000e+00 : f32
    %84 = vector.broadcast %cst_40 : f32 to vector<128x1xf32>
    %85 = arith.maximumf %83, %84 : vector<128x1xf32>
    %86 = vector.broadcast %79 : vector<128x1xf32> to vector<128x32xf32>
    %87 = arith.subf %68, %86 : vector<128x32xf32>
    %cst_41 = arith.constant 9.99999974E-6 : f32
    %88 = vector.broadcast %cst_41 : f32 to vector<128x1xf32>
    %89 = arith.addf %85, %88 : vector<128x1xf32>
    %90 = math.rsqrt %89 : vector<128x1xf32>
    %91 = vector.broadcast %90 : vector<128x1xf32> to vector<128x32xf32>
    %92 = arith.mulf %87, %91 : vector<128x32xf32>
    %93 = vector.shape_cast %70 : vector<32xf32> to vector<1x32xf32>
    %94 = vector.broadcast %93 : vector<1x32xf32> to vector<128x32xf32>
    %95 = arith.mulf %92, %94 : vector<128x32xf32>
    %96 = vector.shape_cast %72 : vector<32xf32> to vector<1x32xf32>
    %97 = vector.broadcast %96 : vector<1x32xf32> to vector<128x32xf32>
    %98 = arith.addf %95, %97 : vector<128x32xf32>
    %c1_42 = arith.constant 1 : index
    %c0_43 = arith.constant 0 : index
    %c0_44 = arith.constant 0 : index
    %99 = vector.load %arg6[%c1_42, %c0_43, %c0_44] : memref<4x32x32xf32, #tpu.memory_space<vmem>>, vector<1x32x32xf32>
    %100 = vector.shape_cast %99 : vector<1x32x32xf32> to vector<32x32xf32>
    %cst_45 = arith.constant dense<0.000000e+00> : vector<128x32xf32>
    %101 = tpu.matmul %98, %100, %cst_45 {dimension_numbers = #tpu.dot_dimension_numbers<[1], [0], [0], [1], [0, 0, 1, 1], [], []>} : vector<128x32xf32>, vector<32x32xf32>, vector<128x32xf32> -> vector<128x32xf32>
    %c1_46 = arith.constant 1 : index
    %c0_47 = arith.constant 0 : index
    %102 = vector.load %arg7[%c1_46, %c0_47] : memref<4x32xf32, #tpu.memory_space<vmem>>, vector<1x32xf32>
    %103 = vector.shape_cast %102 : vector<1x32xf32> to vector<32xf32>
    %104 = vector.shape_cast %103 : vector<32xf32> to vector<1x32xf32>
    %105 = vector.broadcast %104 : vector<1x32xf32> to vector<128x32xf32>
    %106 = arith.addf %101, %105 : vector<128x32xf32>
    %cst_48 = arith.constant 5.000000e-01 : f32
    %107 = vector.broadcast %cst_48 : f32 to vector<128x32xf32>
    %108 = arith.mulf %107, %106 : vector<128x32xf32>
    %cst_49 = arith.constant 0.707106769 : f32
    %109 = vector.broadcast %cst_49 : f32 to vector<128x32xf32>
    %110 = arith.mulf %106, %109 : vector<128x32xf32>
    %111 = math.erf %110 : vector<128x32xf32>
    %cst_50 = arith.constant 1.000000e+00 : f32
    %112 = vector.broadcast %cst_50 : f32 to vector<128x32xf32>
    %113 = arith.addf %112, %111 : vector<128x32xf32>
    %114 = arith.mulf %108, %113 : vector<128x32xf32>
    %c1_51 = arith.constant 1 : index
    %c0_52 = arith.constant 0 : index
    %c0_53 = arith.constant 0 : index
    %115 = vector.load %arg8[%c1_51, %c0_52, %c0_53] : memref<4x32x32xf32, #tpu.memory_space<vmem>>, vector<1x32x32xf32>
    %116 = vector.shape_cast %115 : vector<1x32x32xf32> to vector<32x32xf32>
    %cst_54 = arith.constant dense<0.000000e+00> : vector<128x32xf32>
    %117 = tpu.matmul %114, %116, %cst_54 {dimension_numbers = #tpu.dot_dimension_numbers<[1], [0], [0], [1], [0, 0, 1, 1], [], []>} : vector<128x32xf32>, vector<32x32xf32>, vector<128x32xf32> -> vector<128x32xf32>
    %c1_55 = arith.constant 1 : index
    %c0_56 = arith.constant 0 : index
    %118 = vector.load %arg9[%c1_55, %c0_56] : memref<4x32xf32, #tpu.memory_space<vmem>>, vector<1x32xf32>
    %119 = vector.shape_cast %118 : vector<1x32xf32> to vector<32xf32>
    %120 = vector.shape_cast %119 : vector<32xf32> to vector<1x32xf32>
    %121 = vector.broadcast %120 : vector<1x32xf32> to vector<128x32xf32>
    %122 = arith.addf %117, %121 : vector<128x32xf32>
    %123 = arith.addf %68, %122 : vector<128x32xf32>
    %c2 = arith.constant 2 : index
    %c0_57 = arith.constant 0 : index
    %124 = vector.load %arg4[%c2, %c0_57] : memref<4x32xf32, #tpu.memory_space<vmem>>, vector<1x32xf32>
    %125 = vector.shape_cast %124 : vector<1x32xf32> to vector<32xf32>
    %c2_58 = arith.constant 2 : index
    %c0_59 = arith.constant 0 : index
    %126 = vector.load %arg5[%c2_58, %c0_59] : memref<4x32xf32, #tpu.memory_space<vmem>>, vector<1x32xf32>
    %127 = vector.shape_cast %126 : vector<1x32xf32> to vector<32xf32>
    %cst_60 = arith.constant dense<0.000000e+00> : vector<128xf32>
    %128 = vector.multi_reduction <add>, %123, %cst_60 [1] : vector<128x32xf32> to vector<128xf32>
    %129 = vector.shape_cast %128 : vector<128xf32> to vector<128x1xf32>
    %130 = arith.mulf %123, %123 : vector<128x32xf32>
    %cst_61 = arith.constant dense<0.000000e+00> : vector<128xf32>
    %131 = vector.multi_reduction <add>, %130, %cst_61 [1] : vector<128x32xf32> to vector<128xf32>
    %132 = vector.shape_cast %131 : vector<128xf32> to vector<128x1xf32>
    %cst_62 = arith.constant 3.125000e-02 : f32
    %133 = vector.broadcast %cst_62 : f32 to vector<128x1xf32>
    %134 = arith.mulf %129, %133 : vector<128x1xf32>
    %cst_63 = arith.constant 3.125000e-02 : f32
    %135 = vector.broadcast %cst_63 : f32 to vector<128x1xf32>
    %136 = arith.mulf %132, %135 : vector<128x1xf32>
    %137 = arith.mulf %134, %134 : vector<128x1xf32>
    %138 = arith.subf %136, %137 : vector<128x1xf32>
    %cst_64 = arith.constant 0.000000e+00 : f32
    %139 = vector.broadcast %cst_64 : f32 to vector<128x1xf32>
    %140 = arith.maximumf %138, %139 : vector<128x1xf32>
    %141 = vector.broadcast %134 : vector<128x1xf32> to vector<128x32xf32>
    %142 = arith.subf %123, %141 : vector<128x32xf32>
    %cst_65 = arith.constant 9.99999974E-6 : f32
    %143 = vector.broadcast %cst_65 : f32 to vector<128x1xf32>
    %144 = arith.addf %140, %143 : vector<128x1xf32>
    %145 = math.rsqrt %144 : vector<128x1xf32>
    %146 = vector.broadcast %145 : vector<128x1xf32> to vector<128x32xf32>
    %147 = arith.mulf %142, %146 : vector<128x32xf32>
    %148 = vector.shape_cast %125 : vector<32xf32> to vector<1x32xf32>
    %149 = vector.broadcast %148 : vector<1x32xf32> to vector<128x32xf32>
    %150 = arith.mulf %147, %149 : vector<128x32xf32>
    %151 = vector.shape_cast %127 : vector<32xf32> to vector<1x32xf32>
    %152 = vector.broadcast %151 : vector<1x32xf32> to vector<128x32xf32>
    %153 = arith.addf %150, %152 : vector<128x32xf32>
    %c2_66 = arith.constant 2 : index
    %c0_67 = arith.constant 0 : index
    %c0_68 = arith.constant 0 : index
    %154 = vector.load %arg6[%c2_66, %c0_67, %c0_68] : memref<4x32x32xf32, #tpu.memory_space<vmem>>, vector<1x32x32xf32>
    %155 = vector.shape_cast %154 : vector<1x32x32xf32> to vector<32x32xf32>
    %cst_69 = arith.constant dense<0.000000e+00> : vector<128x32xf32>
    %156 = tpu.matmul %153, %155, %cst_69 {dimension_numbers = #tpu.dot_dimension_numbers<[1], [0], [0], [1], [0, 0, 1, 1], [], []>} : vector<128x32xf32>, vector<32x32xf32>, vector<128x32xf32> -> vector<128x32xf32>
    %c2_70 = arith.constant 2 : index
    %c0_71 = arith.constant 0 : index
    %157 = vector.load %arg7[%c2_70, %c0_71] : memref<4x32xf32, #tpu.memory_space<vmem>>, vector<1x32xf32>
    %158 = vector.shape_cast %157 : vector<1x32xf32> to vector<32xf32>
    %159 = vector.shape_cast %158 : vector<32xf32> to vector<1x32xf32>
    %160 = vector.broadcast %159 : vector<1x32xf32> to vector<128x32xf32>
    %161 = arith.addf %156, %160 : vector<128x32xf32>
    %cst_72 = arith.constant 5.000000e-01 : f32
    %162 = vector.broadcast %cst_72 : f32 to vector<128x32xf32>
    %163 = arith.mulf %162, %161 : vector<128x32xf32>
    %cst_73 = arith.constant 0.707106769 : f32
    %164 = vector.broadcast %cst_73 : f32 to vector<128x32xf32>
    %165 = arith.mulf %161, %164 : vector<128x32xf32>
    %166 = math.erf %165 : vector<128x32xf32>
    %cst_74 = arith.constant 1.000000e+00 : f32
    %167 = vector.broadcast %cst_74 : f32 to vector<128x32xf32>
    %168 = arith.addf %167, %166 : vector<128x32xf32>
    %169 = arith.mulf %163, %168 : vector<128x32xf32>
    %c2_75 = arith.constant 2 : index
    %c0_76 = arith.constant 0 : index
    %c0_77 = arith.constant 0 : index
    %170 = vector.load %arg8[%c2_75, %c0_76, %c0_77] : memref<4x32x32xf32, #tpu.memory_space<vmem>>, vector<1x32x32xf32>
    %171 = vector.shape_cast %170 : vector<1x32x32xf32> to vector<32x32xf32>
    %cst_78 = arith.constant dense<0.000000e+00> : vector<128x32xf32>
    %172 = tpu.matmul %169, %171, %cst_78 {dimension_numbers = #tpu.dot_dimension_numbers<[1], [0], [0], [1], [0, 0, 1, 1], [], []>} : vector<128x32xf32>, vector<32x32xf32>, vector<128x32xf32> -> vector<128x32xf32>
    %c2_79 = arith.constant 2 : index
    %c0_80 = arith.constant 0 : index
    %173 = vector.load %arg9[%c2_79, %c0_80] : memref<4x32xf32, #tpu.memory_space<vmem>>, vector<1x32xf32>
    %174 = vector.shape_cast %173 : vector<1x32xf32> to vector<32xf32>
    %175 = vector.shape_cast %174 : vector<32xf32> to vector<1x32xf32>
    %176 = vector.broadcast %175 : vector<1x32xf32> to vector<128x32xf32>
    %177 = arith.addf %172, %176 : vector<128x32xf32>
    %178 = arith.addf %123, %177 : vector<128x32xf32>
    %c3 = arith.constant 3 : index
    %c0_81 = arith.constant 0 : index
    %179 = vector.load %arg4[%c3, %c0_81] : memref<4x32xf32, #tpu.memory_space<vmem>>, vector<1x32xf32>
    %180 = vector.shape_cast %179 : vector<1x32xf32> to vector<32xf32>
    %c3_82 = arith.constant 3 : index
    %c0_83 = arith.constant 0 : index
    %181 = vector.load %arg5[%c3_82, %c0_83] : memref<4x32xf32, #tpu.memory_space<vmem>>, vector<1x32xf32>
    %182 = vector.shape_cast %181 : vector<1x32xf32> to vector<32xf32>
    %cst_84 = arith.constant dense<0.000000e+00> : vector<128xf32>
    %183 = vector.multi_reduction <add>, %178, %cst_84 [1] : vector<128x32xf32> to vector<128xf32>
    %184 = vector.shape_cast %183 : vector<128xf32> to vector<128x1xf32>
    %185 = arith.mulf %178, %178 : vector<128x32xf32>
    %cst_85 = arith.constant dense<0.000000e+00> : vector<128xf32>
    %186 = vector.multi_reduction <add>, %185, %cst_85 [1] : vector<128x32xf32> to vector<128xf32>
    %187 = vector.shape_cast %186 : vector<128xf32> to vector<128x1xf32>
    %cst_86 = arith.constant 3.125000e-02 : f32
    %188 = vector.broadcast %cst_86 : f32 to vector<128x1xf32>
    %189 = arith.mulf %184, %188 : vector<128x1xf32>
    %cst_87 = arith.constant 3.125000e-02 : f32
    %190 = vector.broadcast %cst_87 : f32 to vector<128x1xf32>
    %191 = arith.mulf %187, %190 : vector<128x1xf32>
    %192 = arith.mulf %189, %189 : vector<128x1xf32>
    %193 = arith.subf %191, %192 : vector<128x1xf32>
    %cst_88 = arith.constant 0.000000e+00 : f32
    %194 = vector.broadcast %cst_88 : f32 to vector<128x1xf32>
    %195 = arith.maximumf %193, %194 : vector<128x1xf32>
    %196 = vector.broadcast %189 : vector<128x1xf32> to vector<128x32xf32>
    %197 = arith.subf %178, %196 : vector<128x32xf32>
    %cst_89 = arith.constant 9.99999974E-6 : f32
    %198 = vector.broadcast %cst_89 : f32 to vector<128x1xf32>
    %199 = arith.addf %195, %198 : vector<128x1xf32>
    %200 = math.rsqrt %199 : vector<128x1xf32>
    %201 = vector.broadcast %200 : vector<128x1xf32> to vector<128x32xf32>
    %202 = arith.mulf %197, %201 : vector<128x32xf32>
    %203 = vector.shape_cast %180 : vector<32xf32> to vector<1x32xf32>
    %204 = vector.broadcast %203 : vector<1x32xf32> to vector<128x32xf32>
    %205 = arith.mulf %202, %204 : vector<128x32xf32>
    %206 = vector.shape_cast %182 : vector<32xf32> to vector<1x32xf32>
    %207 = vector.broadcast %206 : vector<1x32xf32> to vector<128x32xf32>
    %208 = arith.addf %205, %207 : vector<128x32xf32>
    %c3_90 = arith.constant 3 : index
    %c0_91 = arith.constant 0 : index
    %c0_92 = arith.constant 0 : index
    %209 = vector.load %arg6[%c3_90, %c0_91, %c0_92] : memref<4x32x32xf32, #tpu.memory_space<vmem>>, vector<1x32x32xf32>
    %210 = vector.shape_cast %209 : vector<1x32x32xf32> to vector<32x32xf32>
    %cst_93 = arith.constant dense<0.000000e+00> : vector<128x32xf32>
    %211 = tpu.matmul %208, %210, %cst_93 {dimension_numbers = #tpu.dot_dimension_numbers<[1], [0], [0], [1], [0, 0, 1, 1], [], []>} : vector<128x32xf32>, vector<32x32xf32>, vector<128x32xf32> -> vector<128x32xf32>
    %c3_94 = arith.constant 3 : index
    %c0_95 = arith.constant 0 : index
    %212 = vector.load %arg7[%c3_94, %c0_95] : memref<4x32xf32, #tpu.memory_space<vmem>>, vector<1x32xf32>
    %213 = vector.shape_cast %212 : vector<1x32xf32> to vector<32xf32>
    %214 = vector.shape_cast %213 : vector<32xf32> to vector<1x32xf32>
    %215 = vector.broadcast %214 : vector<1x32xf32> to vector<128x32xf32>
    %216 = arith.addf %211, %215 : vector<128x32xf32>
    %cst_96 = arith.constant 5.000000e-01 : f32
    %217 = vector.broadcast %cst_96 : f32 to vector<128x32xf32>
    %218 = arith.mulf %217, %216 : vector<128x32xf32>
    %cst_97 = arith.constant 0.707106769 : f32
    %219 = vector.broadcast %cst_97 : f32 to vector<128x32xf32>
    %220 = arith.mulf %216, %219 : vector<128x32xf32>
    %221 = math.erf %220 : vector<128x32xf32>
    %cst_98 = arith.constant 1.000000e+00 : f32
    %222 = vector.broadcast %cst_98 : f32 to vector<128x32xf32>
    %223 = arith.addf %222, %221 : vector<128x32xf32>
    %224 = arith.mulf %218, %223 : vector<128x32xf32>
    %c3_99 = arith.constant 3 : index
    %c0_100 = arith.constant 0 : index
    %c0_101 = arith.constant 0 : index
    %225 = vector.load %arg8[%c3_99, %c0_100, %c0_101] : memref<4x32x32xf32, #tpu.memory_space<vmem>>, vector<1x32x32xf32>
    %226 = vector.shape_cast %225 : vector<1x32x32xf32> to vector<32x32xf32>
    %cst_102 = arith.constant dense<0.000000e+00> : vector<128x32xf32>
    %227 = tpu.matmul %224, %226, %cst_102 {dimension_numbers = #tpu.dot_dimension_numbers<[1], [0], [0], [1], [0, 0, 1, 1], [], []>} : vector<128x32xf32>, vector<32x32xf32>, vector<128x32xf32> -> vector<128x32xf32>
    %c3_103 = arith.constant 3 : index
    %c0_104 = arith.constant 0 : index
    %228 = vector.load %arg9[%c3_103, %c0_104] : memref<4x32xf32, #tpu.memory_space<vmem>>, vector<1x32xf32>
    %229 = vector.shape_cast %228 : vector<1x32xf32> to vector<32xf32>
    %230 = vector.shape_cast %229 : vector<32xf32> to vector<1x32xf32>
    %231 = vector.broadcast %230 : vector<1x32xf32> to vector<128x32xf32>
    %232 = arith.addf %227, %231 : vector<128x32xf32>
    %233 = arith.addf %178, %232 : vector<128x32xf32>
    %c0_105 = arith.constant 0 : index
    %c0_106 = arith.constant 0 : index
    %234 = vector.load %arg10[%c0_105, %c0_106] : memref<1x32xf32, #tpu.memory_space<vmem>>, vector<1x32xf32>
    %235 = vector.broadcast %234 : vector<1x32xf32> to vector<128x32xf32>
    %236 = arith.mulf %233, %235 : vector<128x32xf32>
    %cst_107 = arith.constant dense<0.000000e+00> : vector<128xf32>
    %237 = vector.multi_reduction <add>, %236, %cst_107 [1] : vector<128x32xf32> to vector<128xf32>
    %238 = vector.shape_cast %237 : vector<128xf32> to vector<1x128xf32>
    %c0_108 = arith.constant 0 : index
    %c0_109 = arith.constant 0 : index
    %239 = vector.load %arg11[%c0_108, %c0_109] : memref<1x1xf32, #tpu.memory_space<vmem>>, vector<1x1xf32>
    %240 = vector.broadcast %239 : vector<1x1xf32> to vector<1x128xf32>
    %241 = arith.addf %238, %240 : vector<1x128xf32>
    %c0_110 = arith.constant 0 : index
    %c0_111 = arith.constant 0 : index
    %242 = vector.load %arg12[%c0_110, %c0_111] : memref<1x128xf32, #tpu.memory_space<vmem>>, vector<1x128xf32>
    tpu.vector_store %arg12[%c0_110, %c0_111], %241 {strides = array<i32>} : memref<1x128xf32, #tpu.memory_space<vmem>>, vector<1x128xf32>,
    return
  }
  func.func @transform_0(%arg0: i32) -> (i32, i32) {
    %c0_i32 = arith.constant 0 : i32
    %c0_i32_0 = arith.constant 0 : i32
    return %arg0, %c0_i32 : i32, i32
  }
  func.func @transform_1(%arg0: i32) -> (i32, i32) {
    %c0_i32 = arith.constant 0 : i32
    %c0_i32_0 = arith.constant 0 : i32
    %c0_i32_1 = arith.constant 0 : i32
    return %c0_i32, %c0_i32_0 : i32, i32
  }
  func.func @transform_2(%arg0: i32) -> (i32, i32) {
    %c0_i32 = arith.constant 0 : i32
    %c0_i32_0 = arith.constant 0 : i32
    %c0_i32_1 = arith.constant 0 : i32
    return %c0_i32, %c0_i32_0 : i32, i32
  }
  func.func @transform_3(%arg0: i32) -> (i32, i32) {
    %c0_i32 = arith.constant 0 : i32
    %c0_i32_0 = arith.constant 0 : i32
    %c0_i32_1 = arith.constant 0 : i32
    return %c0_i32, %c0_i32_0 : i32, i32
  }
  func.func @transform_4(%arg0: i32) -> (i32, i32) {
    %c0_i32 = arith.constant 0 : i32
    %c0_i32_0 = arith.constant 0 : i32
    %c0_i32_1 = arith.constant 0 : i32
    return %c0_i32, %c0_i32_0 : i32, i32
  }
  func.func @transform_5(%arg0: i32) -> (i32, i32, i32) {
    %c0_i32 = arith.constant 0 : i32
    %c0_i32_0 = arith.constant 0 : i32
    %c0_i32_1 = arith.constant 0 : i32
    %c0_i32_2 = arith.constant 0 : i32
    return %c0_i32, %c0_i32_0, %c0_i32_1 : i32, i32, i32
  }
  func.func @transform_6(%arg0: i32) -> (i32, i32) {
    %c0_i32 = arith.constant 0 : i32
    %c0_i32_0 = arith.constant 0 : i32
    %c0_i32_1 = arith.constant 0 : i32
    return %c0_i32, %c0_i32_0 : i32, i32
  }
  func.func @transform_7(%arg0: i32) -> (i32, i32, i32) {
    %c0_i32 = arith.constant 0 : i32
    %c0_i32_0 = arith.constant 0 : i32
    %c0_i32_1 = arith.constant 0 : i32
    %c0_i32_2 = arith.constant 0 : i32
    return %c0_i32, %c0_i32_0, %c0_i32_1 : i32, i32, i32
  }
  func.func @transform_8(%arg0: i32) -> (i32, i32) {
    %c0_i32 = arith.constant 0 : i32
    %c0_i32_0 = arith.constant 0 : i32
    %c0_i32_1 = arith.constant 0 : i32
    return %c0_i32, %c0_i32_0 : i32, i32
  }
  func.func @transform_9(%arg0: i32) -> (i32, i32) {
    %c0_i32 = arith.constant 0 : i32
    %c0_i32_0 = arith.constant 0 : i32
    %c0_i32_1 = arith.constant 0 : i32
    return %c0_i32, %c0_i32_0 : i32, i32
  }
  func.func @transform_10(%arg0: i32) -> (i32, i32) {
    %c0_i32 = arith.constant 0 : i32
    %c0_i32_0 = arith.constant 0 : i32
    %c0_i32_1 = arith.constant 0 : i32
    return %c0_i32, %c0_i32_0 : i32, i32
  }
  func.func @transform_11(%arg0: i32) -> (i32, i32) {
    %c0_i32 = arith.constant 0 : i32
    %c0_i32_0 = arith.constant 0 : i32
    return %c0_i32, %arg0 : i32, i32
  }
}

</mosaic_0001>

<bundles_post_ra>
// kernel: tpu_custom_call.1
= control target key start
LH: loop header
LB: loop body
LE: loop exit
PB: predicated region body
PF: predicated region fallthrough
CT: control target
= control target key end

     0   :  { %s6526_s0 = inlined_call_operand.vmem [shape: f32[128,64], index: 0, kind: input, shape index: {}]   ;;  %s6527_s1 = inlined_call_operand.vmem [shape: f32[64,32], index: 1, kind: input, shape index: {}]   ;;  %s6528_s2 = inlined_call_operand.vmem [shape: f32[1,32], index: 2, kind: input, shape index: {}]   ;;  %s6529_s3 = inlined_call_operand.vmem [shape: f32[4,32], index: 3, kind: input, shape index: {}]   ;;  %s6530_s4 = inlined_call_operand.vmem [shape: f32[4,32], index: 4, kind: input, shape index: {}]   ;;  %s6531_s5 = inlined_call_operand.vmem [shape: f32[4,32,32], index: 5, kind: input, shape index: {}]   ;;  %s6532_s6 = inlined_call_operand.vmem [shape: f32[4,32], index: 6, kind: input, shape index: {}]   ;;  %s6533_s7 = inlined_call_operand.vmem [shape: f32[4,32,32], index: 7, kind: input, shape index: {}]   ;;  %s6534_s8 = inlined_call_operand.vmem [shape: f32[4,32], index: 8, kind: input, shape index: {}]   ;;  %s6535_s9 = inlined_call_operand.vmem [shape: f32[1,32], index: 9, kind: input, shape index: {}]   ;;  %s6536_s10 = inlined_call_operand.<no memory space> [shape: f32[1,1], index: 10, kind: input, shape index: {}]   ;;  %s6537_s11 = inlined_call_operand.hbm [shape: f32[1,128], index: 11, kind: output, shape index: {}]  }
   0x1   :  { %v16_v0 = vstv %s6536_s10 }
   0x2   :  { %17 = vst [vmem:[#allocation2] sm:$0x1] %v16_v0 }
   0x3   :  { %v57_v1 = vld [vmem:[%s6527_s1] sm:$0xff]  ;;  %v58_v2 = vld [vmem:[%s6527_s1 + $0x8] sm:$0xff]  ;;  %v59_v3 = vld [vmem:[%s6527_s1 + $0x10] sm:$0xff]  ;;  %vm72_vm0 = vcmask 523264  }
   0x4   :  { %v4451_v4 = vpack.c.bf16 %v58_v2, %v57_v1  ;;  %v60_v5 = vld [vmem:[%s6527_s1 + $0x18] sm:$0xff]  ;;  %v61_v7 = vld [vmem:[%s6527_s1 + $0x20] sm:$0xff]  ;;  %v62_v8 = vld [vmem:[%s6527_s1 + $0x28] sm:$0xff] }
   0x5   :  { %v4455_v6 = vpack.c.bf16 %v60_v5, %v59_v3  ;;  %v41_v9 = vld [vmem:[%s6526_s0] sm:$0xff]  ;;  %v4459_v10 = vpack.c.bf16 %v62_v8, %v61_v7  ;;  %v63_v11 = vld [vmem:[%s6527_s1 + $0x30] sm:$0xff]  ;;  %v64_v12 = vld [vmem:[%s6527_s1 + $0x38] sm:$0xff] }
   0x6   :  { %4452 = vmatprep.subr.bf16.mxu0 %v4451_v4  ;;  %4171 = vmatprep.mubr.msk.f32.mxu0 %vm72_vm0, %v41_v9 }
   0x7   :  { %4454 = vmatpush3.bf16.msra.mxu0 %v4451_v4 }
   0x8   :  { %4456 = vmatprep.subr.bf16.mxu0 %v4455_v6 }
   0xb   :  { %4458 = vmatpush3.bf16.msra.mxu0 %v4455_v6 }
   0xc   :  { %18 = vsyncpa [#allocation4], 0  ;;  %4460 = vmatprep.subr.bf16.mxu0 %v4459_v10  ;;  %v4463_v13 = vpack.c.bf16 %v64_v12, %v63_v11  ;;  %v42_v14 = vld [vmem:[%s6526_s0 + $0x8] sm:$0xff]  ;;  %v43_v15 = vld [vmem:[%s6526_s0 + $0x10] sm:$0xff]  ;;  %vm348_vm1 = vcmask 261120   ;;  %vm3669_vm2 = vcmask 130112  }
   0xd   :  { %v44_v16 = vld [vmem:[%s6526_s0 + $0x18] sm:$0xff]  ;;  %v45_v17 = vld [vmem:[%s6526_s0 + $0x20] sm:$0xff]  ;;  %v46_v18 = vld [vmem:[%s6526_s0 + $0x28] sm:$0xff]  ;;  %vm3676_vm3 = vcmask 195712   ;;  %vm3683_vm4 = vcmask 261312   ;;  %vm3690_vm5 = vcmask 326912  }
   0xe   :  { %v47_v19 = vld [vmem:[%s6526_s0 + $0x30] sm:$0xff]  ;;  %v48_v20 = vld [vmem:[%s6526_s0 + $0x38] sm:$0xff]  ;;  %v49_v21 = vld [vmem:[%s6526_s0 + $0x40] sm:$0xff]  ;;  %vm3697_vm6 = vcmask 392512   ;;  %vm3704_vm7 = vcmask 458112   ;;  %vm3711_vm8 = vcmask 523712  }
   0xf   :  { %4462 = vmatpush3.bf16.msra.mxu0 %v4459_v10  ;;  %v50_v22 = vld [vmem:[%s6526_s0 + $0x48] sm:$0xff]  ;;  %v51_v23 = vld [vmem:[%s6526_s0 + $0x50] sm:$0xff]  ;;  %v52_v24 = vld [vmem:[%s6526_s0 + $0x58] sm:$0xff]  ;;  %vm3718_vm9 = vcmask 589312   ;;  %vm3725_vm10 = vcmask 654912   ;;  %vm3732_vm11 = vcmask 720512  }
  0x10   :  { %4464 = vmatprep.subr.bf16.mxu0 %v4463_v13  ;;  %v53_v25 = vld [vmem:[%s6526_s0 + $0x60] sm:$0xff]  ;;  %v54_v26 = vld [vmem:[%s6526_s0 + $0x68] sm:$0xff]  ;;  %v55_v27 = vld [vmem:[%s6526_s0 + $0x70] sm:$0xff]  ;;  %vm3739_vm12 = vcmask 786112   ;;  %vm3746_vm13 = vcmask 851712   ;;  %vm3753_vm14 = vcmask 917312  }
  0x11   :  { %v56_v28 = vld [vmem:[%s6526_s0 + $0x78] sm:$0xff]  ;;  %v645_v29 = vld [vmem:[%s6531_s5] sm:$0xff]  ;;  %v646_v30 = vld [vmem:[%s6531_s5 + $0x8] sm:$0xff]  ;;  %vm3760_vm15 = vcmask 982912  }
  0x12   :  { %v4467_v31 = vpack.c.bf16 %v646_v30, %v645_v29  ;;  %v5013_v32 = vld [vmem:[%s6528_s2] ss:$0 sm:$0xff] }
  0x13   :  { %4466 = vmatpush3.bf16.msra.mxu0 %v4463_v13 }
  0x14   :  { %4468 = vmatprep.subr.bf16.mxu0 %v4467_v31  ;;  %4531 = vmatprep.subr.bf16.mxu1 %v4467_v31 }
  0x15   :  { %4533 = vmatpush3.bf16.msra.mxu1 %v4467_v31 }
  0x16   :  { %4172 = vmatmul.mubr.msk.f32.vlgmr.msra.gmra.mrb[0].mxu0 %vm72_vm0, %v42_v14 }
  0x17   :  { %4174 = vmatprep.mubr.msk.f32.mxu0 %vm72_vm0, %v43_v15  ;;  %4470 = vmatpush3.bf16.msra.mxu0 %v4467_v31 }
  0x1a   :  { %4175 = vmatmul.mubr.msk.f32.gmra.mrb[2].mxu0 %vm72_vm0, %v44_v16 }
  0x1b   :  { %4177 = vmatprep.mubr.msk.f32.mxu0 %vm72_vm0, %v45_v17 }
  0x1e   :  { %4178 = vmatmul.mubr.msk.f32.gmra.mrb[4].mxu0 %vm72_vm0, %v46_v18 }
  0x1f   :  { %4180 = vmatprep.mubr.msk.f32.mxu0 %vm72_vm0, %v47_v19 }
  0x22   :  { %4181 = vmatmul.mubr.msk.f32.gmra.mrb[6].mxu0 %vm72_vm0, %v48_v20 }
  0x23   :  { %4183 = vmatprep.mubr.msk.f32.mxu0 %vm72_vm0, %v49_v21 }
  0x26   :  { %4184 = vmatmul.mubr.msk.f32.gmra.mrb[8].mxu0 %vm72_vm0, %v50_v22 }
  0x27   :  { %4186 = vmatprep.mubr.msk.f32.mxu0 %vm72_vm0, %v51_v23 }
  0x2a   :  { %4187 = vmatmul.mubr.msk.f32.gmra.mrb[10].mxu0 %vm72_vm0, %v52_v24 }
  0x2b   :  { %4189 = vmatprep.mubr.msk.f32.mxu0 %vm72_vm0, %v53_v25 }
  0x2e   :  { %4190 = vmatmul.mubr.msk.f32.gmra.mrb[12].mxu0 %vm72_vm0, %v54_v26 }
  0x2f   :  { %4192 = vmatprep.mubr.msk.f32.mxu0 %vm72_vm0, %v55_v27 }
  0x32   :  { %4193 = vmatmul.mubr.msk.f32.gmra.mrb[14].mxu0 %vm72_vm0, %v56_v28  ;;  %vm3767_vm0 = vcmask 1048512  }
  0xe9   :  { %v4173_v33 = vpop.f32.mrb[0].mxu0 }
  0xea   :  { %v193_v34 = vadd.f32 %v4173_v33, %v5013_v32  ;;  %v187_v35 = vpop.f32.mrb[1].mxu0 }
  0xeb   :  { %v188_v36 = vadd.f32 %v5013_v32, %v187_v35 }
  0xec   :  { %v283_v37 = vmul.f32 0.70710677, %v193_v34  ;;  %v267_v56 = vmul.f32 0.5, %v193_v34 }
  0xed   :  { %v282_v38 = vmul.f32 0.70710677, %v188_v36  ;;  %v4176_v39 = vpop.f32.mrb[2].mxu0  ;;  %v266_v58 = vmul.f32 0.5, %v188_v36 }
  0xee   :  { %4539 = verf.f32 %v283_v37  ;;  %v203_v40 = vadd.f32 %v4176_v39, %v5013_v32  ;;  %v197_v41 = vpop.f32.mrb[3].mxu0 }
  0xef   :  { %4541 = verf.f32 %v282_v38  ;;  %v198_v42 = vadd.f32 %v5013_v32, %v197_v41 }
  0xf0   :  { %v285_v43 = vmul.f32 0.70710677, %v203_v40  ;;  %v269_v15 = vmul.f32 0.5, %v203_v40 }
  0xf1   :  { %v284_v44 = vmul.f32 0.70710677, %v198_v42  ;;  %v4179_v45 = vpop.f32.mrb[4].mxu0  ;;  %v268_v12 = vmul.f32 0.5, %v198_v42 }
  0xf2   :  { %4543 = verf.f32 %v285_v43  ;;  %v5020_v46 = vadd.f32 %v4179_v45, %v5013_v32  ;;  %v207_v47 = vpop.f32.mrb[5].mxu0 }
  0xf3   :  { %4545 = verf.f32 %v284_v44  ;;  %v208_v48 = vadd.f32 %v5013_v32, %v207_v47 }
  0xf4   :  { %v287_v51 = vmul.f32 0.70710677, %v5020_v46  ;;  %v271_v39 = vmul.f32 0.5, %v5020_v46 }
  0xf5   :  { %v286_v49 = vmul.f32 0.70710677, %v208_v48  ;;  %v4182_v50 = vpop.f32.mrb[6].mxu0  ;;  %v270_v35 = vmul.f32 0.5, %v208_v48 }
  0xf6   :  { %v217_v52 = vpop.f32.mrb[7].mxu0  ;;  %v5028_v61 = vadd.f32 %v4182_v50, %v5013_v32 }
  0xf7   :  { %v5025_v53 = vadd.f32 %v5013_v32, %v217_v52  ;;  %4547 = verf.f32 %v286_v49 }
  0xf8   :  { %v4540_v54 = vpop.eup %4539  ;;  %4549 = verf.f32 %v287_v51  ;;  %v289_v8 = vmul.f32 0.70710677, %v5028_v61  ;;  %v273_v51 = vmul.f32 0.5, %v5028_v61 }
  0xf9   :  { %v4542_v55 = vpop.eup %4541  ;;  %v315_v57 = vadd.f32 1.0, %v4540_v54  ;;  %v4185_v59 = vpop.f32.mrb[8].mxu0  ;;  %v288_v62 = vmul.f32 0.70710677, %v5025_v53  ;;  %v272_v45 = vmul.f32 0.5, %v5025_v53 }
  0xfa   :  { %v314_v60 = vadd.f32 1.0, %v4542_v55  ;;  %v227_v63 = vpop.f32.mrb[9].mxu0  ;;  %v233_v20 = vadd.f32 %v4185_v59, %v5013_v32 }
  0xfb   :  { %v5031_v0 = vmul.f32 %v315_v57, %v267_v56  ;;  %4551 = verf.f32 %v288_v62  ;;  %v5041_v9 = vadd.f32 %v5013_v32, %v227_v63 }
  0xfc   :  { %v4544_v1 = vpop.eup %4543  ;;  %v5033_v2 = vmul.f32 %v314_v60, %v266_v58  ;;  %4553 = verf.f32 %v289_v8  ;;  %v291_v30 = vmul.f32 0.70710677, %v233_v20 }
  0xfd   :  { %v4546_v3 = vpop.eup %4545  ;;  %v352_v4 = vsel %vm348_vm1, %v5031_v0, 0.0  ;;  %v398_v5 = vmul.f32 %v5031_v0, %v5031_v0  ;;  %v4188_v6 = vpop.f32.mrb[10].mxu0  ;;  %v317_v11 = vadd.f32 1.0, %v4544_v1  ;;  %v290_v21 = vmul.f32 0.70710677, %v5041_v9 }
  0xfe   :  { %v316_v7 = vadd.f32 1.0, %v4546_v3  ;;  %353 = vadd.xlane.f32.xlu0 %v352_v4  ;;  %v237_v10 = vpop.f32.mrb[11].mxu0  ;;  %v397_v14 = vmul.f32 %v5033_v2, %v5033_v2  ;;  %v349_v17 = vsel %vm348_vm1, %v5033_v2, 0.0  ;;  %v243_v42 = vadd.f32 %v4188_v6, %v5013_v32 }
  0xff   :  { %v416_v13 = vsel %vm348_vm1, %v398_v5, 0.0  ;;  %v5052_v23 = vmul.f32 %v317_v11, %v269_v15  ;;  %4555 = verf.f32 %v290_v21  ;;  %v238_v31 = vadd.f32 %v5013_v32, %v237_v10 }
 0x100   :  { %417 = vadd.xlane.f32.xlu1 %v416_v13  ;;  %v5046_v16 = vmul.f32 %v316_v7, %v268_v12  ;;  %v413_v24 = vsel %vm348_vm1, %v397_v14, 0.0  ;;  %4557 = verf.f32 %v291_v30  ;;  %v293_v52 = vmul.f32 0.70710677, %v243_v42 }
 0x101   :  { %v4191_v18 = vpop.f32.mrb[12].mxu0  ;;  %v4548_v19 = vpop.eup %4547  ;;  %v358_v36 = vsel %vm348_vm1, %v5052_v23, 0.0  ;;  %v400_v37 = vmul.f32 %v5052_v23, %v5052_v23  ;;  %v292_v43 = vmul.f32 0.70710677, %v238_v31  ;;  %v274_v60 = vmul.f32 0.5, %v5041_v9 }
 0x102   :  { %350 = vadd.xlane.f32.xlu0 %v349_v17  ;;  %v247_v22 = vpop.f32.mrb[13].mxu0  ;;  %v4550_v25 = vpop.eup %4549  ;;  %v318_v26 = vadd.f32 1.0, %v4548_v19  ;;  %v355_v27 = vsel %vm348_vm1, %v5046_v16, 0.0  ;;  %v399_v28 = vmul.f32 %v5046_v16, %v5046_v16  ;;  %v253_v61 = vadd.f32 %v4191_v18, %v5013_v32 }
 0x103   :  { %v319_v34 = vadd.f32 1.0, %v4550_v25  ;;  %v422_v48 = vsel %vm348_vm1, %v400_v37, 0.0  ;;  %4559 = verf.f32 %v292_v43  ;;  %v248_v54 = vadd.f32 %v5013_v32, %v247_v22 }
 0x104   :  { %414 = vadd.xlane.f32.xlu1 %v413_v24  ;;  %v5067_v40 = vmul.f32 %v318_v26, %v270_v35  ;;  %v419_v41 = vsel %vm348_vm1, %v399_v28, 0.0  ;;  %4561 = verf.f32 %v293_v52  ;;  %v275_v7 = vmul.f32 0.5, %v233_v20 }
 0x105   :  { %v5059_v29 = vpop.f32.mrb[14].mxu0  ;;  %v4552_v38 = vpop.eup %4551  ;;  %v5071_v44 = vmul.f32 %v319_v34, %v271_v39  ;;  %v294_v62 = vmul.f32 0.70710677, %v248_v54  ;;  %v295_v8 = vmul.f32 0.70710677, %v253_v61  ;;  %v276_v17 = vmul.f32 0.5, %v238_v31 }
 0x106   :  { %356 = vadd.xlane.f32.xlu0 %v355_v27  ;;  %v257_v33 = vpop.f32.mrb[15].mxu0  ;;  %v320_v47 = vadd.f32 1.0, %v4552_v38  ;;  %v4554_v49 = vpop.eup %4553  ;;  %v361_v46 = vsel %vm348_vm1, %v5067_v40, 0.0  ;;  %v401_v50 = vmul.f32 %v5067_v40, %v5067_v40  ;;  %v263_v18 = vadd.f32 %v5059_v29, %v5013_v32 }
 0x107   :  { %v321_v55 = vadd.f32 1.0, %v4554_v49  ;;  %v364_v56 = vsel %vm348_vm1, %v5071_v44, 0.0  ;;  %v402_v57 = vmul.f32 %v5071_v44, %v5071_v44  ;;  %4563 = verf.f32 %v294_v62 }
 0x108   :  { %359 = vadd.xlane.f32.xlu1 %v358_v36  ;;  %v5081_v53 = vmul.f32 %v320_v47, %v272_v45  ;;  %v425_v59 = vsel %vm348_vm1, %v401_v50, 0.0  ;;  %v258_v9 = vadd.f32 %v5013_v32, %v257_v33  ;;  %4565 = verf.f32 %v295_v8 }
 0x109   :  { %v4556_v58 = vpop.eup %4555  ;;  %v5090_v63 = vmul.f32 %v321_v55, %v273_v51  ;;  %v428_v3 = vsel %vm348_vm1, %v402_v57, 0.0  ;;  %v277_v27 = vmul.f32 0.5, %v243_v42  ;;  %v297_v28 = vmul.f32 0.70710677, %v263_v18  ;;  %v648_v42 = vld [vmem:[%s6531_s5 + $0x18] sm:$0xff] }
 0x10a   :  { %420 = vadd.xlane.f32.xlu0 %v419_v41  ;;  %v322_v1 = vadd.f32 1.0, %v4556_v58  ;;  %v367_v4 = vsel %vm348_vm1, %v5081_v53, 0.0  ;;  %v4558_v5 = vpop.eup %4557  ;;  %v403_v6 = vmul.f32 %v5081_v53, %v5081_v53  ;;  %v296_v19 = vmul.f32 0.70710677, %v258_v9  ;;  %v647_v41 = vld [vmem:[%s6531_s5 + $0x10] sm:$0xff] }
 0x10b   :  { %v323_v10 = vadd.f32 1.0, %v4558_v5  ;;  %v370_v12 = vsel %vm348_vm1, %v5090_v63, 0.0  ;;  %v404_v13 = vmul.f32 %v5090_v63, %v5090_v63  ;;  %v278_v35 = vmul.f32 0.5, %v248_v54 }
 0x10c   :  { %423 = vadd.xlane.f32.xlu1 %v422_v48  ;;  %v5098_v11 = vmul.f32 %v322_v1, %v274_v60  ;;  %v431_v15 = vsel %vm348_vm1, %v403_v6, 0.0  ;;  %4567 = verf.f32 %v296_v19  ;;  %v4471_v45 = vpack.c.bf16 %v648_v42, %v647_v41 }
 0x10d   :  { %v4560_v14 = vpop.eup %4559  ;;  %v5107_v20 = vmul.f32 %v323_v10, %v275_v7  ;;  %v434_v22 = vsel %vm348_vm1, %v404_v13, 0.0  ;;  %4569 = verf.f32 %v297_v28  ;;  %v279_v48 = vmul.f32 0.5, %v253_v61 }
 0x10e   :  { %362 = vadd.xlane.f32.xlu0 %v361_v46  ;;  %v324_v21 = vadd.f32 1.0, %v4560_v14  ;;  %v373_v24 = vsel %vm348_vm1, %v5098_v11, 0.0  ;;  %v4562_v25 = vpop.eup %4561  ;;  %v405_v26 = vmul.f32 %v5098_v11, %v5098_v11  ;;  %4472 = vmatprep.subr.bf16.mxu0 %v4471_v45  ;;  %v280_v55 = vmul.f32 0.5, %v258_v9 }
 0x10f   :  { %v325_v30 = vadd.f32 1.0, %v4562_v25  ;;  %v376_v29 = vsel %vm348_vm1, %v5107_v20, 0.0  ;;  %v406_v31 = vmul.f32 %v5107_v20, %v5107_v20  ;;  %4474 = vmatpush3.bf16.msra.mxu0 %v4471_v45  ;;  %4532 = vmatprep.subr.bf16.mxu1 %v4471_v45  ;;  %v281_v62 = vmul.f32 0.5, %v263_v18 }
 0x110   :  { %365 = vadd.xlane.f32.xlu1 %v364_v56  ;;  %v5114_v32 = vmul.f32 %v324_v21, %v276_v17  ;;  %v437_v34 = vsel %vm348_vm1, %v405_v26, 0.0  ;;  %4534 = vmatpush3.bf16.msra.mxu1 %v4471_v45 }
 0x111   :  { %v4564_v33 = vpop.eup %4563  ;;  %v5121_v36 = vmul.f32 %v325_v30, %v277_v27  ;;  %v440_v38 = vsel %vm348_vm1, %v406_v31, 0.0 }
 0x112   :  { %426 = vadd.xlane.f32.xlu0 %v425_v59  ;;  %v326_v37 = vadd.f32 1.0, %v4564_v33  ;;  %v379_v39 = vsel %vm348_vm1, %v5114_v32, 0.0  ;;  %v4566_v43 = vpop.eup %4565  ;;  %v407_v47 = vmul.f32 %v5114_v32, %v5114_v32 }
 0x113   :  { %v327_v49 = vadd.f32 1.0, %v4566_v43  ;;  %v382_v50 = vsel %vm348_vm1, %v5121_v36, 0.0  ;;  %v408_v51 = vmul.f32 %v5121_v36, %v5121_v36 }
 0x114   :  { %429 = vadd.xlane.f32.xlu1 %v428_v3  ;;  %v5134_v46 = vmul.f32 %v326_v37, %v278_v35  ;;  %v443_v54 = vsel %vm348_vm1, %v407_v47, 0.0 }
 0x115   :  { %v5141_v56 = vmul.f32 %v327_v49, %v279_v48  ;;  %v446_v58 = vsel %vm348_vm1, %v408_v51, 0.0 }
 0x116   :  { %368 = vadd.xlane.f32.xlu0 %v367_v4  ;;  %v4568_v52 = vpop.eup %4567  ;;  %v385_v59 = vsel %vm348_vm1, %v5134_v46, 0.0  ;;  %v409_v61 = vmul.f32 %v5134_v46, %v5134_v46 }
 0x117   :  { %v328_v57 = vadd.f32 1.0, %v4568_v52  ;;  %v4570_v60 = vpop.eup %4569  ;;  %v388_v4 = vsel %vm348_vm1, %v5141_v56, 0.0  ;;  %v410_v5 = vmul.f32 %v5141_v56, %v5141_v56 }
 0x118   :  { %371 = vadd.xlane.f32.xlu1 %v370_v12  ;;  %v329_v1 = vadd.f32 1.0, %v4570_v60  ;;  %v449_v6 = vsel %vm348_vm1, %v409_v61, 0.0 }
 0x119   :  { %v5148_v3 = vmul.f32 %v328_v57, %v280_v55  ;;  %v452_v8 = vsel %vm348_vm1, %v410_v5, 0.0 }
 0x11a   :  { %432 = vadd.xlane.f32.xlu0 %v431_v15  ;;  %v5155_v7 = vmul.f32 %v329_v1, %v281_v62 }
 0x11b   :  { %v391_v9 = vsel %vm348_vm1, %v5148_v3, 0.0  ;;  %v411_v10 = vmul.f32 %v5148_v3, %v5148_v3 }
 0x11c   :  { %435 = vadd.xlane.f32.xlu1 %v434_v22  ;;  %v394_v12 = vsel %vm348_vm1, %v5155_v7, 0.0  ;;  %v412_v13 = vmul.f32 %v5155_v7, %v5155_v7 }
 0x11d   :  { %v455_v14 = vsel %vm348_vm1, %v411_v10, 0.0  ;;  %v5186_v10 = vld [vmem:[%s6529_s3] ss:$0 sm:$0xff] }
 0x11e   :  { %374 = vadd.xlane.f32.xlu0 %v373_v24  ;;  %v458_v15 = vsel %vm348_vm1, %v412_v13, 0.0 }
 0x120   :  { %377 = vadd.xlane.f32.xlu1 %v376_v29 }
 0x122   :  { %438 = vadd.xlane.f32.xlu0 %v437_v34 }
 0x124   :  { %441 = vadd.xlane.f32.xlu1 %v440_v38 }
 0x126   :  { %380 = vadd.xlane.f32.xlu0 %v379_v39 }
 0x128   :  { %383 = vadd.xlane.f32.xlu1 %v382_v50 }
 0x12a   :  { %444 = vadd.xlane.f32.xlu0 %v443_v54 }
 0x12c   :  { %447 = vadd.xlane.f32.xlu1 %v446_v58 }
 0x12e   :  { %386 = vadd.xlane.f32.xlu0 %v385_v59 }
 0x130   :  { %389 = vadd.xlane.f32.xlu1 %v388_v4 }
 0x132   :  { %450 = vadd.xlane.f32.xlu0 %v449_v6 }
 0x134   :  { %453 = vadd.xlane.f32.xlu1 %v452_v8 }
 0x136   :  { %392 = vadd.xlane.f32.xlu0 %v391_v9 }
 0x138   :  { %395 = vadd.xlane.f32.xlu1 %v394_v12 }
 0x13a   :  { %456 = vadd.xlane.f32.xlu0 %v455_v14 }
 0x13c   :  { %459 = vadd.xlane.f32.xlu1 %v458_v15 }
 0x18b   :  { %v354_v17 = vpop.xlane.xlu0 %353 }
 0x18c   :  { %v462_v18 = vmul.f32 0.03125, %v354_v17 }
 0x18d   :  { %v418_v19 = vpop.xlane.xlu1 %417 }
 0x18e   :  { %v494_v21 = vmul.f32 %v462_v18, %v462_v18  ;;  %v478_v22 = vmul.f32 0.03125, %v418_v19  ;;  %v542_v60 = vsub.f32 %v5031_v0, %v462_v18 }
 0x18f   :  { %v351_v24 = vpop.xlane.xlu0 %350 }
 0x190   :  { %v510_v25 = vsub.f32 %v478_v22, %v494_v21  ;;  %v461_v26 = vmul.f32 0.03125, %v351_v24 }
 0x191   :  { %v415_v27 = vpop.xlane.xlu1 %414 }
 0x192   :  { %v526_v28 = vmax.f32 %v510_v25, 0.0  ;;  %v493_v30 = vmul.f32 %v461_v26, %v461_v26  ;;  %v477_v29 = vmul.f32 0.03125, %v415_v27  ;;  %v541_v15 = vsub.f32 %v5033_v2, %v461_v26 }
 0x193   :  { %v357_v31 = vpop.xlane.xlu0 %356 }
 0x194   :  { %v558_v33 = vadd.f32 1e-05, %v526_v28  ;;  %v509_v34 = vsub.f32 %v477_v29, %v493_v30  ;;  %v5168_v35 = vmul.f32 0.03125, %v357_v31  ;;  %v5197_v29 = vld [vmem:[%s6530_s4] ss:$0 sm:$0xff] }
 0x195   :  { %v360_v37 = vpop.xlane.xlu1 %359 }
 0x196   :  { %4571 = vrsqrt.f32 %v558_v33  ;;  %v525_v38 = vmax.f32 %v509_v34, 0.0  ;;  %v5170_v39 = vmul.f32 0.03125, %v360_v37  ;;  %v495_v43 = vmul.f32 %v5168_v35, %v5168_v35 }
 0x197   :  { %v421_v41 = vpop.xlane.xlu0 %420 }
 0x198   :  { %v557_v42 = vadd.f32 1e-05, %v525_v38  ;;  %v479_v45 = vmul.f32 0.03125, %v421_v41  ;;  %v496_v48 = vmul.f32 %v5170_v39, %v5170_v39  ;;  %v543_v41 = vsub.f32 %v5046_v16, %v5168_v35 }
 0x199   :  { %v424_v47 = vpop.xlane.xlu1 %423 }
 0x19a   :  { %4573 = vrsqrt.f32 %v557_v42  ;;  %v511_v49 = vsub.f32 %v479_v45, %v495_v43  ;;  %v480_v50 = vmul.f32 0.03125, %v424_v47 }
 0x19b   :  { %v363_v51 = vpop.xlane.xlu0 %362 }
 0x19c   :  { %v527_v52 = vmax.f32 %v511_v49, 0.0  ;;  %v512_v54 = vsub.f32 %v480_v50, %v496_v48  ;;  %v5176_v55 = vmul.f32 0.03125, %v363_v51  ;;  %v544_v51 = vsub.f32 %v5052_v23, %v5170_v39 }
 0x19d   :  { %v366_v57 = vpop.xlane.xlu1 %365 }
 0x19e   :  { %v559_v58 = vadd.f32 1e-05, %v527_v52  ;;  %v528_v59 = vmax.f32 %v512_v54, 0.0  ;;  %v5179_v61 = vmul.f32 0.03125, %v366_v57  ;;  %v497_v5 = vmul.f32 %v5176_v55, %v5176_v55 }
 0x19f   :  { %v427_v62 = vpop.xlane.xlu0 %426 }
 0x1a0   :  { %v4572_v1 = vpop.eup %4571  ;;  %4575 = vrsqrt.f32 %v559_v58  ;;  %v560_v4 = vadd.f32 1e-05, %v528_v59  ;;  %v481_v6 = vmul.f32 0.03125, %v427_v62  ;;  %v498_v12 = vmul.f32 %v5179_v61, %v5179_v61 }
 0x1a1   :  { %v590_v8 = vmul.f32 %v4572_v1, %v542_v60  ;;  %v430_v9 = vpop.xlane.xlu1 %429 }
 0x1a2   :  { %4577 = vrsqrt.f32 %v560_v4  ;;  %v513_v13 = vsub.f32 %v481_v6, %v497_v5  ;;  %v482_v14 = vmul.f32 0.03125, %v430_v9 }
 0x1a3   :  { %v369_v17 = vpop.xlane.xlu0 %368  ;;  %v610_v24 = vmul.f32 %v5186_v10, %v590_v8 }
 0x1a4   :  { %v4574_v18 = vpop.eup %4573  ;;  %v529_v19 = vmax.f32 %v513_v13, 0.0  ;;  %v514_v21 = vsub.f32 %v482_v14, %v498_v12  ;;  %v5191_v22 = vmul.f32 0.03125, %v369_v17 }
 0x1a5   :  { %v372_v25 = vpop.xlane.xlu1 %371  ;;  %v589_v27 = vmul.f32 %v4574_v18, %v541_v15  ;;  %v630_v45 = vadd.f32 %v5197_v29, %v610_v24  ;;  %v545_v15 = vsub.f32 %v5067_v40, %v5176_v55 }
 0x1a6   :  { %v561_v28 = vadd.f32 1e-05, %v529_v19  ;;  %v530_v30 = vmax.f32 %v514_v21, 0.0  ;;  %v5199_v31 = vmul.f32 0.03125, %v372_v25  ;;  %v499_v37 = vmul.f32 %v5191_v22, %v5191_v22 }
 0x1a7   :  { %v433_v26 = vpop.xlane.xlu0 %432  ;;  %v609_v33 = vmul.f32 %v5186_v10, %v589_v27  ;;  %v546_v27 = vsub.f32 %v5071_v44, %v5179_v61 }
 0x1a8   :  { %4579 = vrsqrt.f32 %v561_v28  ;;  %v562_v34 = vadd.f32 1e-05, %v530_v30  ;;  %v483_v38 = vmul.f32 0.03125, %v433_v26  ;;  %v500_v48 = vmul.f32 %v5199_v31, %v5199_v31 }
 0x1a9   :  { %v436_v42 = vpop.xlane.xlu1 %435  ;;  %v629_v43 = vadd.f32 %v5197_v29, %v609_v33 }
 0x1aa   :  { %v4576_v47 = vpop.eup %4575  ;;  %4581 = vrsqrt.f32 %v562_v34  ;;  %v515_v49 = vsub.f32 %v483_v38, %v499_v37  ;;  %v484_v50 = vmul.f32 0.03125, %v436_v42 }
 0x1ab   :  { %4203 = vmatprep.mubr.msk.f32.mxu0 %vm348_vm1, %v629_v43  ;;  %v375_v52 = vpop.xlane.xlu0 %374  ;;  %v591_v54 = vmul.f32 %v4576_v47, %v543_v41 }
 0x1ac   :  { %v4578_v35 = vpop.eup %4577  ;;  %v531_v57 = vmax.f32 %v515_v49, 0.0  ;;  %v516_v58 = vsub.f32 %v484_v50, %v500_v48  ;;  %v5213_v59 = vmul.f32 0.03125, %v375_v52  ;;  %4204 = vmatmul.mubr.msk.f32.vlgmr.msra.gmra.mrb[16].mxu0 %vm348_vm1, %v630_v45  ;;  %v547_v52 = vsub.f32 %v5081_v53, %v5191_v22 }
 0x1ad   :  { %v378_v60 = vpop.xlane.xlu1 %377  ;;  %v611_v62 = vmul.f32 %v5186_v10, %v591_v54  ;;  %v592_v1 = vmul.f32 %v4578_v35, %v544_v51 }
 0x1ae   :  { %v563_v4 = vadd.f32 1e-05, %v531_v57  ;;  %v532_v5 = vmax.f32 %v516_v58, 0.0  ;;  %v5217_v6 = vmul.f32 0.03125, %v378_v60  ;;  %v501_v13 = vmul.f32 %v5213_v59, %v5213_v59 }
 0x1af   :  { %v439_v39 = vpop.xlane.xlu0 %438  ;;  %v631_v8 = vadd.f32 %v5197_v29, %v611_v62  ;;  %v612_v9 = vmul.f32 %v5186_v10, %v592_v1  ;;  %v548_v1 = vsub.f32 %v5090_v63, %v5199_v31 }
 0x1b0   :  { %4583 = vrsqrt.f32 %v563_v4  ;;  %v564_v12 = vadd.f32 1e-05, %v532_v5  ;;  %v485_v14 = vmul.f32 0.03125, %v439_v39  ;;  %v502_v21 = vmul.f32 %v5217_v6, %v5217_v6 }
 0x1b1   :  { %v442_v17 = vpop.xlane.xlu1 %441  ;;  %4206 = vmatprep.mubr.msk.f32.mxu0 %vm348_vm1, %v631_v8  ;;  %v632_v18 = vadd.f32 %v5197_v29, %v612_v9 }
 0x1b2   :  { %v4580_v19 = vpop.eup %4579  ;;  %4585 = vrsqrt.f32 %v564_v12  ;;  %v517_v24 = vsub.f32 %v485_v14, %v501_v13  ;;  %v486_v25 = vmul.f32 0.03125, %v442_v17 }
 0x1b3   :  { %4207 = vmatmul.mubr.msk.f32.gmra.mrb[18].mxu0 %vm348_vm1, %v632_v18  ;;  %v381_v28 = vpop.xlane.xlu0 %380  ;;  %v593_v30 = vmul.f32 %v4580_v19, %v545_v15 }
 0x1b4   :  { %v4582_v55 = vpop.eup %4581  ;;  %v533_v26 = vmax.f32 %v517_v24, 0.0  ;;  %v518_v33 = vsub.f32 %v486_v25, %v502_v21  ;;  %v5232_v34 = vmul.f32 0.03125, %v381_v28  ;;  %v549_v28 = vsub.f32 %v5098_v11, %v5213_v59 }
 0x1b5   :  { %v384_v37 = vpop.xlane.xlu1 %383  ;;  %v613_v38 = vmul.f32 %v5186_v10, %v593_v30  ;;  %v594_v41 = vmul.f32 %v4582_v55, %v546_v27 }
 0x1b6   :  { %v565_v42 = vadd.f32 1e-05, %v533_v26  ;;  %v534_v43 = vmax.f32 %v518_v33, 0.0  ;;  %v5235_v45 = vmul.f32 0.03125, %v384_v37  ;;  %v503_v50 = vmul.f32 %v5232_v34, %v5232_v34 }
 0x1b7   :  { %v445_v47 = vpop.xlane.xlu0 %444  ;;  %v633_v61 = vadd.f32 %v5197_v29, %v613_v38  ;;  %v614_v48 = vmul.f32 %v5186_v10, %v594_v41  ;;  %v550_v41 = vsub.f32 %v5107_v20, %v5217_v6 }
 0x1b8   :  { %4587 = vrsqrt.f32 %v565_v42  ;;  %v566_v49 = vadd.f32 1e-05, %v534_v43  ;;  %v487_v51 = vmul.f32 0.03125, %v445_v47  ;;  %v504_v58 = vmul.f32 %v5235_v45, %v5235_v45 }
 0x1b9   :  { %v448_v54 = vpop.xlane.xlu1 %447  ;;  %4209 = vmatprep.mubr.msk.f32.mxu0 %vm348_vm1, %v633_v61  ;;  %v634_v35 = vadd.f32 %v5197_v29, %v614_v48 }
 0x1ba   :  { %v4584_v57 = vpop.eup %4583  ;;  %4589 = vrsqrt.f32 %v566_v49  ;;  %v519_v60 = vsub.f32 %v487_v51, %v503_v50  ;;  %v488_v62 = vmul.f32 0.03125, %v448_v54 }
 0x1bb   :  { %4210 = vmatmul.mubr.msk.f32.gmra.mrb[20].mxu0 %vm348_vm1, %v634_v35  ;;  %v387_v4 = vpop.xlane.xlu0 %386  ;;  %v595_v5 = vmul.f32 %v4584_v57, %v547_v52 }
 0x1bc   :  { %v4586_v22 = vpop.eup %4585  ;;  %v535_v39 = vmax.f32 %v519_v60, 0.0  ;;  %v520_v8 = vsub.f32 %v488_v62, %v504_v58  ;;  %v5250_v9 = vmul.f32 0.03125, %v387_v4  ;;  %v551_v4 = vsub.f32 %v5114_v32, %v5232_v34 }
 0x1bd   :  { %v390_v12 = vpop.xlane.xlu1 %389  ;;  %v615_v13 = vmul.f32 %v5186_v10, %v595_v5  ;;  %v596_v14 = vmul.f32 %v4586_v22, %v548_v1 }
 0x1be   :  { %v567_v15 = vadd.f32 1e-05, %v535_v39  ;;  %v536_v17 = vmax.f32 %v520_v8, 0.0  ;;  %v5253_v18 = vmul.f32 0.03125, %v390_v12  ;;  %v505_v25 = vmul.f32 %v5250_v9, %v5250_v9 }
 0x1bf   :  { %v451_v19 = vpop.xlane.xlu0 %450  ;;  %v635_v31 = vadd.f32 %v5197_v29, %v615_v13  ;;  %v616_v21 = vmul.f32 %v5186_v10, %v596_v14  ;;  %v552_v14 = vsub.f32 %v5121_v36, %v5235_v45  ;;  %v553_v45 = vsub.f32 %v5134_v46, %v5250_v9 }
 0x1c0   :  { %4591 = vrsqrt.f32 %v567_v15  ;;  %v568_v24 = vadd.f32 1e-05, %v536_v17  ;;  %v489_v27 = vmul.f32 0.03125, %v451_v19  ;;  %v506_v33 = vmul.f32 %v5253_v18, %v5253_v18 }
 0x1c1   :  { %v454_v30 = vpop.xlane.xlu1 %453  ;;  %4212 = vmatprep.mubr.msk.f32.mxu1 %vm348_vm1, %v635_v31  ;;  %v636_v55 = vadd.f32 %v5197_v29, %v616_v21 }
 0x1c2   :  { %v4588_v26 = vpop.eup %4587  ;;  %4593 = vrsqrt.f32 %v568_v24  ;;  %v521_v37 = vsub.f32 %v489_v27, %v505_v25  ;;  %v490_v38 = vmul.f32 0.03125, %v454_v30 }
 0x1c3   :  { %4213 = vmatmul.mubr.msk.f32.vlgmr.msra.gmra.mrb[0].mxu1 %vm348_vm1, %v636_v55  ;;  %v393_v42 = vpop.xlane.xlu0 %392  ;;  %v597_v43 = vmul.f32 %v4588_v26, %v549_v28 }
 0x1c4   :  { %v4590_v59 = vpop.eup %4589  ;;  %v537_v47 = vmax.f32 %v521_v37, 0.0  ;;  %v522_v61 = vsub.f32 %v490_v38, %v506_v33  ;;  %v475_v48 = vmul.f32 0.03125, %v393_v42  ;;  %v554_v33 = vsub.f32 %v5141_v56, %v5253_v18 }
 0x1c5   :  { %v396_v49 = vpop.xlane.xlu1 %395  ;;  %v617_v50 = vmul.f32 %v5186_v10, %v597_v43  ;;  %v598_v51 = vmul.f32 %v4590_v59, %v550_v41 }
 0x1c6   :  { %v569_v52 = vadd.f32 1e-05, %v537_v47  ;;  %v538_v54 = vmax.f32 %v522_v61, 0.0  ;;  %v476_v35 = vmul.f32 0.03125, %v396_v49  ;;  %v507_v62 = vmul.f32 %v475_v48, %v475_v48 }
 0x1c7   :  { %v457_v57 = vpop.xlane.xlu0 %456  ;;  %v637_v58 = vadd.f32 %v5197_v29, %v617_v50  ;;  %v618_v6 = vmul.f32 %v5186_v10, %v598_v51  ;;  %v555_v59 = vsub.f32 %v5148_v3, %v475_v48 }
 0x1c8   :  { %4595 = vrsqrt.f32 %v569_v52  ;;  %v570_v60 = vadd.f32 1e-05, %v538_v54  ;;  %v491_v1 = vmul.f32 0.03125, %v457_v57  ;;  %v508_v8 = vmul.f32 %v476_v35, %v476_v35 }
 0x1c9   :  { %v460_v5 = vpop.xlane.xlu1 %459  ;;  %4215 = vmatprep.mubr.msk.f32.mxu1 %vm348_vm1, %v637_v58  ;;  %v638_v22 = vadd.f32 %v5197_v29, %v618_v6  ;;  %v556_v18 = vsub.f32 %v5155_v7, %v476_v35  ;;  %v927_v35 = vld [vmem:[%s6533_s7] sm:$0xff]  ;;  %v928_v58 = vld [vmem:[%s6533_s7 + $0x8] sm:$0xff] }
 0x1ca   :  { %v4592_v39 = vpop.eup %4591  ;;  %4597 = vrsqrt.f32 %v570_v60  ;;  %v523_v12 = vsub.f32 %v491_v1, %v507_v62  ;;  %v492_v13 = vmul.f32 0.03125, %v460_v5  ;;  %v4475_v6 = vpack.c.bf16 %v928_v58, %v927_v35  ;;  %v5317_v62 = vld [vmem:[%s6532_s6] ss:$0 sm:$0xff] }
 0x1cb   :  { %4216 = vmatmul.mubr.msk.f32.gmra.mrb[2].mxu1 %vm348_vm1, %v638_v22  ;;  %v599_v15 = vmul.f32 %v4592_v39, %v551_v4 }
 0x1cc   :  { %v4594_v17 = vpop.eup %4593  ;;  %v539_v19 = vmax.f32 %v523_v12, 0.0  ;;  %v524_v31 = vsub.f32 %v492_v13, %v508_v8  ;;  %4476 = vmatprep.subr.bf16.mxu1 %v4475_v6 }
 0x1cd   :  { %v619_v34 = vmul.f32 %v5186_v10, %v599_v15  ;;  %v600_v21 = vmul.f32 %v4594_v17, %v552_v14  ;;  %4478 = vmatpush3.bf16.msra.mxu1 %v4475_v6 }
 0x1ce   :  { %v571_v24 = vadd.f32 1e-05, %v539_v19  ;;  %v540_v25 = vmax.f32 %v524_v31, 0.0 }
 0x1cf   :  { %v639_v27 = vadd.f32 %v5197_v29, %v619_v34  ;;  %v620_v28 = vmul.f32 %v5186_v10, %v600_v21 }
 0x1d0   :  { %4599 = vrsqrt.f32 %v571_v24  ;;  %v572_v30 = vadd.f32 1e-05, %v540_v25 }
 0x1d1   :  { %4218 = vmatprep.mubr.msk.f32.mxu1 %vm348_vm1, %v639_v27  ;;  %v640_v55 = vadd.f32 %v5197_v29, %v620_v28 }
 0x1d2   :  { %v4596_v26 = vpop.eup %4595  ;;  %4601 = vrsqrt.f32 %v572_v30 }
 0x1d3   :  { %4219 = vmatmul.mubr.msk.f32.gmra.mrb[4].mxu1 %vm348_vm1, %v640_v55  ;;  %v601_v37 = vmul.f32 %v4596_v26, %v553_v45 }
 0x1d4   :  { %v4598_v38 = vpop.eup %4597 }
 0x1d5   :  { %v621_v41 = vmul.f32 %v5186_v10, %v601_v37  ;;  %v602_v42 = vmul.f32 %v4598_v38, %v554_v33 }
 0x1d7   :  { %v641_v43 = vadd.f32 %v5197_v29, %v621_v41  ;;  %v622_v9 = vmul.f32 %v5186_v10, %v602_v42 }
 0x1d9   :  { %4221 = vmatprep.mubr.msk.f32.mxu1 %vm348_vm1, %v641_v43  ;;  %v642_v47 = vadd.f32 %v5197_v29, %v622_v9 }
 0x1da   :  { %v4600_v61 = vpop.eup %4599 }
 0x1db   :  { %4222 = vmatmul.mubr.msk.f32.gmra.mrb[6].mxu1 %vm348_vm1, %v642_v47  ;;  %v603_v49 = vmul.f32 %v4600_v61, %v555_v59 }
 0x1dc   :  { %v4602_v50 = vpop.eup %4601 }
 0x1dd   :  { %v623_v51 = vmul.f32 %v5186_v10, %v603_v49  ;;  %v604_v52 = vmul.f32 %v4602_v50, %v556_v18 }
 0x1df   :  { %v643_v54 = vadd.f32 %v5197_v29, %v623_v51  ;;  %v624_v57 = vmul.f32 %v5186_v10, %v604_v52  ;;  %v929_v10 = vld [vmem:[%s6533_s7 + $0x10] sm:$0xff] }
 0x1e1   :  { %4224 = vmatprep.mubr.msk.f32.mxu1 %vm348_vm1, %v643_v54  ;;  %v644_v48 = vadd.f32 %v5197_v29, %v624_v57  ;;  %v930_v29 = vld [vmem:[%s6533_s7 + $0x18] sm:$0xff] }
 0x1e2   :  { %v4479_v60 = vpack.c.bf16 %v930_v29, %v929_v10 }
 0x1e3   :  { %4225 = vmatmul.mubr.msk.f32.gmra.mrb[8].mxu1 %vm348_vm1, %v644_v48 }
 0x1e4   :  { %4480 = vmatprep.subr.bf16.mxu1 %v4479_v60 }
 0x1e5   :  { %4482 = vmatpush3.bf16.msra.mxu1 %v4479_v60 }
 0x27f   :  { %v4205_v1 = vpop.f32.mrb[16].mxu0 }
 0x280   :  { %v774_v4 = vadd.f32 %v4205_v1, %v5317_v62  ;;  %v768_v5 = vpop.f32.mrb[17].mxu0 }
 0x281   :  { %v769_v22 = vadd.f32 %v5317_v62, %v768_v5 }
 0x282   :  { %v864_v39 = vmul.f32 0.70710677, %v774_v4  ;;  %v848_v55 = vmul.f32 0.5, %v774_v4 }
 0x283   :  { %v863_v8 = vmul.f32 0.70710677, %v769_v22  ;;  %v847_v28 = vmul.f32 0.5, %v769_v22 }
 0x284   :  { %4603 = verf.f32 %v864_v39 }
 0x285   :  { %4605 = verf.f32 %v863_v8 }
 0x286   :  { %v4208_v12 = vpop.f32.mrb[18].mxu0 }
 0x287   :  { %v784_v13 = vadd.f32 %v4208_v12, %v5317_v62  ;;  %v778_v14 = vpop.f32.mrb[19].mxu0 }
 0x288   :  { %v779_v15 = vadd.f32 %v5317_v62, %v778_v14 }
 0x289   :  { %v866_v17 = vmul.f32 0.70710677, %v784_v13  ;;  %v850_v49 = vmul.f32 0.5, %v784_v13 }
 0x28a   :  { %v865_v19 = vmul.f32 0.70710677, %v779_v15  ;;  %v849_v59 = vmul.f32 0.5, %v779_v15 }
 0x28b   :  { %4607 = verf.f32 %v866_v17 }
 0x28c   :  { %4609 = verf.f32 %v865_v19 }
 0x28e   :  { %v4604_v31 = vpop.eup %4603  ;;  %v4211_v34 = vpop.f32.mrb[20].mxu0 }
 0x28f   :  { %v4606_v21 = vpop.eup %4605  ;;  %v896_v24 = vadd.f32 1.0, %v4604_v31  ;;  %v794_v25 = vadd.f32 %v4211_v34, %v5317_v62  ;;  %v788_v27 = vpop.f32.mrb[21].mxu0 }
 0x290   :  { %v895_v30 = vadd.f32 1.0, %v4606_v21  ;;  %v789_v45 = vadd.f32 %v5317_v62, %v788_v27 }
 0x291   :  { %v868_v26 = vmul.f32 0.70710677, %v794_v25  ;;  %v912_v38 = vmul.f32 %v896_v24, %v848_v55  ;;  %v852_v4 = vmul.f32 0.5, %v794_v25 }
 0x292   :  { %v911_v33 = vmul.f32 %v895_v30, %v847_v28  ;;  %v867_v37 = vmul.f32 0.70710677, %v789_v45  ;;  %v851_v10 = vmul.f32 0.5, %v789_v45 }
 0x293   :  { %4611 = verf.f32 %v868_v26 }
 0x294   :  { %4613 = verf.f32 %v867_v37  ;;  %4235 = vmatprep.mubr.msk.f32.mxu1 %vm348_vm1, %v911_v33 }
 0x295   :  { %v4608_v41 = vpop.eup %4607  ;;  %4236 = vmatmul.mubr.msk.f32.vlgmr.msra.gmra.mrb[10].mxu1 %vm348_vm1, %v912_v38 }
 0x296   :  { %v4610_v42 = vpop.eup %4609  ;;  %v898_v43 = vadd.f32 1.0, %v4608_v41  ;;  %v4214_v9 = vpop.f32.mrb[0].mxu1 }
 0x297   :  { %v897_v47 = vadd.f32 1.0, %v4610_v42  ;;  %v804_v61 = vadd.f32 %v4214_v9, %v5317_v62  ;;  %v798_v18 = vpop.f32.mrb[1].mxu1 }
 0x298   :  { %v799_v50 = vadd.f32 %v5317_v62, %v798_v18  ;;  %v914_v54 = vmul.f32 %v898_v43, %v850_v49 }
 0x299   :  { %v913_v51 = vmul.f32 %v897_v47, %v849_v59  ;;  %v870_v52 = vmul.f32 0.70710677, %v804_v61  ;;  %v854_v24 = vmul.f32 0.5, %v804_v61 }
 0x29a   :  { %v869_v57 = vmul.f32 0.70710677, %v799_v50  ;;  %v853_v19 = vmul.f32 0.5, %v799_v50 }
 0x29b   :  { %4615 = verf.f32 %v870_v52  ;;  %4238 = vmatprep.mubr.msk.f32.mxu1 %vm348_vm1, %v913_v51 }
 0x29c   :  { %4617 = verf.f32 %v869_v57  ;;  %4239 = vmatmul.mubr.msk.f32.gmra.mrb[12].mxu1 %vm348_vm1, %v914_v54 }
 0x29d   :  { %v4612_v48 = vpop.eup %4611 }
 0x29e   :  { %v4614_v35 = vpop.eup %4613  ;;  %v900_v58 = vadd.f32 1.0, %v4612_v48  ;;  %v4217_v6 = vpop.f32.mrb[2].mxu1 }
 0x29f   :  { %v899_v29 = vadd.f32 1.0, %v4614_v35  ;;  %v814_v60 = vadd.f32 %v4217_v6, %v5317_v62  ;;  %v808_v1 = vpop.f32.mrb[3].mxu1 }
 0x2a0   :  { %v809_v5 = vadd.f32 %v5317_v62, %v808_v1  ;;  %v916_v8 = vmul.f32 %v900_v58, %v852_v4 }
 0x2a1   :  { %v915_v22 = vmul.f32 %v899_v29, %v851_v10  ;;  %v872_v39 = vmul.f32 0.70710677, %v814_v60  ;;  %v856_v9 = vmul.f32 0.5, %v814_v60 }
 0x2a2   :  { %v871_v12 = vmul.f32 0.70710677, %v809_v5  ;;  %v855_v38 = vmul.f32 0.5, %v809_v5 }
 0x2a3   :  { %4619 = verf.f32 %v872_v39  ;;  %4241 = vmatprep.mubr.msk.f32.mxu1 %vm348_vm1, %v915_v22 }
 0x2a4   :  { %4621 = verf.f32 %v871_v12  ;;  %4242 = vmatmul.mubr.msk.f32.gmra.mrb[14].mxu1 %vm348_vm1, %v916_v8 }
 0x2a5   :  { %v4616_v13 = vpop.eup %4615 }
 0x2a6   :  { %v4618_v14 = vpop.eup %4617  ;;  %v902_v15 = vadd.f32 1.0, %v4616_v13  ;;  %v4220_v17 = vpop.f32.mrb[4].mxu1 }
 0x2a7   :  { %v901_v31 = vadd.f32 1.0, %v4618_v14  ;;  %v824_v34 = vadd.f32 %v4220_v17, %v5317_v62  ;;  %v818_v21 = vpop.f32.mrb[5].mxu1 }
 0x2a8   :  { %v819_v25 = vadd.f32 %v5317_v62, %v818_v21  ;;  %v918_v30 = vmul.f32 %v902_v15, %v854_v24 }
 0x2a9   :  { %v917_v27 = vmul.f32 %v901_v31, %v853_v19  ;;  %v874_v28 = vmul.f32 0.70710677, %v824_v34  ;;  %v858_v6 = vmul.f32 0.5, %v824_v34 }
 0x2aa   :  { %v873_v45 = vmul.f32 0.70710677, %v819_v25  ;;  %v857_v57 = vmul.f32 0.5, %v819_v25 }
 0x2ab   :  { %4623 = verf.f32 %v874_v28  ;;  %4244 = vmatprep.mubr.msk.f32.mxu1 %vm348_vm1, %v917_v27  ;;  %v5354_v27 = vld [vmem:[%s6534_s8] ss:$0 sm:$0xff] }
 0x2ac   :  { %4625 = verf.f32 %v873_v45  ;;  %4245 = vmatmul.mubr.msk.f32.gmra.mrb[16].mxu1 %vm348_vm1, %v918_v30 }
 0x2ad   :  { %v4620_v55 = vpop.eup %4619 }
 0x2ae   :  { %v4622_v26 = vpop.eup %4621  ;;  %v904_v33 = vadd.f32 1.0, %v4620_v55  ;;  %v4223_v37 = vpop.f32.mrb[6].mxu1 }
 0x2af   :  { %v903_v41 = vadd.f32 1.0, %v4622_v26  ;;  %v834_v42 = vadd.f32 %v4223_v37, %v5317_v62  ;;  %v828_v43 = vpop.f32.mrb[7].mxu1 }
 0x2b0   :  { %v829_v59 = vadd.f32 %v5317_v62, %v828_v43  ;;  %v920_v18 = vmul.f32 %v904_v33, %v856_v9 }
 0x2b1   :  { %v919_v47 = vmul.f32 %v903_v41, %v855_v38  ;;  %v876_v61 = vmul.f32 0.70710677, %v834_v42  ;;  %v860_v13 = vmul.f32 0.5, %v834_v42 }
 0x2b2   :  { %v875_v49 = vmul.f32 0.70710677, %v829_v59  ;;  %v859_v8 = vmul.f32 0.5, %v829_v59 }
 0x2b3   :  { %4627 = verf.f32 %v876_v61  ;;  %4247 = vmatprep.mubr.msk.f32.mxu1 %vm348_vm1, %v919_v47 }
 0x2b4   :  { %4629 = verf.f32 %v875_v49  ;;  %4248 = vmatmul.mubr.msk.f32.gmra.mrb[18].mxu1 %vm348_vm1, %v920_v18 }
 0x2b5   :  { %v4624_v50 = vpop.eup %4623 }
 0x2b6   :  { %v4626_v51 = vpop.eup %4625  ;;  %v906_v52 = vadd.f32 1.0, %v4624_v50  ;;  %v4226_v54 = vpop.f32.mrb[8].mxu1 }
 0x2b7   :  { %v905_v48 = vadd.f32 1.0, %v4626_v51  ;;  %v844_v35 = vadd.f32 %v4226_v54, %v5317_v62  ;;  %v838_v58 = vpop.f32.mrb[9].mxu1 }
 0x2b8   :  { %v839_v10 = vadd.f32 %v5317_v62, %v838_v58  ;;  %v922_v1 = vmul.f32 %v906_v52, %v858_v6 }
 0x2b9   :  { %v921_v29 = vmul.f32 %v905_v48, %v857_v57  ;;  %v878_v60 = vmul.f32 0.70710677, %v844_v35  ;;  %v862_v21 = vmul.f32 0.5, %v844_v35 }
 0x2ba   :  { %v877_v4 = vmul.f32 0.70710677, %v839_v10  ;;  %v861_v31 = vmul.f32 0.5, %v839_v10 }
 0x2bb   :  { %4631 = verf.f32 %v878_v60  ;;  %4250 = vmatprep.mubr.msk.f32.mxu1 %vm348_vm1, %v921_v29 }
 0x2bc   :  { %4633 = verf.f32 %v877_v4  ;;  %4251 = vmatmul.mubr.msk.f32.gmra.mrb[20].mxu1 %vm348_vm1, %v922_v1 }
 0x2bd   :  { %v4628_v5 = vpop.eup %4627 }
 0x2be   :  { %v4630_v22 = vpop.eup %4629  ;;  %v908_v39 = vadd.f32 1.0, %v4628_v5 }
 0x2bf   :  { %v907_v12 = vadd.f32 1.0, %v4630_v22 }
 0x2c0   :  { %v924_v15 = vmul.f32 %v908_v39, %v860_v13 }
 0x2c1   :  { %v923_v14 = vmul.f32 %v907_v12, %v859_v8 }
 0x2c3   :  { %4253 = vmatprep.mubr.msk.f32.mxu1 %vm348_vm1, %v923_v14 }
 0x2c4   :  { %4254 = vmatmul.mubr.msk.f32.gmra.mrb[22].mxu1 %vm348_vm1, %v924_v15 }
 0x2c5   :  { %v4632_v62 = vpop.eup %4631 }
 0x2c6   :  { %v4634_v17 = vpop.eup %4633  ;;  %v910_v19 = vadd.f32 1.0, %v4632_v62 }
 0x2c7   :  { %v909_v34 = vadd.f32 1.0, %v4634_v17 }
 0x2c8   :  { %v926_v25 = vmul.f32 %v910_v19, %v862_v21 }
 0x2c9   :  { %v925_v24 = vmul.f32 %v909_v34, %v861_v31 }
 0x2cb   :  { %4256 = vmatprep.mubr.msk.f32.mxu1 %vm348_vm1, %v925_v24 }
 0x2cc   :  { %4257 = vmatmul.mubr.msk.f32.gmra.mrb[24].mxu1 %vm348_vm1, %v926_v25 }
 0x368   :  { %v4237_v28 = vpop.f32.mrb[10].mxu1 }
 0x369   :  { %v1056_v30 = vadd.f32 %v4237_v28, %v5354_v27  ;;  %v1050_v45 = vpop.f32.mrb[11].mxu1 }
 0x36a   :  { %v1051_v55 = vadd.f32 %v5354_v27, %v1050_v45 }
 0x36b   :  { %v5359_v26 = vadd.f32 %v1056_v30, %v5031_v0 }
 0x36c   :  { %v5362_v33 = vadd.f32 %v1051_v55, %v5033_v2 }
 0x36d   :  { %v1150_v37 = vsel %vm348_vm1, %v5359_v26, 0.0  ;;  %v1196_v38 = vmul.f32 %v5359_v26, %v5359_v26 }
 0x36e   :  { %1151 = vadd.xlane.f32.xlu1 %v1150_v37  ;;  %v1147_v41 = vsel %vm348_vm1, %v5362_v33, 0.0  ;;  %v1195_v42 = vmul.f32 %v5362_v33, %v5362_v33 }
 0x36f   :  { %v4240_v43 = vpop.f32.mrb[12].mxu1  ;;  %1148 = vadd.xlane.f32.xlu0 %v1147_v41  ;;  %v1214_v59 = vsel %vm348_vm1, %v1196_v38, 0.0  ;;  %v3840_v41 = vld [vmem:[%s6531_s5 + $0x20] sm:$0xff] }
 0x370   :  { %v1066_v0 = vadd.f32 %v4240_v43, %v5354_v27  ;;  %v1060_v9 = vpop.f32.mrb[13].mxu1  ;;  %v1211_v61 = vsel %vm348_vm1, %v1195_v42, 0.0  ;;  %v3841_v42 = vld [vmem:[%s6531_s5 + $0x28] sm:$0xff] }
 0x371   :  { %v1061_v2 = vadd.f32 %v5354_v27, %v1060_v9  ;;  %v4483_v9 = vpack.c.bf16 %v3841_v42, %v3840_v41 }
 0x372   :  { %v5376_v47 = vadd.f32 %v1066_v0, %v5052_v23  ;;  %1215 = vadd.xlane.f32.xlu1 %v1214_v59 }
 0x373   :  { %v5380_v18 = vadd.f32 %v1061_v2, %v5046_v16  ;;  %1212 = vadd.xlane.f32.xlu0 %v1211_v61  ;;  %4484 = vmatprep.subr.bf16.mxu0 %v4483_v9 }
 0x374   :  { %v1156_v49 = vsel %vm348_vm1, %v5376_v47, 0.0  ;;  %v1198_v51 = vmul.f32 %v5376_v47, %v5376_v47  ;;  %4486 = vmatpush3.bf16.msra.mxu0 %v4483_v9 }
 0x375   :  { %v1153_v50 = vsel %vm348_vm1, %v5380_v18, 0.0  ;;  %v1197_v23 = vmul.f32 %v5380_v18, %v5380_v18 }
 0x376   :  { %1157 = vadd.xlane.f32.xlu1 %v1156_v49  ;;  %v1220_v48 = vsel %vm348_vm1, %v1198_v51, 0.0 }
 0x377   :  { %v4243_v52 = vpop.f32.mrb[14].mxu1  ;;  %1154 = vadd.xlane.f32.xlu0 %v1153_v50  ;;  %v1217_v58 = vsel %vm348_vm1, %v1197_v23, 0.0 }
 0x378   :  { %v1076_v54 = vadd.f32 %v4243_v52, %v5354_v27  ;;  %v1070_v16 = vpop.f32.mrb[15].mxu1 }
 0x379   :  { %v1071_v57 = vadd.f32 %v5354_v27, %v1070_v16 }
 0x37a   :  { %v5394_v35 = vadd.f32 %v1076_v54, %v5071_v44  ;;  %1221 = vadd.xlane.f32.xlu1 %v1220_v48 }
 0x37b   :  { %v5398_v6 = vadd.f32 %v1071_v57, %v5067_v40  ;;  %1218 = vadd.xlane.f32.xlu0 %v1217_v58 }
 0x37c   :  { %v1162_v10 = vsel %vm348_vm1, %v5394_v35, 0.0  ;;  %v1200_v60 = vmul.f32 %v5394_v35, %v5394_v35 }
 0x37d   :  { %v1159_v29 = vsel %vm348_vm1, %v5398_v6, 0.0  ;;  %v1199_v44 = vmul.f32 %v5398_v6, %v5398_v6 }
 0x37e   :  { %1163 = vadd.xlane.f32.xlu1 %v1162_v10  ;;  %v1226_v22 = vsel %vm348_vm1, %v1200_v60, 0.0 }
 0x37f   :  { %v4246_v1 = vpop.f32.mrb[16].mxu1  ;;  %1160 = vadd.xlane.f32.xlu0 %v1159_v29  ;;  %v1223_v8 = vsel %vm348_vm1, %v1199_v44, 0.0 }
 0x380   :  { %v1086_v4 = vadd.f32 %v4246_v1, %v5354_v27  ;;  %v1080_v40 = vpop.f32.mrb[17].mxu1 }
 0x381   :  { %v1081_v5 = vadd.f32 %v5354_v27, %v1080_v40 }
 0x382   :  { %v5412_v39 = vadd.f32 %v1086_v4, %v5090_v63  ;;  %1227 = vadd.xlane.f32.xlu1 %v1226_v22 }
 0x383   :  { %v5416_v12 = vadd.f32 %v1081_v5, %v5081_v53  ;;  %1224 = vadd.xlane.f32.xlu0 %v1223_v8 }
 0x384   :  { %v1168_v13 = vsel %vm348_vm1, %v5412_v39, 0.0  ;;  %v1202_v15 = vmul.f32 %v5412_v39, %v5412_v39 }
 0x385   :  { %v1165_v14 = vsel %vm348_vm1, %v5416_v12, 0.0  ;;  %v1201_v63 = vmul.f32 %v5416_v12, %v5416_v12 }
 0x386   :  { %1169 = vadd.xlane.f32.xlu1 %v1168_v13  ;;  %v1232_v31 = vsel %vm348_vm1, %v1202_v15, 0.0 }
 0x387   :  { %v4249_v62 = vpop.f32.mrb[18].mxu1  ;;  %1166 = vadd.xlane.f32.xlu0 %v1165_v14  ;;  %v1229_v21 = vsel %vm348_vm1, %v1201_v63, 0.0 }
 0x388   :  { %v1096_v17 = vadd.f32 %v4249_v62, %v5354_v27  ;;  %v1090_v53 = vpop.f32.mrb[19].mxu1  ;;  %v3861_v62 = vld [vmem:[%s6533_s7 + $0x20] sm:$0xff] }
 0x389   :  { %v1091_v19 = vadd.f32 %v5354_v27, %v1090_v53 }
 0x38a   :  { %v5430_v34 = vadd.f32 %v1096_v17, %v5107_v20  ;;  %1233 = vadd.xlane.f32.xlu1 %v1232_v31  ;;  %v3862_v17 = vld [vmem:[%s6533_s7 + $0x28] sm:$0xff] }
 0x38b   :  { %v5434_v24 = vadd.f32 %v1091_v19, %v5098_v11  ;;  %1230 = vadd.xlane.f32.xlu0 %v1229_v21  ;;  %v4491_v53 = vpack.c.bf16 %v3862_v17, %v3861_v62  ;;  %v5539_v62 = vld [vmem:[%s6529_s3 + $0x1] ss:$0 sm:$0xff] }
 0x38c   :  { %v1174_v25 = vsel %vm348_vm1, %v5430_v34, 0.0  ;;  %v1204_v30 = vmul.f32 %v5430_v34, %v5430_v34 }
 0x38d   :  { %v1171_v28 = vsel %vm348_vm1, %v5434_v24, 0.0  ;;  %v1203_v20 = vmul.f32 %v5434_v24, %v5434_v24  ;;  %4492 = vmatprep.subr.bf16.mxu1 %v4491_v53 }
 0x38e   :  { %1175 = vadd.xlane.f32.xlu1 %v1174_v25  ;;  %v1238_v38 = vsel %vm348_vm1, %v1204_v30, 0.0  ;;  %4494 = vmatpush3.bf16.msra.mxu1 %v4491_v53 }
 0x38f   :  { %v4252_v45 = vpop.f32.mrb[20].mxu1  ;;  %1172 = vadd.xlane.f32.xlu0 %v1171_v28  ;;  %v1235_v0 = vsel %vm348_vm1, %v1203_v20, 0.0 }
 0x390   :  { %v1106_v55 = vadd.f32 %v4252_v45, %v5354_v27  ;;  %v1100_v11 = vpop.f32.mrb[21].mxu1 }
 0x391   :  { %v1101_v37 = vadd.f32 %v5354_v27, %v1100_v11 }
 0x392   :  { %v5454_v43 = vadd.f32 %v1106_v55, %v5121_v36  ;;  %1239 = vadd.xlane.f32.xlu1 %v1238_v38  ;;  %v3842_v36 = vld [vmem:[%s6531_s5 + $0x30] sm:$0xff] }
 0x393   :  { %v5458_v2 = vadd.f32 %v1101_v37, %v5114_v32  ;;  %1236 = vadd.xlane.f32.xlu0 %v1235_v0  ;;  %v3843_v32 = vld [vmem:[%s6531_s5 + $0x38] sm:$0xff] }
 0x394   :  { %v1180_v59 = vsel %vm348_vm1, %v5454_v43, 0.0  ;;  %v1206_v49 = vmul.f32 %v5454_v43, %v5454_v43  ;;  %v4487_v51 = vpack.c.bf16 %v3843_v32, %v3842_v36 }
 0x395   :  { %v1177_v61 = vsel %vm348_vm1, %v5458_v2, 0.0  ;;  %v1205_v50 = vmul.f32 %v5458_v2, %v5458_v2 }
 0x396   :  { %1181 = vadd.xlane.f32.xlu1 %v1180_v59  ;;  %4488 = vmatprep.subr.bf16.mxu0 %v4487_v51  ;;  %v1244_v57 = vsel %vm348_vm1, %v1206_v49, 0.0 }
 0x397   :  { %v4255_v23 = vpop.f32.mrb[22].mxu1  ;;  %1178 = vadd.xlane.f32.xlu0 %v1177_v61  ;;  %4490 = vmatpush3.bf16.msra.mxu0 %v4487_v51  ;;  %v1241_v58 = vsel %vm348_vm1, %v1205_v50, 0.0 }
 0x398   :  { %v1116_v52 = vadd.f32 %v4255_v23, %v5354_v27  ;;  %v1110_v54 = vpop.f32.mrb[23].mxu1 }
 0x399   :  { %v1111_v16 = vadd.f32 %v5354_v27, %v1110_v54 }
 0x39a   :  { %v5478_v48 = vadd.f32 %v1116_v52, %v5141_v56  ;;  %1245 = vadd.xlane.f32.xlu1 %v1244_v57 }
 0x39b   :  { %v5482_v10 = vadd.f32 %v1111_v16, %v5134_v46  ;;  %1242 = vadd.xlane.f32.xlu0 %v1241_v58 }
 0x39c   :  { %v1186_v29 = vsel %vm348_vm1, %v5478_v48, 0.0  ;;  %v1208_v44 = vmul.f32 %v5478_v48, %v5478_v48 }
 0x39d   :  { %v1183_v60 = vsel %vm348_vm1, %v5482_v10, 0.0  ;;  %v1207_v56 = vmul.f32 %v5482_v10, %v5482_v10 }
 0x39e   :  { %1187 = vadd.xlane.f32.xlu1 %v1186_v29  ;;  %v1250_v5 = vsel %vm348_vm1, %v1208_v44, 0.0 }
 0x39f   :  { %1184 = vadd.xlane.f32.xlu0 %v1183_v60  ;;  %v4258_v1 = vpop.f32.mrb[24].mxu1  ;;  %v1247_v8 = vsel %vm348_vm1, %v1207_v56, 0.0 }
 0x3a0   :  { %v1126_v4 = vadd.f32 %v4258_v1, %v5354_v27  ;;  %v1120_v46 = vpop.f32.mrb[25].mxu1 }
 0x3a1   :  { %v1121_v40 = vadd.f32 %v5354_v27, %v1120_v46 }
 0x3a2   :  { %v5496_v22 = vadd.f32 %v1126_v4, %v5155_v7  ;;  %1251 = vadd.xlane.f32.xlu1 %v1250_v5 }
 0x3a3   :  { %v5500_v13 = vadd.f32 %v1121_v40, %v5148_v3  ;;  %1248 = vadd.xlane.f32.xlu0 %v1247_v8 }
 0x3a4   :  { %v1192_v14 = vsel %vm348_vm1, %v5496_v22, 0.0  ;;  %v1210_v27 = vmul.f32 %v5496_v22, %v5496_v22 }
 0x3a5   :  { %v1189_v15 = vsel %vm348_vm1, %v5500_v13, 0.0  ;;  %v1209_v7 = vmul.f32 %v5500_v13, %v5500_v13 }
 0x3a6   :  { %1193 = vadd.xlane.f32.xlu1 %v1192_v14  ;;  %v1256_v63 = vsel %vm348_vm1, %v1210_v27, 0.0 }
 0x3a7   :  { %1190 = vadd.xlane.f32.xlu0 %v1189_v15  ;;  %v1253_v3 = vsel %vm348_vm1, %v1209_v7, 0.0 }
 0x3aa   :  { %1257 = vadd.xlane.f32.xlu1 %v1256_v63 }
 0x3ab   :  { %1254 = vadd.xlane.f32.xlu0 %v1253_v3 }
 0x3fb   :  { %v1152_v19 = vpop.xlane.xlu1 %1151 }
 0x3fc   :  { %v1260_v31 = vmul.f32 0.03125, %v1152_v19  ;;  %v1149_v21 = vpop.xlane.xlu0 %1148 }
 0x3fd   :  { %v1259_v25 = vmul.f32 0.03125, %v1149_v21 }
 0x3fe   :  { %v1292_v30 = vmul.f32 %v1260_v31, %v1260_v31  ;;  %v1340_v15 = vsub.f32 %v5359_v26, %v1260_v31 }
 0x3ff   :  { %v1216_v28 = vpop.xlane.xlu1 %1215  ;;  %v1291_v55 = vmul.f32 %v1259_v25, %v1259_v25  ;;  %v1339_v3 = vsub.f32 %v5362_v33, %v1259_v25  ;;  %v5549_v25 = vld [vmem:[%s6530_s4 + $0x1] ss:$0 sm:$0xff] }
 0x400   :  { %v1276_v20 = vmul.f32 0.03125, %v1216_v28  ;;  %v1213_v45 = vpop.xlane.xlu0 %1212 }
 0x401   :  { %v1275_v11 = vmul.f32 0.03125, %v1213_v45 }
 0x402   :  { %v1308_v37 = vsub.f32 %v1276_v20, %v1292_v30 }
 0x403   :  { %v1307_v38 = vsub.f32 %v1275_v11, %v1291_v55  ;;  %v1158_v41 = vpop.xlane.xlu1 %1157 }
 0x404   :  { %v1324_v42 = vmax.f32 %v1308_v37, 0.0  ;;  %v5518_v0 = vmul.f32 0.03125, %v1158_v41  ;;  %v1155_v9 = vpop.xlane.xlu0 %1154 }
 0x405   :  { %v1323_v59 = vmax.f32 %v1307_v38, 0.0  ;;  %v5520_v61 = vmul.f32 0.03125, %v1155_v9 }
 0x406   :  { %v1356_v49 = vadd.f32 1e-05, %v1324_v42  ;;  %v1294_v50 = vmul.f32 %v5518_v0, %v5518_v0  ;;  %v1342_v42 = vsub.f32 %v5376_v47, %v5518_v0 }
 0x407   :  { %v1355_v36 = vadd.f32 1e-05, %v1323_v59  ;;  %v1222_v32 = vpop.xlane.xlu1 %1221  ;;  %v1293_v52 = vmul.f32 %v5520_v61, %v5520_v61  ;;  %v1341_v0 = vsub.f32 %v5380_v18, %v5520_v61 }
 0x408   :  { %4635 = vrsqrt.f32 %v1356_v49  ;;  %v1278_v51 = vmul.f32 0.03125, %v1222_v32  ;;  %v1219_v23 = vpop.xlane.xlu0 %1218 }
 0x409   :  { %4637 = vrsqrt.f32 %v1355_v36  ;;  %v1277_v54 = vmul.f32 0.03125, %v1219_v23 }
 0x40a   :  { %v1310_v16 = vsub.f32 %v1278_v51, %v1294_v50 }
 0x40b   :  { %v1309_v57 = vsub.f32 %v1277_v54, %v1293_v52  ;;  %v1164_v58 = vpop.xlane.xlu1 %1163 }
 0x40c   :  { %v1326_v29 = vmax.f32 %v1310_v16, 0.0  ;;  %v5526_v60 = vmul.f32 0.03125, %v1164_v58  ;;  %v1161_v44 = vpop.xlane.xlu0 %1160 }
 0x40d   :  { %v1325_v56 = vmax.f32 %v1309_v57, 0.0  ;;  %v5528_v1 = vmul.f32 0.03125, %v1161_v44 }
 0x40e   :  { %v1358_v4 = vadd.f32 1e-05, %v1326_v29  ;;  %v1296_v5 = vmul.f32 %v5526_v60, %v5526_v60 }
 0x40f   :  { %v1357_v46 = vadd.f32 1e-05, %v1325_v56  ;;  %v1228_v40 = vpop.xlane.xlu1 %1227  ;;  %v1295_v27 = vmul.f32 %v5528_v1, %v5528_v1 }
 0x410   :  { %4639 = vrsqrt.f32 %v1358_v4  ;;  %v1280_v8 = vmul.f32 0.03125, %v1228_v40  ;;  %v1225_v14 = vpop.xlane.xlu0 %1224 }
 0x411   :  { %4641 = vrsqrt.f32 %v1357_v46  ;;  %v1279_v7 = vmul.f32 0.03125, %v1225_v14 }
 0x412   :  { %v4636_v63 = vpop.eup %4635  ;;  %v1312_v17 = vsub.f32 %v1280_v8, %v1296_v5 }
 0x413   :  { %v4638_v53 = vpop.eup %4637  ;;  %v1388_v19 = vmul.f32 %v4636_v63, %v1340_v15  ;;  %v1311_v21 = vsub.f32 %v1279_v7, %v1295_v27  ;;  %v1170_v28 = vpop.xlane.xlu1 %1169  ;;  %v1344_v27 = vsub.f32 %v5394_v35, %v5526_v60  ;;  %v1343_v60 = vsub.f32 %v5398_v6, %v5528_v1 }
 0x414   :  { %v1328_v30 = vmax.f32 %v1312_v17, 0.0  ;;  %v5541_v31 = vmul.f32 0.03125, %v1170_v28  ;;  %v1167_v20 = vpop.xlane.xlu0 %1166  ;;  %v1387_v45 = vmul.f32 %v4638_v53, %v1339_v3 }
 0x415   :  { %v1408_v55 = vmul.f32 %v5539_v62, %v1388_v19  ;;  %v1327_v11 = vmax.f32 %v1311_v21, 0.0  ;;  %v5544_v37 = vmul.f32 0.03125, %v1167_v20 }
 0x416   :  { %v1360_v38 = vadd.f32 1e-05, %v1328_v30  ;;  %v1407_v41 = vmul.f32 %v5539_v62, %v1387_v45  ;;  %v1298_v49 = vmul.f32 %v5541_v31, %v5541_v31 }
 0x417   :  { %v1359_v9 = vadd.f32 1e-05, %v1327_v11  ;;  %v1234_v59 = vpop.xlane.xlu1 %1233  ;;  %v1297_v51 = vmul.f32 %v5544_v37, %v5544_v37  ;;  %v1428_v52 = vadd.f32 %v5549_v25, %v1408_v55 }
 0x418   :  { %4643 = vrsqrt.f32 %v1360_v38  ;;  %v1282_v36 = vmul.f32 0.03125, %v1234_v59  ;;  %v1231_v32 = vpop.xlane.xlu0 %1230  ;;  %v1427_v50 = vadd.f32 %v5549_v25, %v1407_v41 }
 0x419   :  { %4645 = vrsqrt.f32 %v1359_v9  ;;  %v1281_v23 = vmul.f32 0.03125, %v1231_v32 }
 0x41a   :  { %v4640_v54 = vpop.eup %4639  ;;  %v1314_v16 = vsub.f32 %v1282_v36, %v1298_v49  ;;  %4267 = vmatprep.mubr.msk.f32.mxu0 %vm348_vm1, %v1427_v50 }
 0x41b   :  { %v4642_v57 = vpop.eup %4641  ;;  %v1313_v58 = vsub.f32 %v1281_v23, %v1297_v51  ;;  %v1176_v29 = vpop.xlane.xlu1 %1175  ;;  %4268 = vmatmul.mubr.msk.f32.vlgmr.msra.gmra.mrb[22].mxu0 %vm348_vm1, %v1428_v52  ;;  %v1390_v44 = vmul.f32 %v4640_v54, %v1342_v42  ;;  %v1346_v23 = vsub.f32 %v5412_v39, %v5541_v31  ;;  %v1345_v31 = vsub.f32 %v5416_v12, %v5544_v37 }
 0x41c   :  { %v1330_v56 = vmax.f32 %v1314_v16, 0.0  ;;  %v5564_v4 = vmul.f32 0.03125, %v1176_v29  ;;  %v1173_v46 = vpop.xlane.xlu0 %1172  ;;  %v1389_v40 = vmul.f32 %v4642_v57, %v1341_v0 }
 0x41d   :  { %v1329_v5 = vmax.f32 %v1313_v58, 0.0  ;;  %v5566_v8 = vmul.f32 0.03125, %v1173_v46  ;;  %v1410_v14 = vmul.f32 %v5539_v62, %v1390_v44 }
 0x41e   :  { %v1362_v61 = vadd.f32 1e-05, %v1330_v56  ;;  %v1409_v15 = vmul.f32 %v5539_v62, %v1389_v40  ;;  %v1300_v3 = vmul.f32 %v5564_v4, %v5564_v4 }
 0x41f   :  { %v1361_v7 = vadd.f32 1e-05, %v1329_v5  ;;  %v1240_v63 = vpop.xlane.xlu1 %1239  ;;  %v1299_v21 = vmul.f32 %v5566_v8, %v5566_v8  ;;  %v1430_v30 = vadd.f32 %v5549_v25, %v1410_v14 }
 0x420   :  { %4647 = vrsqrt.f32 %v1362_v61  ;;  %v1284_v17 = vmul.f32 0.03125, %v1240_v63  ;;  %v1237_v53 = vpop.xlane.xlu0 %1236  ;;  %v1429_v19 = vadd.f32 %v5549_v25, %v1409_v15 }
 0x421   :  { %4649 = vrsqrt.f32 %v1361_v7  ;;  %v1283_v28 = vmul.f32 0.03125, %v1237_v53 }
 0x422   :  { %v4644_v20 = vpop.eup %4643  ;;  %v1316_v45 = vsub.f32 %v1284_v17, %v1300_v3  ;;  %4270 = vmatprep.mubr.msk.f32.mxu0 %vm348_vm1, %v1429_v19 }
 0x423   :  { %v4646_v55 = vpop.eup %4645  ;;  %v1315_v11 = vsub.f32 %v1283_v28, %v1299_v21  ;;  %v1182_v38 = vpop.xlane.xlu1 %1181  ;;  %4271 = vmatmul.mubr.msk.f32.gmra.mrb[24].mxu0 %vm348_vm1, %v1430_v30  ;;  %v1392_v41 = vmul.f32 %v4644_v20, %v1344_v27  ;;  %v1348_v28 = vsub.f32 %v5430_v34, %v5564_v4  ;;  %v1347_v4 = vsub.f32 %v5434_v24, %v5566_v8 }
 0x424   :  { %v1332_v42 = vmax.f32 %v1316_v45, 0.0  ;;  %v5582_v9 = vmul.f32 0.03125, %v1182_v38  ;;  %v1179_v59 = vpop.xlane.xlu0 %1178  ;;  %v1391_v49 = vmul.f32 %v4646_v55, %v1343_v60 }
 0x425   :  { %v1331_v36 = vmax.f32 %v1315_v11, 0.0  ;;  %v5584_v32 = vmul.f32 0.03125, %v1179_v59  ;;  %v1412_v50 = vmul.f32 %v5539_v62, %v1392_v41 }
 0x426   :  { %v1364_v1 = vadd.f32 1e-05, %v1332_v42  ;;  %v1411_v51 = vmul.f32 %v5539_v62, %v1391_v49  ;;  %v1302_v0 = vmul.f32 %v5582_v9, %v5582_v9 }
 0x427   :  { %v1363_v52 = vadd.f32 1e-05, %v1331_v36  ;;  %v1246_v54 = vpop.xlane.xlu1 %1245  ;;  %v1301_v29 = vmul.f32 %v5584_v32, %v5584_v32  ;;  %v1432_v56 = vadd.f32 %v5549_v25, %v1412_v50 }
 0x428   :  { %4651 = vrsqrt.f32 %v1364_v1  ;;  %v1286_v16 = vmul.f32 0.03125, %v1246_v54  ;;  %v1243_v57 = vpop.xlane.xlu0 %1242  ;;  %v1431_v58 = vadd.f32 %v5549_v25, %v1411_v51 }
 0x429   :  { %4653 = vrsqrt.f32 %v1363_v52  ;;  %v1285_v44 = vmul.f32 0.03125, %v1243_v57 }
 0x42a   :  { %v4648_v46 = vpop.eup %4647  ;;  %v1318_v40 = vsub.f32 %v1286_v16, %v1302_v0  ;;  %4273 = vmatprep.mubr.msk.f32.mxu0 %vm348_vm1, %v1431_v58 }
 0x42b   :  { %v4650_v5 = vpop.eup %4649  ;;  %v1317_v14 = vsub.f32 %v1285_v44, %v1301_v29  ;;  %v1188_v61 = vpop.xlane.xlu1 %1187  ;;  %4274 = vmatmul.mubr.msk.f32.gmra.mrb[26].mxu0 %vm348_vm1, %v1432_v56  ;;  %v1394_v15 = vmul.f32 %v4648_v46, %v1346_v23  ;;  %v1350_v44 = vsub.f32 %v5454_v43, %v5582_v9 }
 0x42c   :  { %v1334_v27 = vmax.f32 %v1318_v40, 0.0  ;;  %v5600_v7 = vmul.f32 0.03125, %v1188_v61  ;;  %v1185_v63 = vpop.xlane.xlu0 %1184  ;;  %v1393_v3 = vmul.f32 %v4650_v5, %v1345_v31 }
 0x42d   :  { %v1333_v17 = vmax.f32 %v1317_v14, 0.0  ;;  %v5602_v53 = vmul.f32 0.03125, %v1185_v63  ;;  %v1414_v19 = vmul.f32 %v5539_v62, %v1394_v15 }
 0x42e   :  { %v1366_v37 = vadd.f32 1e-05, %v1334_v27  ;;  %v1413_v21 = vmul.f32 %v5539_v62, %v1393_v3  ;;  %v1304_v60 = vmul.f32 %v5600_v7, %v5600_v7  ;;  %v1349_v3 = vsub.f32 %v5458_v2, %v5584_v32 }
 0x42f   :  { %v1365_v30 = vadd.f32 1e-05, %v1333_v17  ;;  %v1252_v20 = vpop.xlane.xlu1 %1251  ;;  %v1303_v38 = vmul.f32 %v5602_v53, %v5602_v53  ;;  %v1434_v42 = vadd.f32 %v5549_v25, %v1414_v19 }
 0x430   :  { %4655 = vrsqrt.f32 %v1366_v37  ;;  %v1288_v45 = vmul.f32 0.03125, %v1252_v20  ;;  %v1249_v55 = vpop.xlane.xlu0 %1248  ;;  %v1433_v11 = vadd.f32 %v5549_v25, %v1413_v21 }
 0x431   :  { %4657 = vrsqrt.f32 %v1365_v30  ;;  %v1287_v41 = vmul.f32 0.03125, %v1249_v55 }
 0x432   :  { %v4652_v59 = vpop.eup %4651  ;;  %v1320_v49 = vsub.f32 %v1288_v45, %v1304_v60  ;;  %4276 = vmatprep.mubr.msk.f32.mxu0 %vm348_vm1, %v1433_v11  ;;  %v1352_v11 = vsub.f32 %v5478_v48, %v5600_v7 }
 0x433   :  { %v4654_v36 = vpop.eup %4653  ;;  %v1319_v50 = vsub.f32 %v1287_v41, %v1303_v38  ;;  %4277 = vmatmul.mubr.msk.f32.gmra.mrb[28].mxu0 %vm348_vm1, %v1434_v42  ;;  %v1194_v1 = vpop.xlane.xlu1 %1193  ;;  %v1396_v51 = vmul.f32 %v4652_v59, %v1348_v28  ;;  %v1351_v42 = vsub.f32 %v5482_v10, %v5602_v53 }
 0x434   :  { %v1336_v23 = vmax.f32 %v1320_v49, 0.0  ;;  %v1274_v52 = vmul.f32 0.03125, %v1194_v1  ;;  %v1191_v54 = vpop.xlane.xlu0 %1190  ;;  %v1395_v0 = vmul.f32 %v4654_v36, %v1347_v4 }
 0x435   :  { %v1335_v16 = vmax.f32 %v1319_v50, 0.0  ;;  %v1273_v57 = vmul.f32 0.03125, %v1191_v54  ;;  %v1416_v58 = vmul.f32 %v5539_v62, %v1396_v51 }
 0x436   :  { %v1368_v29 = vadd.f32 1e-05, %v1336_v23  ;;  %v1415_v8 = vmul.f32 %v5539_v62, %v1395_v0  ;;  %v1306_v31 = vmul.f32 %v1274_v52, %v1274_v52  ;;  %v1354_v1 = vsub.f32 %v5496_v22, %v1274_v52 }
 0x437   :  { %v1367_v56 = vadd.f32 1e-05, %v1335_v16  ;;  %v1258_v46 = vpop.xlane.xlu1 %1257  ;;  %v1305_v61 = vmul.f32 %v1273_v57, %v1273_v57  ;;  %v1436_v27 = vadd.f32 %v5549_v25, %v1416_v58  ;;  %v1353_v53 = vsub.f32 %v5500_v13, %v1273_v57  ;;  %v3863_v57 = vld [vmem:[%s6533_s7 + $0x30] sm:$0xff] }
 0x438   :  { %4659 = vrsqrt.f32 %v1368_v29  ;;  %v1290_v40 = vmul.f32 0.03125, %v1258_v46  ;;  %v1255_v5 = vpop.xlane.xlu0 %1254  ;;  %v1435_v14 = vadd.f32 %v5549_v25, %v1415_v8 }
 0x439   :  { %4661 = vrsqrt.f32 %v1367_v56  ;;  %v1289_v15 = vmul.f32 0.03125, %v1255_v5 }
 0x43a   :  { %v4656_v63 = vpop.eup %4655  ;;  %v1322_v17 = vsub.f32 %v1290_v40, %v1306_v31  ;;  %4279 = vmatprep.mubr.msk.f32.mxu0 %vm348_vm1, %v1435_v14 }
 0x43b   :  { %v4658_v9 = vpop.eup %4657  ;;  %v1321_v19 = vsub.f32 %v1289_v15, %v1305_v61  ;;  %4280 = vmatmul.mubr.msk.f32.gmra.mrb[30].mxu0 %vm348_vm1, %v1436_v27  ;;  %v1398_v37 = vmul.f32 %v4656_v63, %v1350_v44  ;;  %v3864_v44 = vld [vmem:[%s6533_s7 + $0x38] sm:$0xff] }
 0x43c   :  { %v1338_v21 = vmax.f32 %v1322_v17, 0.0  ;;  %v1397_v28 = vmul.f32 %v4658_v9, %v1349_v3  ;;  %v4495_v56 = vpack.c.bf16 %v3864_v44, %v3863_v57 }
 0x43d   :  { %v1337_v30 = vmax.f32 %v1321_v19, 0.0  ;;  %v1418_v20 = vmul.f32 %v5539_v62, %v1398_v37 }
 0x43e   :  { %v1370_v60 = vadd.f32 1e-05, %v1338_v21  ;;  %v1417_v45 = vmul.f32 %v5539_v62, %v1397_v28  ;;  %4496 = vmatprep.subr.bf16.mxu1 %v4495_v56 }
 0x43f   :  { %v1369_v55 = vadd.f32 1e-05, %v1337_v30  ;;  %v1438_v38 = vadd.f32 %v5549_v25, %v1418_v20  ;;  %4498 = vmatpush3.bf16.msra.mxu1 %v4495_v56 }
 0x440   :  { %4663 = vrsqrt.f32 %v1370_v60  ;;  %v1437_v32 = vadd.f32 %v5549_v25, %v1417_v45 }
 0x441   :  { %4665 = vrsqrt.f32 %v1369_v55 }
 0x442   :  { %v4660_v41 = vpop.eup %4659  ;;  %4282 = vmatprep.mubr.msk.f32.mxu0 %vm348_vm1, %v1437_v32 }
 0x443   :  { %v4662_v59 = vpop.eup %4661  ;;  %4283 = vmatmul.mubr.msk.f32.gmra.mrb[32].mxu0 %vm348_vm1, %v1438_v38  ;;  %v1400_v4 = vmul.f32 %v4660_v41, %v1352_v11 }
 0x444   :  { %v1399_v49 = vmul.f32 %v4662_v59, %v1351_v42 }
 0x445   :  { %v1420_v36 = vmul.f32 %v5539_v62, %v1400_v4 }
 0x446   :  { %v1419_v50 = vmul.f32 %v5539_v62, %v1399_v49 }
 0x447   :  { %v1440_v51 = vadd.f32 %v5549_v25, %v1420_v36 }
 0x448   :  { %v1439_v7 = vadd.f32 %v5549_v25, %v1419_v50 }
 0x44a   :  { %v4664_v23 = vpop.eup %4663  ;;  %4285 = vmatprep.mubr.msk.f32.mxu0 %vm348_vm1, %v1439_v7 }
 0x44b   :  { %v4666_v54 = vpop.eup %4665  ;;  %4286 = vmatmul.mubr.msk.f32.gmra.mrb[34].mxu0 %vm348_vm1, %v1440_v51  ;;  %v1402_v0 = vmul.f32 %v4664_v23, %v1354_v1 }
 0x44c   :  { %v1401_v16 = vmul.f32 %v4666_v54, %v1353_v53 }
 0x44d   :  { %v1422_v58 = vmul.f32 %v5539_v62, %v1402_v0 }
 0x44e   :  { %v1421_v29 = vmul.f32 %v5539_v62, %v1401_v16  ;;  %v5661_v62 = vld [vmem:[%s6532_s6 + $0x1] ss:$0 sm:$0xff] }
 0x44f   :  { %v1442_v52 = vadd.f32 %v5549_v25, %v1422_v58 }
 0x450   :  { %v1441_v8 = vadd.f32 %v5549_v25, %v1421_v29 }
 0x452   :  { %4288 = vmatprep.mubr.msk.f32.mxu0 %vm348_vm1, %v1441_v8 }
 0x453   :  { %4289 = vmatmul.mubr.msk.f32.gmra.mrb[36].mxu0 %vm348_vm1, %v1442_v52 }
 0x4ee   :  { %v4269_v25 = vpop.f32.mrb[22].mxu0 }
 0x4ef   :  { %v1573_v46 = vadd.f32 %v4269_v25, %v5661_v62  ;;  %v1567_v31 = vpop.f32.mrb[23].mxu0 }
 0x4f0   :  { %v1568_v40 = vadd.f32 %v5661_v62, %v1567_v31 }
 0x4f1   :  { %v1663_v5 = vmul.f32 0.70710677, %v1573_v46  ;;  %v1647_v45 = vmul.f32 0.5, %v1573_v46 }
 0x4f2   :  { %v1662_v14 = vmul.f32 0.70710677, %v1568_v40  ;;  %v1646_v28 = vmul.f32 0.5, %v1568_v40 }
 0x4f3   :  { %4667 = verf.f32 %v1663_v5 }
 0x4f4   :  { %4669 = verf.f32 %v1662_v14 }
 0x4f6   :  { %v4272_v61 = vpop.f32.mrb[24].mxu0 }
 0x4f7   :  { %v1583_v15 = vadd.f32 %v4272_v61, %v5661_v62  ;;  %v1577_v27 = vpop.f32.mrb[25].mxu0 }
 0x4f8   :  { %v1578_v63 = vadd.f32 %v5661_v62, %v1577_v27 }
 0x4f9   :  { %v1665_v3 = vmul.f32 0.70710677, %v1583_v15  ;;  %v1649_v51 = vmul.f32 0.5, %v1583_v15 }
 0x4fa   :  { %v1664_v17 = vmul.f32 0.70710677, %v1578_v63  ;;  %v1648_v36 = vmul.f32 0.5, %v1578_v63 }
 0x4fb   :  { %4671 = verf.f32 %v1665_v3 }
 0x4fc   :  { %4673 = verf.f32 %v1664_v17 }
 0x4fd   :  { %v4668_v9 = vpop.eup %4667 }
 0x4fe   :  { %v4670_v19 = vpop.eup %4669  ;;  %v1695_v37 = vadd.f32 1.0, %v4668_v9  ;;  %v4275_v21 = vpop.f32.mrb[26].mxu0 }
 0x4ff   :  { %v1694_v30 = vadd.f32 1.0, %v4670_v19  ;;  %v1593_v20 = vadd.f32 %v4275_v21, %v5661_v62  ;;  %v1587_v60 = vpop.f32.mrb[27].mxu0 }
 0x500   :  { %v1588_v55 = vadd.f32 %v5661_v62, %v1587_v60  ;;  %v1711_v38 = vmul.f32 %v1695_v37, %v1647_v45 }
 0x501   :  { %v1710_v32 = vmul.f32 %v1694_v30, %v1646_v28  ;;  %v1667_v11 = vmul.f32 0.70710677, %v1593_v20  ;;  %v1651_v46 = vmul.f32 0.5, %v1593_v20 }
 0x502   :  { %v1666_v41 = vmul.f32 0.70710677, %v1588_v55  ;;  %v1650_v57 = vmul.f32 0.5, %v1588_v55 }
 0x503   :  { %4675 = verf.f32 %v1667_v11  ;;  %4299 = vmatprep.mubr.msk.f32.mxu1 %vm348_vm1, %v1710_v32 }
 0x504   :  { %4677 = verf.f32 %v1666_v41  ;;  %4300 = vmatmul.mubr.msk.f32.vlgmr.msra.gmra.mrb[26].mxu1 %vm348_vm1, %v1711_v38 }
 0x505   :  { %v4672_v42 = vpop.eup %4671 }
 0x506   :  { %v4674_v59 = vpop.eup %4673  ;;  %v1697_v4 = vadd.f32 1.0, %v4672_v42  ;;  %v4278_v49 = vpop.f32.mrb[28].mxu0 }
 0x507   :  { %v1696_v50 = vadd.f32 1.0, %v4674_v59  ;;  %v1603_v7 = vadd.f32 %v4278_v49, %v5661_v62  ;;  %v1597_v1 = vpop.f32.mrb[29].mxu0 }
 0x508   :  { %v1598_v23 = vadd.f32 %v5661_v62, %v1597_v1  ;;  %v1713_v0 = vmul.f32 %v1697_v4, %v1649_v51 }
 0x509   :  { %v1712_v53 = vmul.f32 %v1696_v50, %v1648_v36  ;;  %v1669_v54 = vmul.f32 0.70710677, %v1603_v7  ;;  %v1653_v21 = vmul.f32 0.5, %v1603_v7 }
 0x50a   :  { %v1668_v16 = vmul.f32 0.70710677, %v1598_v23  ;;  %v1652_v17 = vmul.f32 0.5, %v1598_v23 }
 0x50b   :  { %4679 = verf.f32 %v1669_v54  ;;  %4302 = vmatprep.mubr.msk.f32.mxu1 %vm348_vm1, %v1712_v53 }
 0x50c   :  { %4681 = verf.f32 %v1668_v16  ;;  %4303 = vmatmul.mubr.msk.f32.gmra.mrb[28].mxu1 %vm348_vm1, %v1713_v0 }
 0x50d   :  { %v4676_v58 = vpop.eup %4675 }
 0x50e   :  { %v4678_v29 = vpop.eup %4677  ;;  %v1699_v8 = vadd.f32 1.0, %v4676_v58  ;;  %v4281_v52 = vpop.f32.mrb[30].mxu0 }
 0x50f   :  { %v1698_v44 = vadd.f32 1.0, %v4678_v29  ;;  %v1613_v56 = vadd.f32 %v4281_v52, %v5661_v62  ;;  %v1607_v25 = vpop.f32.mrb[31].mxu0 }
 0x510   :  { %v1608_v31 = vadd.f32 %v5661_v62, %v1607_v25  ;;  %v1715_v14 = vmul.f32 %v1699_v8, %v1651_v46 }
 0x511   :  { %v1714_v40 = vmul.f32 %v1698_v44, %v1650_v57  ;;  %v1671_v5 = vmul.f32 0.70710677, %v1613_v56  ;;  %v1655_v49 = vmul.f32 0.5, %v1613_v56 }
 0x512   :  { %v1670_v61 = vmul.f32 0.70710677, %v1608_v31  ;;  %v1654_v41 = vmul.f32 0.5, %v1608_v31 }
 0x513   :  { %4683 = verf.f32 %v1671_v5  ;;  %4305 = vmatprep.mubr.msk.f32.mxu1 %vm348_vm1, %v1714_v40 }
 0x514   :  { %4685 = verf.f32 %v1670_v61  ;;  %4306 = vmatmul.mubr.msk.f32.gmra.mrb[30].mxu1 %vm348_vm1, %v1715_v14 }
 0x515   :  { %v4680_v15 = vpop.eup %4679 }
 0x516   :  { %v4682_v27 = vpop.eup %4681  ;;  %v1701_v63 = vadd.f32 1.0, %v4680_v15  ;;  %v4284_v3 = vpop.f32.mrb[32].mxu0 }
 0x517   :  { %v1700_v9 = vadd.f32 1.0, %v4682_v27  ;;  %v1623_v19 = vadd.f32 %v4284_v3, %v5661_v62  ;;  %v1617_v37 = vpop.f32.mrb[33].mxu0 }
 0x518   :  { %v1618_v28 = vadd.f32 %v5661_v62, %v1617_v37  ;;  %v1717_v60 = vmul.f32 %v1701_v63, %v1653_v21 }
 0x519   :  { %v1716_v30 = vmul.f32 %v1700_v9, %v1652_v17  ;;  %v1673_v20 = vmul.f32 0.70710677, %v1623_v19  ;;  %v1657_v52 = vmul.f32 0.5, %v1623_v19 }
 0x51a   :  { %v1672_v45 = vmul.f32 0.70710677, %v1618_v28  ;;  %v1656_v16 = vmul.f32 0.5, %v1618_v28 }
 0x51b   :  { %4687 = verf.f32 %v1673_v20  ;;  %4308 = vmatprep.mubr.msk.f32.mxu1 %vm348_vm1, %v1716_v30  ;;  %v3884_v30 = vld [vmem:[%s6531_s5 + $0x40] sm:$0xff]  ;;  %v3885_v20 = vld [vmem:[%s6531_s5 + $0x48] sm:$0xff] }
 0x51c   :  { %4689 = verf.f32 %v1672_v45  ;;  %4309 = vmatmul.mubr.msk.f32.gmra.mrb[32].mxu1 %vm348_vm1, %v1717_v60  ;;  %v4499_v60 = vpack.c.bf16 %v3885_v20, %v3884_v30  ;;  %v5704_v45 = vld [vmem:[%s6534_s8 + $0x1] ss:$0 sm:$0xff] }
 0x51d   :  { %v4684_v55 = vpop.eup %4683 }
 0x51e   :  { %v4686_v32 = vpop.eup %4685  ;;  %v1703_v11 = vadd.f32 1.0, %v4684_v55  ;;  %v4287_v38 = vpop.f32.mrb[34].mxu0  ;;  %4500 = vmatprep.subr.bf16.mxu0 %v4499_v60 }
 0x51f   :  { %v1702_v42 = vadd.f32 1.0, %v4686_v32  ;;  %v1633_v59 = vadd.f32 %v4287_v38, %v5661_v62  ;;  %v1627_v4 = vpop.f32.mrb[35].mxu0  ;;  %4502 = vmatpush3.bf16.msra.mxu0 %v4499_v60 }
 0x520   :  { %v1628_v36 = vadd.f32 %v5661_v62, %v1627_v4  ;;  %v1719_v1 = vmul.f32 %v1703_v11, %v1655_v49 }
 0x521   :  { %v1718_v50 = vmul.f32 %v1702_v42, %v1654_v41  ;;  %v1675_v7 = vmul.f32 0.70710677, %v1633_v59  ;;  %v1659_v15 = vmul.f32 0.5, %v1633_v59 }
 0x522   :  { %v1674_v51 = vmul.f32 0.70710677, %v1628_v36  ;;  %v1658_v14 = vmul.f32 0.5, %v1628_v36 }
 0x523   :  { %4691 = verf.f32 %v1675_v7  ;;  %4311 = vmatprep.mubr.msk.f32.mxu1 %vm348_vm1, %v1718_v50 }
 0x524   :  { %4693 = verf.f32 %v1674_v51  ;;  %4312 = vmatmul.mubr.msk.f32.gmra.mrb[34].mxu1 %vm348_vm1, %v1719_v1 }
 0x525   :  { %v4688_v23 = vpop.eup %4687 }
 0x526   :  { %v4690_v53 = vpop.eup %4689  ;;  %v1705_v54 = vadd.f32 1.0, %v4688_v23  ;;  %v4290_v0 = vpop.f32.mrb[36].mxu0 }
 0x527   :  { %v1704_v58 = vadd.f32 1.0, %v4690_v53  ;;  %v1643_v29 = vadd.f32 %v4290_v0, %v5661_v62  ;;  %v1637_v8 = vpop.f32.mrb[37].mxu0 }
 0x528   :  { %v1638_v57 = vadd.f32 %v5661_v62, %v1637_v8  ;;  %v1721_v25 = vmul.f32 %v1705_v54, %v1657_v52 }
 0x529   :  { %v1720_v44 = vmul.f32 %v1704_v58, %v1656_v16  ;;  %v1677_v56 = vmul.f32 0.70710677, %v1643_v29  ;;  %v1661_v37 = vmul.f32 0.5, %v1643_v29 }
 0x52a   :  { %v1676_v46 = vmul.f32 0.70710677, %v1638_v57  ;;  %v1660_v9 = vmul.f32 0.5, %v1638_v57 }
 0x52b   :  { %4695 = verf.f32 %v1677_v56  ;;  %4314 = vmatprep.mubr.msk.f32.mxu1 %vm348_vm1, %v1720_v44 }
 0x52c   :  { %4697 = verf.f32 %v1676_v46  ;;  %4315 = vmatmul.mubr.msk.f32.gmra.mrb[36].mxu1 %vm348_vm1, %v1721_v25 }
 0x52d   :  { %v4692_v31 = vpop.eup %4691 }
 0x52e   :  { %v4694_v40 = vpop.eup %4693  ;;  %v1707_v5 = vadd.f32 1.0, %v4692_v31 }
 0x52f   :  { %v1706_v61 = vadd.f32 1.0, %v4694_v40 }
 0x530   :  { %v1723_v63 = vmul.f32 %v1707_v5, %v1659_v15 }
 0x531   :  { %v1722_v27 = vmul.f32 %v1706_v61, %v1658_v14 }
 0x533   :  { %4317 = vmatprep.mubr.msk.f32.mxu1 %vm348_vm1, %v1722_v27 }
 0x534   :  { %4318 = vmatmul.mubr.msk.f32.gmra.mrb[38].mxu1 %vm348_vm1, %v1723_v63 }
 0x535   :  { %v4696_v62 = vpop.eup %4695 }
 0x536   :  { %v4698_v3 = vpop.eup %4697  ;;  %v1709_v17 = vadd.f32 1.0, %v4696_v62 }
 0x537   :  { %v1708_v19 = vadd.f32 1.0, %v4698_v3 }
 0x538   :  { %v1725_v28 = vmul.f32 %v1709_v17, %v1661_v37 }
 0x539   :  { %v1724_v21 = vmul.f32 %v1708_v19, %v1660_v9 }
 0x53b   :  { %4320 = vmatprep.mubr.msk.f32.mxu1 %vm348_vm1, %v1724_v21 }
 0x53c   :  { %4321 = vmatmul.mubr.msk.f32.gmra.mrb[40].mxu1 %vm348_vm1, %v1725_v28 }
 0x5d7   :  { %v4301_v55 = vpop.f32.mrb[26].mxu1 }
 0x5d8   :  { %v1856_v32 = vadd.f32 %v4301_v55, %v5704_v45  ;;  %v1850_v11 = vpop.f32.mrb[27].mxu1 }
 0x5d9   :  { %v1851_v38 = vadd.f32 %v5704_v45, %v1850_v11 }
 0x5da   :  { %v5709_v41 = vadd.f32 %v1856_v32, %v5359_v26 }
 0x5db   :  { %v5712_v42 = vadd.f32 %v1851_v38, %v5362_v33 }
 0x5dc   :  { %v1950_v59 = vsel %vm348_vm1, %v5709_v41, 0.0  ;;  %v1996_v4 = vmul.f32 %v5709_v41, %v5709_v41 }
 0x5dd   :  { %1951 = vadd.xlane.f32.xlu1 %v1950_v59  ;;  %v1947_v49 = vsel %vm348_vm1, %v5712_v42, 0.0  ;;  %v1995_v36 = vmul.f32 %v5712_v42, %v5712_v42 }
 0x5de   :  { %1948 = vadd.xlane.f32.xlu0 %v1947_v49  ;;  %v2014_v33 = vsel %vm348_vm1, %v1996_v4, 0.0 }
 0x5df   :  { %v4304_v50 = vpop.f32.mrb[28].mxu1  ;;  %v2011_v51 = vsel %vm348_vm1, %v1995_v36, 0.0 }
 0x5e0   :  { %v1866_v26 = vadd.f32 %v4304_v50, %v5704_v45  ;;  %v1860_v7 = vpop.f32.mrb[29].mxu1 }
 0x5e1   :  { %v1861_v1 = vadd.f32 %v5704_v45, %v1860_v7  ;;  %2015 = vadd.xlane.f32.xlu1 %v2014_v33  ;;  %v3886_v33 = vld [vmem:[%s6531_s5 + $0x50] sm:$0xff] }
 0x5e2   :  { %v5727_v23 = vadd.f32 %v1866_v26, %v5376_v47  ;;  %2012 = vadd.xlane.f32.xlu0 %v2011_v51 }
 0x5e3   :  { %v5730_v53 = vadd.f32 %v1861_v1, %v5380_v18  ;;  %v3887_v1 = vld [vmem:[%s6531_s5 + $0x58] sm:$0xff] }
 0x5e4   :  { %v1956_v54 = vsel %vm348_vm1, %v5727_v23, 0.0  ;;  %v1998_v0 = vmul.f32 %v5727_v23, %v5727_v23  ;;  %v4503_v51 = vpack.c.bf16 %v3887_v1, %v3886_v33 }
 0x5e5   :  { %1957 = vadd.xlane.f32.xlu1 %v1956_v54  ;;  %v1953_v16 = vsel %vm348_vm1, %v5730_v53, 0.0  ;;  %v1997_v58 = vmul.f32 %v5730_v53, %v5730_v53 }
 0x5e6   :  { %1954 = vadd.xlane.f32.xlu0 %v1953_v16  ;;  %v2020_v18 = vsel %vm348_vm1, %v1998_v0, 0.0  ;;  %4504 = vmatprep.subr.bf16.mxu0 %v4503_v51 }
 0x5e7   :  { %v4307_v47 = vpop.f32.mrb[30].mxu1  ;;  %v2017_v57 = vsel %vm348_vm1, %v1997_v58, 0.0  ;;  %4506 = vmatpush3.bf16.msra.mxu0 %v4503_v51 }
 0x5e8   :  { %v1876_v29 = vadd.f32 %v4307_v47, %v5704_v45  ;;  %v1870_v8 = vpop.f32.mrb[31].mxu1 }
 0x5e9   :  { %v1871_v52 = vadd.f32 %v5704_v45, %v1870_v8  ;;  %2021 = vadd.xlane.f32.xlu1 %v2020_v18 }
 0x5ea   :  { %v5745_v44 = vadd.f32 %v1876_v29, %v5394_v35  ;;  %2018 = vadd.xlane.f32.xlu0 %v2017_v57 }
 0x5eb   :  { %v5748_v56 = vadd.f32 %v1871_v52, %v5398_v6 }
 0x5ec   :  { %v1962_v25 = vsel %vm348_vm1, %v5745_v44, 0.0  ;;  %v2000_v46 = vmul.f32 %v5745_v44, %v5745_v44 }
 0x5ed   :  { %1963 = vadd.xlane.f32.xlu1 %v1962_v25  ;;  %v1959_v31 = vsel %vm348_vm1, %v5748_v56, 0.0  ;;  %v1999_v40 = vmul.f32 %v5748_v56, %v5748_v56 }
 0x5ee   :  { %1960 = vadd.xlane.f32.xlu0 %v1959_v31  ;;  %v2026_v6 = vsel %vm348_vm1, %v2000_v46, 0.0 }
 0x5ef   :  { %v4310_v35 = vpop.f32.mrb[32].mxu1  ;;  %v2023_v15 = vsel %vm348_vm1, %v1999_v40, 0.0 }
 0x5f0   :  { %v1886_v5 = vadd.f32 %v4310_v35, %v5704_v45  ;;  %v1880_v14 = vpop.f32.mrb[33].mxu1 }
 0x5f1   :  { %v1881_v61 = vadd.f32 %v5704_v45, %v1880_v14  ;;  %2027 = vadd.xlane.f32.xlu1 %v2026_v6 }
 0x5f2   :  { %v5763_v27 = vadd.f32 %v1886_v5, %v5412_v39  ;;  %2024 = vadd.xlane.f32.xlu0 %v2023_v15 }
 0x5f3   :  { %v5766_v63 = vadd.f32 %v1881_v61, %v5416_v12 }
 0x5f4   :  { %v1968_v62 = vsel %vm348_vm1, %v5763_v27, 0.0  ;;  %v2002_v3 = vmul.f32 %v5763_v27, %v5763_v27 }
 0x5f5   :  { %1969 = vadd.xlane.f32.xlu1 %v1968_v62  ;;  %v1965_v17 = vsel %vm348_vm1, %v5766_v63, 0.0  ;;  %v2001_v9 = vmul.f32 %v5766_v63, %v5766_v63 }
 0x5f6   :  { %1966 = vadd.xlane.f32.xlu0 %v1965_v17  ;;  %v2032_v12 = vsel %vm348_vm1, %v2002_v3, 0.0  ;;  %v3905_v3 = vld [vmem:[%s6533_s7 + $0x40] sm:$0xff]  ;;  %v3906_v17 = vld [vmem:[%s6533_s7 + $0x48] sm:$0xff] }
 0x5f7   :  { %v4313_v39 = vpop.f32.mrb[34].mxu1  ;;  %v2029_v28 = vsel %vm348_vm1, %v2001_v9, 0.0  ;;  %v4507_v9 = vpack.c.bf16 %v3906_v17, %v3905_v3  ;;  %v5883_v3 = vld [vmem:[%s6529_s3 + $0x2] ss:$0 sm:$0xff] }
 0x5f8   :  { %v1896_v19 = vadd.f32 %v4313_v39, %v5704_v45  ;;  %v1890_v37 = vpop.f32.mrb[35].mxu1 }
 0x5f9   :  { %v1891_v21 = vadd.f32 %v5704_v45, %v1890_v37  ;;  %2033 = vadd.xlane.f32.xlu1 %v2032_v12  ;;  %4508 = vmatprep.subr.bf16.mxu1 %v4507_v9 }
 0x5fa   :  { %v5781_v30 = vadd.f32 %v1896_v19, %v5430_v34  ;;  %2030 = vadd.xlane.f32.xlu0 %v2029_v28  ;;  %4510 = vmatpush3.bf16.msra.mxu1 %v4507_v9 }
 0x5fb   :  { %v5784_v20 = vadd.f32 %v1891_v21, %v5434_v24 }
 0x5fc   :  { %v1974_v60 = vsel %vm348_vm1, %v5781_v30, 0.0  ;;  %v2004_v55 = vmul.f32 %v5781_v30, %v5781_v30 }
 0x5fd   :  { %1975 = vadd.xlane.f32.xlu1 %v1974_v60  ;;  %v1971_v32 = vsel %vm348_vm1, %v5784_v20, 0.0  ;;  %v2003_v11 = vmul.f32 %v5784_v20, %v5784_v20 }
 0x5fe   :  { %1972 = vadd.xlane.f32.xlu0 %v1971_v32  ;;  %v2038_v24 = vsel %vm348_vm1, %v2004_v55, 0.0 }
 0x5ff   :  { %v4316_v34 = vpop.f32.mrb[36].mxu1  ;;  %v2035_v49 = vsel %vm348_vm1, %v2003_v11, 0.0 }
 0x600   :  { %v1906_v38 = vadd.f32 %v4316_v34, %v5704_v45  ;;  %v1900_v59 = vpop.f32.mrb[37].mxu1 }
 0x601   :  { %v1901_v4 = vadd.f32 %v5704_v45, %v1900_v59  ;;  %2039 = vadd.xlane.f32.xlu1 %v2038_v24 }
 0x602   :  { %v5799_v36 = vadd.f32 %v1906_v38, %v5454_v43  ;;  %2036 = vadd.xlane.f32.xlu0 %v2035_v49 }
 0x603   :  { %v5802_v50 = vadd.f32 %v1901_v4, %v5458_v2 }
 0x604   :  { %v1980_v26 = vsel %vm348_vm1, %v5799_v36, 0.0  ;;  %v2006_v7 = vmul.f32 %v5799_v36, %v5799_v36 }
 0x605   :  { %1981 = vadd.xlane.f32.xlu1 %v1980_v26  ;;  %v1977_v43 = vsel %vm348_vm1, %v5802_v50, 0.0  ;;  %v2005_v2 = vmul.f32 %v5802_v50, %v5802_v50 }
 0x606   :  { %1978 = vadd.xlane.f32.xlu0 %v1977_v43  ;;  %v2044_v58 = vsel %vm348_vm1, %v2006_v7, 0.0 }
 0x607   :  { %v4319_v54 = vpop.f32.mrb[38].mxu1  ;;  %v2041_v29 = vsel %vm348_vm1, %v2005_v2, 0.0 }
 0x608   :  { %v1916_v0 = vadd.f32 %v4319_v54, %v5704_v45  ;;  %v1910_v16 = vpop.f32.mrb[39].mxu1 }
 0x609   :  { %v1911_v47 = vadd.f32 %v5704_v45, %v1910_v16  ;;  %2045 = vadd.xlane.f32.xlu1 %v2044_v58 }
 0x60a   :  { %v5823_v8 = vadd.f32 %v1916_v0, %v5478_v48  ;;  %2042 = vadd.xlane.f32.xlu0 %v2041_v29 }
 0x60b   :  { %v5826_v18 = vadd.f32 %v1911_v47, %v5482_v10 }
 0x60c   :  { %v1986_v52 = vsel %vm348_vm1, %v5823_v8, 0.0  ;;  %v2008_v57 = vmul.f32 %v5823_v8, %v5823_v8 }
 0x60d   :  { %1987 = vadd.xlane.f32.xlu1 %v1986_v52  ;;  %v1983_v25 = vsel %vm348_vm1, %v5826_v18, 0.0  ;;  %v2007_v46 = vmul.f32 %v5826_v18, %v5826_v18 }
 0x60e   :  { %1984 = vadd.xlane.f32.xlu0 %v1983_v25  ;;  %v2050_v10 = vsel %vm348_vm1, %v2008_v57, 0.0 }
 0x60f   :  { %v4322_v48 = vpop.f32.mrb[40].mxu1  ;;  %v2047_v5 = vsel %vm348_vm1, %v2007_v46, 0.0 }
 0x610   :  { %v1926_v31 = vadd.f32 %v4322_v48, %v5704_v45  ;;  %v1920_v40 = vpop.f32.mrb[41].mxu1 }
 0x611   :  { %v1921_v35 = vadd.f32 %v5704_v45, %v1920_v40  ;;  %2051 = vadd.xlane.f32.xlu1 %v2050_v10 }
 0x612   :  { %v5841_v14 = vadd.f32 %v1926_v31, %v5496_v22  ;;  %2048 = vadd.xlane.f32.xlu0 %v2047_v5 }
 0x613   :  { %v5844_v6 = vadd.f32 %v1921_v35, %v5500_v13 }
 0x614   :  { %v1992_v61 = vsel %vm348_vm1, %v5841_v14, 0.0  ;;  %v2010_v15 = vmul.f32 %v5841_v14, %v5841_v14 }
 0x615   :  { %1993 = vadd.xlane.f32.xlu1 %v1992_v61  ;;  %v1989_v45 = vsel %vm348_vm1, %v5844_v6, 0.0  ;;  %v2009_v62 = vmul.f32 %v5844_v6, %v5844_v6 }
 0x616   :  { %1990 = vadd.xlane.f32.xlu0 %v1989_v45  ;;  %v2056_v22 = vsel %vm348_vm1, %v2010_v15, 0.0 }
 0x617   :  { %v2053_v13 = vsel %vm348_vm1, %v2009_v62, 0.0 }
 0x619   :  { %2057 = vadd.xlane.f32.xlu1 %v2056_v22 }
 0x61a   :  { %2054 = vadd.xlane.f32.xlu0 %v2053_v13 }
 0x66a   :  { %v1952_v39 = vpop.xlane.xlu1 %1951 }
 0x66b   :  { %v2060_v19 = vmul.f32 0.03125, %v1952_v39  ;;  %v1949_v37 = vpop.xlane.xlu0 %1948 }
 0x66c   :  { %v2059_v12 = vmul.f32 0.03125, %v1949_v37 }
 0x66d   :  { %v2092_v28 = vmul.f32 %v2060_v19, %v2060_v19  ;;  %v2140_v15 = vsub.f32 %v5709_v41, %v2060_v19 }
 0x66e   :  { %v2016_v21 = vpop.xlane.xlu1 %2015  ;;  %v2091_v32 = vmul.f32 %v2059_v12, %v2059_v12  ;;  %v2139_v13 = vsub.f32 %v5712_v42, %v2059_v12  ;;  %v5893_v12 = vld [vmem:[%s6530_s4 + $0x2] ss:$0 sm:$0xff] }
 0x66f   :  { %v2076_v60 = vmul.f32 0.03125, %v2016_v21  ;;  %v2013_v55 = vpop.xlane.xlu0 %2012 }
 0x670   :  { %v2075_v11 = vmul.f32 0.03125, %v2013_v55 }
 0x671   :  { %v2108_v34 = vsub.f32 %v2076_v60, %v2092_v28 }
 0x672   :  { %v2107_v38 = vsub.f32 %v2075_v11, %v2091_v32  ;;  %v1958_v59 = vpop.xlane.xlu1 %1957 }
 0x673   :  { %v2124_v24 = vmax.f32 %v2108_v34, 0.0  ;;  %v5862_v4 = vmul.f32 0.03125, %v1958_v59  ;;  %v1955_v49 = vpop.xlane.xlu0 %1954 }
 0x674   :  { %v2123_v26 = vmax.f32 %v2107_v38, 0.0  ;;  %v5864_v7 = vmul.f32 0.03125, %v1955_v49 }
 0x675   :  { %v2156_v33 = vadd.f32 1e-05, %v2124_v24  ;;  %v2094_v2 = vmul.f32 %v5862_v4, %v5862_v4  ;;  %v2142_v24 = vsub.f32 %v5727_v23, %v5862_v4 }
 0x676   :  { %v2155_v1 = vadd.f32 1e-05, %v2123_v26  ;;  %v2022_v43 = vpop.xlane.xlu1 %2021  ;;  %v2093_v0 = vmul.f32 %v5864_v7, %v5864_v7  ;;  %v2141_v4 = vsub.f32 %v5730_v53, %v5864_v7 }
 0x677   :  { %4699 = vrsqrt.f32 %v2156_v33  ;;  %v2078_v51 = vmul.f32 0.03125, %v2022_v43  ;;  %v2019_v54 = vpop.xlane.xlu0 %2018 }
 0x678   :  { %4701 = vrsqrt.f32 %v2155_v1  ;;  %v2077_v16 = vmul.f32 0.03125, %v2019_v54 }
 0x679   :  { %v2110_v58 = vsub.f32 %v2078_v51, %v2094_v2 }
 0x67a   :  { %v2109_v47 = vsub.f32 %v2077_v16, %v2093_v0  ;;  %v1964_v29 = vpop.xlane.xlu1 %1963 }
 0x67b   :  { %v2126_v52 = vmax.f32 %v2110_v58, 0.0  ;;  %v5870_v57 = vmul.f32 0.03125, %v1964_v29  ;;  %v1961_v25 = vpop.xlane.xlu0 %1960 }
 0x67c   :  { %v2125_v46 = vmax.f32 %v2109_v47, 0.0  ;;  %v5872_v48 = vmul.f32 0.03125, %v1961_v25 }
 0x67d   :  { %v2158_v31 = vadd.f32 1e-05, %v2126_v52  ;;  %v2096_v35 = vmul.f32 %v5870_v57, %v5870_v57 }
 0x67e   :  { %v2157_v40 = vadd.f32 1e-05, %v2125_v46  ;;  %v2028_v10 = vpop.xlane.xlu1 %2027  ;;  %v2095_v45 = vmul.f32 %v5872_v48, %v5872_v48 }
 0x67f   :  { %4703 = vrsqrt.f32 %v2158_v31  ;;  %v2080_v5 = vmul.f32 0.03125, %v2028_v10  ;;  %v2025_v61 = vpop.xlane.xlu0 %2024 }
 0x680   :  { %4705 = vrsqrt.f32 %v2157_v40  ;;  %v2079_v62 = vmul.f32 0.03125, %v2025_v61 }
 0x681   :  { %v4700_v22 = vpop.eup %4699  ;;  %v2112_v17 = vsub.f32 %v2080_v5, %v2096_v35 }
 0x682   :  { %v4702_v9 = vpop.eup %4701  ;;  %v2188_v39 = vmul.f32 %v4700_v22, %v2140_v15  ;;  %v2111_v37 = vsub.f32 %v2079_v62, %v2095_v45  ;;  %v1970_v21 = vpop.xlane.xlu1 %1969  ;;  %v2144_v45 = vsub.f32 %v5745_v44, %v5870_v57  ;;  %v2143_v57 = vsub.f32 %v5748_v56, %v5872_v48 }
 0x683   :  { %v2128_v28 = vmax.f32 %v2112_v17, 0.0  ;;  %v5885_v19 = vmul.f32 0.03125, %v1970_v21  ;;  %v1967_v60 = vpop.xlane.xlu0 %1966  ;;  %v2187_v55 = vmul.f32 %v4702_v9, %v2139_v13 }
 0x684   :  { %v2208_v32 = vmul.f32 %v5883_v3, %v2188_v39  ;;  %v2127_v11 = vmax.f32 %v2111_v37, 0.0  ;;  %v5888_v34 = vmul.f32 0.03125, %v1967_v60 }
 0x685   :  { %v2160_v38 = vadd.f32 1e-05, %v2128_v28  ;;  %v2207_v59 = vmul.f32 %v5883_v3, %v2187_v55  ;;  %v2098_v33 = vmul.f32 %v5885_v19, %v5885_v19 }
 0x686   :  { %v2159_v49 = vadd.f32 1e-05, %v2127_v11  ;;  %v2034_v26 = vpop.xlane.xlu1 %2033  ;;  %v2097_v51 = vmul.f32 %v5888_v34, %v5888_v34  ;;  %v2228_v0 = vadd.f32 %v5893_v12, %v2208_v32 }
 0x687   :  { %4707 = vrsqrt.f32 %v2160_v38  ;;  %v2082_v1 = vmul.f32 0.03125, %v2034_v26  ;;  %v2031_v43 = vpop.xlane.xlu0 %2030  ;;  %v2227_v2 = vadd.f32 %v5893_v12, %v2207_v59 }
 0x688   :  { %4709 = vrsqrt.f32 %v2159_v49  ;;  %v2081_v54 = vmul.f32 0.03125, %v2031_v43 }
 0x689   :  { %v4704_v16 = vpop.eup %4703  ;;  %v2114_v58 = vsub.f32 %v2082_v1, %v2098_v33  ;;  %4331 = vmatprep.mubr.msk.f32.mxu0 %vm348_vm1, %v2227_v2 }
 0x68a   :  { %v4706_v47 = vpop.eup %4705  ;;  %v2113_v29 = vsub.f32 %v2081_v54, %v2097_v51  ;;  %v1976_v52 = vpop.xlane.xlu1 %1975  ;;  %4332 = vmatmul.mubr.msk.f32.vlgmr.msra.gmra.mrb[38].mxu0 %vm348_vm1, %v2228_v0  ;;  %v2190_v25 = vmul.f32 %v4704_v16, %v2142_v24  ;;  %v2146_v54 = vsub.f32 %v5763_v27, %v5885_v19  ;;  %v2145_v19 = vsub.f32 %v5766_v63, %v5888_v34 }
 0x68b   :  { %v2130_v46 = vmax.f32 %v2114_v58, 0.0  ;;  %v5908_v31 = vmul.f32 0.03125, %v1976_v52  ;;  %v1973_v40 = vpop.xlane.xlu0 %1972  ;;  %v2189_v10 = vmul.f32 %v4706_v47, %v2141_v4 }
 0x68c   :  { %v2129_v35 = vmax.f32 %v2113_v29, 0.0  ;;  %v5910_v5 = vmul.f32 0.03125, %v1973_v40  ;;  %v2210_v61 = vmul.f32 %v5883_v3, %v2190_v25 }
 0x68d   :  { %v2162_v7 = vadd.f32 1e-05, %v2130_v46  ;;  %v2209_v15 = vmul.f32 %v5883_v3, %v2189_v10  ;;  %v2100_v13 = vmul.f32 %v5908_v31, %v5908_v31 }
 0x68e   :  { %v2161_v62 = vadd.f32 1e-05, %v2129_v35  ;;  %v2040_v22 = vpop.xlane.xlu1 %2039  ;;  %v2099_v37 = vmul.f32 %v5910_v5, %v5910_v5  ;;  %v2230_v28 = vadd.f32 %v5893_v12, %v2210_v61 }
 0x68f   :  { %4711 = vrsqrt.f32 %v2162_v7  ;;  %v2084_v17 = vmul.f32 0.03125, %v2040_v22  ;;  %v2037_v9 = vpop.xlane.xlu0 %2036  ;;  %v2229_v39 = vadd.f32 %v5893_v12, %v2209_v15 }
 0x690   :  { %4713 = vrsqrt.f32 %v2161_v62  ;;  %v2083_v21 = vmul.f32 0.03125, %v2037_v9 }
 0x691   :  { %v4708_v60 = vpop.eup %4707  ;;  %v2116_v55 = vsub.f32 %v2084_v17, %v2100_v13  ;;  %4334 = vmatprep.mubr.msk.f32.mxu0 %vm348_vm1, %v2229_v39 }
 0x692   :  { %v4710_v32 = vpop.eup %4709  ;;  %v2115_v11 = vsub.f32 %v2083_v21, %v2099_v37  ;;  %v1982_v38 = vpop.xlane.xlu1 %1981  ;;  %4335 = vmatmul.mubr.msk.f32.gmra.mrb[40].mxu0 %vm348_vm1, %v2230_v28  ;;  %v2192_v59 = vmul.f32 %v4708_v60, %v2144_v45  ;;  %v2148_v21 = vsub.f32 %v5781_v30, %v5908_v31  ;;  %v2147_v31 = vsub.f32 %v5784_v20, %v5910_v5 }
 0x693   :  { %v2132_v24 = vmax.f32 %v2116_v55, 0.0  ;;  %v5926_v49 = vmul.f32 0.03125, %v1982_v38  ;;  %v1979_v26 = vpop.xlane.xlu0 %1978  ;;  %v2191_v33 = vmul.f32 %v4710_v32, %v2143_v57 }
 0x694   :  { %v2131_v1 = vmax.f32 %v2115_v11, 0.0  ;;  %v5928_v43 = vmul.f32 0.03125, %v1979_v26  ;;  %v2212_v2 = vmul.f32 %v5883_v3, %v2192_v59 }
 0x695   :  { %v2164_v48 = vadd.f32 1e-05, %v2132_v24  ;;  %v2211_v51 = vmul.f32 %v5883_v3, %v2191_v33  ;;  %v2102_v4 = vmul.f32 %v5926_v49, %v5926_v49 }
 0x696   :  { %v2163_v0 = vadd.f32 1e-05, %v2131_v1  ;;  %v2046_v16 = vpop.xlane.xlu1 %2045  ;;  %v2101_v52 = vmul.f32 %v5928_v43, %v5928_v43  ;;  %v2232_v46 = vadd.f32 %v5893_v12, %v2212_v2 }
 0x697   :  { %4715 = vrsqrt.f32 %v2164_v48  ;;  %v2086_v58 = vmul.f32 0.03125, %v2046_v16  ;;  %v2043_v47 = vpop.xlane.xlu0 %2042  ;;  %v2231_v29 = vadd.f32 %v5893_v12, %v2211_v51 }
 0x698   :  { %4717 = vrsqrt.f32 %v2163_v0  ;;  %v2085_v25 = vmul.f32 0.03125, %v2043_v47 }
 0x699   :  { %v4712_v40 = vpop.eup %4711  ;;  %v2118_v10 = vsub.f32 %v2086_v58, %v2102_v4  ;;  %4337 = vmatprep.mubr.msk.f32.mxu0 %vm348_vm1, %v2231_v29 }
 0x69a   :  { %v4714_v35 = vpop.eup %4713  ;;  %v2117_v61 = vsub.f32 %v2085_v25, %v2101_v52  ;;  %v1988_v7 = vpop.xlane.xlu1 %1987  ;;  %4338 = vmatmul.mubr.msk.f32.gmra.mrb[42].mxu0 %vm348_vm1, %v2232_v46  ;;  %v2194_v15 = vmul.f32 %v4712_v40, %v2146_v54  ;;  %v2150_v25 = vsub.f32 %v5799_v36, %v5926_v49 }
 0x69b   :  { %v2134_v45 = vmax.f32 %v2118_v10, 0.0  ;;  %v5944_v62 = vmul.f32 0.03125, %v1988_v7  ;;  %v1985_v22 = vpop.xlane.xlu0 %1984  ;;  %v2193_v13 = vmul.f32 %v4714_v35, %v2145_v19 }
 0x69c   :  { %v2133_v17 = vmax.f32 %v2117_v61, 0.0  ;;  %v5946_v9 = vmul.f32 0.03125, %v1985_v22  ;;  %v2214_v39 = vmul.f32 %v5883_v3, %v2194_v15 }
 0x69d   :  { %v2166_v34 = vadd.f32 1e-05, %v2134_v45  ;;  %v2213_v37 = vmul.f32 %v5883_v3, %v2193_v13  ;;  %v2104_v57 = vmul.f32 %v5944_v62, %v5944_v62  ;;  %v2149_v13 = vsub.f32 %v5802_v50, %v5928_v43 }
 0x69e   :  { %v2165_v28 = vadd.f32 1e-05, %v2133_v17  ;;  %v2052_v60 = vpop.xlane.xlu1 %2051  ;;  %v2103_v38 = vmul.f32 %v5946_v9, %v5946_v9  ;;  %v2234_v24 = vadd.f32 %v5893_v12, %v2214_v39 }
 0x69f   :  { %4719 = vrsqrt.f32 %v2166_v34  ;;  %v2088_v55 = vmul.f32 0.03125, %v2052_v60  ;;  %v2049_v32 = vpop.xlane.xlu0 %2048  ;;  %v2233_v11 = vadd.f32 %v5893_v12, %v2213_v37 }
 0x6a0   :  { %4721 = vrsqrt.f32 %v2165_v28  ;;  %v2087_v59 = vmul.f32 0.03125, %v2049_v32 }
 0x6a1   :  { %v4716_v26 = vpop.eup %4715  ;;  %v2120_v33 = vsub.f32 %v2088_v55, %v2104_v57  ;;  %4340 = vmatprep.mubr.msk.f32.mxu0 %vm348_vm1, %v2233_v11  ;;  %v2152_v11 = vsub.f32 %v5823_v8, %v5944_v62 }
 0x6a2   :  { %v4718_v1 = vpop.eup %4717  ;;  %v2119_v2 = vsub.f32 %v2087_v59, %v2103_v38  ;;  %v1994_v48 = vpop.xlane.xlu1 %1993  ;;  %4341 = vmatmul.mubr.msk.f32.gmra.mrb[44].mxu0 %vm348_vm1, %v2234_v24  ;;  %v2196_v51 = vmul.f32 %v4716_v26, %v2148_v21  ;;  %v2151_v24 = vsub.f32 %v5826_v18, %v5946_v9 }
 0x6a3   :  { %v2136_v54 = vmax.f32 %v2120_v33, 0.0  ;;  %v2074_v0 = vmul.f32 0.03125, %v1994_v48  ;;  %v1991_v16 = vpop.xlane.xlu0 %1990  ;;  %v2195_v4 = vmul.f32 %v4718_v1, %v2147_v31 }
 0x6a4   :  { %v2135_v58 = vmax.f32 %v2119_v2, 0.0  ;;  %v2073_v47 = vmul.f32 0.03125, %v1991_v16  ;;  %v2216_v29 = vmul.f32 %v5883_v3, %v2196_v51 }
 0x6a5   :  { %v2168_v52 = vadd.f32 1e-05, %v2136_v54  ;;  %v2215_v5 = vmul.f32 %v5883_v3, %v2195_v4  ;;  %v2106_v19 = vmul.f32 %v2074_v0, %v2074_v0  ;;  %v2154_v48 = vsub.f32 %v5841_v14, %v2074_v0 }
 0x6a6   :  { %v2167_v46 = vadd.f32 1e-05, %v2135_v58  ;;  %v2058_v40 = vpop.xlane.xlu1 %2057  ;;  %v2105_v7 = vmul.f32 %v2073_v47, %v2073_v47  ;;  %v2236_v45 = vadd.f32 %v5893_v12, %v2216_v29  ;;  %v2153_v9 = vsub.f32 %v5844_v6, %v2073_v47  ;;  %v3907_v47 = vld [vmem:[%s6533_s7 + $0x50] sm:$0xff] }
 0x6a7   :  { %4723 = vrsqrt.f32 %v2168_v52  ;;  %v2090_v10 = vmul.f32 0.03125, %v2058_v40  ;;  %v2055_v35 = vpop.xlane.xlu0 %2054  ;;  %v2235_v61 = vadd.f32 %v5893_v12, %v2215_v5 }
 0x6a8   :  { %4725 = vrsqrt.f32 %v2167_v46  ;;  %v2089_v15 = vmul.f32 0.03125, %v2055_v35 }
 0x6a9   :  { %v4720_v22 = vpop.eup %4719  ;;  %v2122_v17 = vsub.f32 %v2090_v10, %v2106_v19  ;;  %4343 = vmatprep.mubr.msk.f32.mxu0 %vm348_vm1, %v2235_v61 }
 0x6aa   :  { %v4722_v49 = vpop.eup %4721  ;;  %v2121_v39 = vsub.f32 %v2089_v15, %v2105_v7  ;;  %4344 = vmatmul.mubr.msk.f32.gmra.mrb[46].mxu0 %vm348_vm1, %v2236_v45  ;;  %v2198_v34 = vmul.f32 %v4720_v22, %v2150_v25  ;;  %v3908_v25 = vld [vmem:[%s6533_s7 + $0x58] sm:$0xff] }
 0x6ab   :  { %v2138_v37 = vmax.f32 %v2122_v17, 0.0  ;;  %v2197_v21 = vmul.f32 %v4722_v49, %v2149_v13  ;;  %v4511_v46 = vpack.c.bf16 %v3908_v25, %v3907_v47 }
 0x6ac   :  { %v2137_v28 = vmax.f32 %v2121_v39, 0.0  ;;  %v2218_v60 = vmul.f32 %v5883_v3, %v2198_v34 }
 0x6ad   :  { %v2170_v57 = vadd.f32 1e-05, %v2138_v37  ;;  %v2217_v55 = vmul.f32 %v5883_v3, %v2197_v21  ;;  %4512 = vmatprep.subr.bf16.mxu1 %v4511_v46 }
 0x6ae   :  { %v2169_v32 = vadd.f32 1e-05, %v2137_v28  ;;  %v2238_v38 = vadd.f32 %v5893_v12, %v2218_v60  ;;  %4514 = vmatpush3.bf16.msra.mxu1 %v4511_v46 }
 0x6af   :  { %4727 = vrsqrt.f32 %v2170_v57  ;;  %v2237_v43 = vadd.f32 %v5893_v12, %v2217_v55 }
 0x6b0   :  { %4729 = vrsqrt.f32 %v2169_v32 }
 0x6b1   :  { %v4724_v59 = vpop.eup %4723  ;;  %4346 = vmatprep.mubr.msk.f32.mxu0 %vm348_vm1, %v2237_v43 }
 0x6b2   :  { %v4726_v26 = vpop.eup %4725  ;;  %4347 = vmatmul.mubr.msk.f32.gmra.mrb[48].mxu0 %vm348_vm1, %v2238_v38  ;;  %v2200_v31 = vmul.f32 %v4724_v59, %v2152_v11 }
 0x6b3   :  { %v2199_v33 = vmul.f32 %v4726_v26, %v2151_v24 }
 0x6b4   :  { %v2220_v1 = vmul.f32 %v5883_v3, %v2200_v31 }
 0x6b5   :  { %v2219_v2 = vmul.f32 %v5883_v3, %v2199_v33 }
 0x6b6   :  { %v2240_v51 = vadd.f32 %v5893_v12, %v2220_v1 }
 0x6b7   :  { %v2239_v62 = vadd.f32 %v5893_v12, %v2219_v2 }
 0x6b9   :  { %v4728_v54 = vpop.eup %4727  ;;  %4349 = vmatprep.mubr.msk.f32.mxu0 %vm348_vm1, %v2239_v62 }
 0x6ba   :  { %v4730_v16 = vpop.eup %4729  ;;  %4350 = vmatmul.mubr.msk.f32.gmra.mrb[50].mxu0 %vm348_vm1, %v2240_v51  ;;  %v2202_v4 = vmul.f32 %v4728_v54, %v2154_v48 }
 0x6bb   :  { %v2201_v58 = vmul.f32 %v4730_v16, %v2153_v9 }
 0x6bc   :  { %v2222_v29 = vmul.f32 %v5883_v3, %v2202_v4 }
 0x6bd   :  { %v2221_v52 = vmul.f32 %v5883_v3, %v2201_v58  ;;  %v6005_v3 = vld [vmem:[%s6532_s6 + $0x2] ss:$0 sm:$0xff] }
 0x6be   :  { %v2242_v0 = vadd.f32 %v5893_v12, %v2222_v29 }
 0x6bf   :  { %v2241_v5 = vadd.f32 %v5893_v12, %v2221_v52 }
 0x6c1   :  { %4352 = vmatprep.mubr.msk.f32.mxu0 %vm348_vm1, %v2241_v5 }
 0x6c2   :  { %4353 = vmatmul.mubr.msk.f32.gmra.mrb[52].mxu0 %vm348_vm1, %v2242_v0 }
 0x75d   :  { %v4333_v12 = vpop.f32.mrb[38].mxu0 }
 0x75e   :  { %v2373_v40 = vadd.f32 %v4333_v12, %v6005_v3  ;;  %v2367_v19 = vpop.f32.mrb[39].mxu0 }
 0x75f   :  { %v2368_v10 = vadd.f32 %v6005_v3, %v2367_v19 }
 0x760   :  { %v2463_v35 = vmul.f32 0.70710677, %v2373_v40  ;;  %v2447_v55 = vmul.f32 0.5, %v2373_v40 }
 0x761   :  { %v2462_v61 = vmul.f32 0.70710677, %v2368_v10  ;;  %v2446_v21 = vmul.f32 0.5, %v2368_v10 }
 0x762   :  { %4731 = verf.f32 %v2463_v35 }
 0x763   :  { %4733 = verf.f32 %v2462_v61 }
 0x765   :  { %v4336_v7 = vpop.f32.mrb[40].mxu0 }
 0x766   :  { %v2383_v15 = vadd.f32 %v4336_v7, %v6005_v3  ;;  %v2377_v45 = vpop.f32.mrb[41].mxu0 }
 0x767   :  { %v2378_v22 = vadd.f32 %v6005_v3, %v2377_v45 }
 0x768   :  { %v2465_v13 = vmul.f32 0.70710677, %v2383_v15  ;;  %v2449_v51 = vmul.f32 0.5, %v2383_v15 }
 0x769   :  { %v2464_v17 = vmul.f32 0.70710677, %v2378_v22  ;;  %v2448_v1 = vmul.f32 0.5, %v2378_v22 }
 0x76a   :  { %4735 = verf.f32 %v2465_v13 }
 0x76b   :  { %4737 = verf.f32 %v2464_v17 }
 0x76c   :  { %v4732_v49 = vpop.eup %4731 }
 0x76d   :  { %v4734_v39 = vpop.eup %4733  ;;  %v2495_v34 = vadd.f32 1.0, %v4732_v49  ;;  %v4339_v37 = vpop.f32.mrb[42].mxu0 }
 0x76e   :  { %v2494_v28 = vadd.f32 1.0, %v4734_v39  ;;  %v2393_v60 = vadd.f32 %v4339_v37, %v6005_v3  ;;  %v2387_v57 = vpop.f32.mrb[43].mxu0 }
 0x76f   :  { %v2388_v32 = vadd.f32 %v6005_v3, %v2387_v57  ;;  %v2511_v38 = vmul.f32 %v2495_v34, %v2447_v55 }
 0x770   :  { %v2510_v43 = vmul.f32 %v2494_v28, %v2446_v21  ;;  %v2467_v11 = vmul.f32 0.70710677, %v2393_v60  ;;  %v2451_v40 = vmul.f32 0.5, %v2393_v60 }
 0x771   :  { %v2466_v59 = vmul.f32 0.70710677, %v2388_v32  ;;  %v2450_v47 = vmul.f32 0.5, %v2388_v32 }
 0x772   :  { %4739 = verf.f32 %v2467_v11  ;;  %4363 = vmatprep.mubr.msk.f32.mxu1 %vm348_vm1, %v2510_v43 }
 0x773   :  { %4741 = verf.f32 %v2466_v59  ;;  %4364 = vmatmul.mubr.msk.f32.vlgmr.msra.gmra.mrb[42].mxu1 %vm348_vm1, %v2511_v38 }
 0x774   :  { %v4736_v24 = vpop.eup %4735 }
 0x775   :  { %v4738_v26 = vpop.eup %4737  ;;  %v2497_v31 = vadd.f32 1.0, %v4736_v24  ;;  %v4342_v33 = vpop.f32.mrb[44].mxu0 }
 0x776   :  { %v2496_v2 = vadd.f32 1.0, %v4738_v26  ;;  %v2403_v62 = vadd.f32 %v4342_v33, %v6005_v3  ;;  %v2397_v48 = vpop.f32.mrb[45].mxu0 }
 0x777   :  { %v2398_v54 = vadd.f32 %v6005_v3, %v2397_v48  ;;  %v2513_v4 = vmul.f32 %v2497_v31, %v2449_v51 }
 0x778   :  { %v2512_v9 = vmul.f32 %v2496_v2, %v2448_v1  ;;  %v2469_v16 = vmul.f32 0.70710677, %v2403_v62  ;;  %v2453_v37 = vmul.f32 0.5, %v2403_v62 }
 0x779   :  { %v2468_v58 = vmul.f32 0.70710677, %v2398_v54  ;;  %v2452_v17 = vmul.f32 0.5, %v2398_v54 }
 0x77a   :  { %4743 = verf.f32 %v2469_v16  ;;  %4366 = vmatprep.mubr.msk.f32.mxu1 %vm348_vm1, %v2512_v9 }
 0x77b   :  { %4745 = verf.f32 %v2468_v58  ;;  %4367 = vmatmul.mubr.msk.f32.gmra.mrb[44].mxu1 %vm348_vm1, %v2513_v4 }
 0x77c   :  { %v4740_v29 = vpop.eup %4739 }
 0x77d   :  { %v4742_v52 = vpop.eup %4741  ;;  %v2499_v5 = vadd.f32 1.0, %v4740_v29  ;;  %v4345_v0 = vpop.f32.mrb[46].mxu0 }
 0x77e   :  { %v2498_v25 = vadd.f32 1.0, %v4742_v52  ;;  %v2413_v46 = vadd.f32 %v4345_v0, %v6005_v3  ;;  %v2407_v12 = vpop.f32.mrb[47].mxu0 }
 0x77f   :  { %v2408_v19 = vadd.f32 %v6005_v3, %v2407_v12  ;;  %v2515_v61 = vmul.f32 %v2499_v5, %v2451_v40 }
 0x780   :  { %v2514_v10 = vmul.f32 %v2498_v25, %v2450_v47  ;;  %v2471_v35 = vmul.f32 0.70710677, %v2413_v46  ;;  %v2455_v33 = vmul.f32 0.5, %v2413_v46 }
 0x781   :  { %v2470_v7 = vmul.f32 0.70710677, %v2408_v19  ;;  %v2454_v59 = vmul.f32 0.5, %v2408_v19 }
 0x782   :  { %4747 = verf.f32 %v2471_v35  ;;  %4369 = vmatprep.mubr.msk.f32.mxu1 %vm348_vm1, %v2514_v10 }
 0x783   :  { %4749 = verf.f32 %v2470_v7  ;;  %4370 = vmatmul.mubr.msk.f32.gmra.mrb[46].mxu1 %vm348_vm1, %v2515_v61 }
 0x784   :  { %v4744_v15 = vpop.eup %4743 }
 0x785   :  { %v4746_v45 = vpop.eup %4745  ;;  %v2501_v22 = vadd.f32 1.0, %v4744_v15  ;;  %v4348_v13 = vpop.f32.mrb[48].mxu0 }
 0x786   :  { %v2500_v49 = vadd.f32 1.0, %v4746_v45  ;;  %v2423_v39 = vadd.f32 %v4348_v13, %v6005_v3  ;;  %v2417_v34 = vpop.f32.mrb[49].mxu0 }
 0x787   :  { %v2418_v21 = vadd.f32 %v6005_v3, %v2417_v34  ;;  %v2517_v57 = vmul.f32 %v2501_v22, %v2453_v37 }
 0x788   :  { %v2516_v28 = vmul.f32 %v2500_v49, %v2452_v17  ;;  %v2473_v60 = vmul.f32 0.70710677, %v2423_v39  ;;  %v2457_v0 = vmul.f32 0.5, %v2423_v39 }
 0x789   :  { %v2472_v55 = vmul.f32 0.70710677, %v2418_v21  ;;  %v2456_v58 = vmul.f32 0.5, %v2418_v21 }
 0x78a   :  { %4751 = verf.f32 %v2473_v60  ;;  %4372 = vmatprep.mubr.msk.f32.mxu1 %vm348_vm1, %v2516_v28  ;;  %v6042_v28 = vld [vmem:[%s6534_s8 + $0x2] ss:$0 sm:$0xff] }
 0x78b   :  { %4753 = verf.f32 %v2472_v55  ;;  %4373 = vmatmul.mubr.msk.f32.gmra.mrb[48].mxu1 %vm348_vm1, %v2517_v57 }
 0x78c   :  { %v4748_v32 = vpop.eup %4747 }
 0x78d   :  { %v4750_v43 = vpop.eup %4749  ;;  %v2503_v11 = vadd.f32 1.0, %v4748_v32  ;;  %v4351_v38 = vpop.f32.mrb[50].mxu0 }
 0x78e   :  { %v2502_v24 = vadd.f32 1.0, %v4750_v43  ;;  %v2433_v26 = vadd.f32 %v4351_v38, %v6005_v3  ;;  %v2427_v31 = vpop.f32.mrb[51].mxu0 }
 0x78f   :  { %v2428_v1 = vadd.f32 %v6005_v3, %v2427_v31  ;;  %v2519_v48 = vmul.f32 %v2503_v11, %v2455_v33 }
 0x790   :  { %v2518_v2 = vmul.f32 %v2502_v24, %v2454_v59  ;;  %v2475_v62 = vmul.f32 0.70710677, %v2433_v26  ;;  %v2459_v15 = vmul.f32 0.5, %v2433_v26 }
 0x791   :  { %v2474_v51 = vmul.f32 0.70710677, %v2428_v1  ;;  %v2458_v61 = vmul.f32 0.5, %v2428_v1 }
 0x792   :  { %4755 = verf.f32 %v2475_v62  ;;  %4375 = vmatprep.mubr.msk.f32.mxu1 %vm348_vm1, %v2518_v2 }
 0x793   :  { %4757 = verf.f32 %v2474_v51  ;;  %4376 = vmatmul.mubr.msk.f32.gmra.mrb[50].mxu1 %vm348_vm1, %v2519_v48 }
 0x794   :  { %v4752_v54 = vpop.eup %4751 }
 0x795   :  { %v4754_v9 = vpop.eup %4753  ;;  %v2505_v16 = vadd.f32 1.0, %v4752_v54  ;;  %v4354_v4 = vpop.f32.mrb[52].mxu0 }
 0x796   :  { %v2504_v29 = vadd.f32 1.0, %v4754_v9  ;;  %v2443_v52 = vadd.f32 %v4354_v4, %v6005_v3  ;;  %v2437_v5 = vpop.f32.mrb[53].mxu0 }
 0x797   :  { %v2438_v47 = vadd.f32 %v6005_v3, %v2437_v5  ;;  %v2521_v12 = vmul.f32 %v2505_v16, %v2457_v0 }
 0x798   :  { %v2520_v25 = vmul.f32 %v2504_v29, %v2456_v58  ;;  %v2477_v46 = vmul.f32 0.70710677, %v2443_v52  ;;  %v2461_v34 = vmul.f32 0.5, %v2443_v52 }
 0x799   :  { %v2476_v40 = vmul.f32 0.70710677, %v2438_v47  ;;  %v2460_v49 = vmul.f32 0.5, %v2438_v47 }
 0x79a   :  { %4759 = verf.f32 %v2477_v46  ;;  %4378 = vmatprep.mubr.msk.f32.mxu1 %vm348_vm1, %v2520_v25 }
 0x79b   :  { %4761 = verf.f32 %v2476_v40  ;;  %4379 = vmatmul.mubr.msk.f32.gmra.mrb[52].mxu1 %vm348_vm1, %v2521_v12 }
 0x79c   :  { %v4756_v19 = vpop.eup %4755 }
 0x79d   :  { %v4758_v10 = vpop.eup %4757  ;;  %v2507_v35 = vadd.f32 1.0, %v4756_v19 }
 0x79e   :  { %v2506_v7 = vadd.f32 1.0, %v4758_v10 }
 0x79f   :  { %v2523_v22 = vmul.f32 %v2507_v35, %v2459_v15 }
 0x7a0   :  { %v2522_v45 = vmul.f32 %v2506_v7, %v2458_v61 }
 0x7a2   :  { %4381 = vmatprep.mubr.msk.f32.mxu1 %vm348_vm1, %v2522_v45 }
 0x7a3   :  { %4382 = vmatmul.mubr.msk.f32.gmra.mrb[54].mxu1 %vm348_vm1, %v2523_v22 }
 0x7a4   :  { %v4760_v3 = vpop.eup %4759 }
 0x7a5   :  { %v4762_v13 = vpop.eup %4761  ;;  %v2509_v17 = vadd.f32 1.0, %v4760_v3 }
 0x7a6   :  { %v2508_v39 = vadd.f32 1.0, %v4762_v13 }
 0x7a7   :  { %v2525_v21 = vmul.f32 %v2509_v17, %v2461_v34 }
 0x7a8   :  { %v2524_v37 = vmul.f32 %v2508_v39, %v2460_v49 }
 0x7aa   :  { %4384 = vmatprep.mubr.msk.f32.mxu1 %vm348_vm1, %v2524_v37 }
 0x7ab   :  { %4385 = vmatmul.mubr.msk.f32.gmra.mrb[56].mxu1 %vm348_vm1, %v2525_v21 }
 0x846   :  { %v4365_v60 = vpop.f32.mrb[42].mxu1 }
 0x847   :  { %v2656_v57 = vadd.f32 %v4365_v60, %v6042_v28  ;;  %v2650_v55 = vpop.f32.mrb[43].mxu1 }
 0x848   :  { %v2651_v32 = vadd.f32 %v6042_v28, %v2650_v55 }
 0x849   :  { %v6047_v43 = vadd.f32 %v2656_v57, %v5709_v41 }
 0x84a   :  { %v6050_v11 = vadd.f32 %v2651_v32, %v5712_v42 }
 0x84b   :  { %v2750_v38 = vsel %vm348_vm1, %v6047_v43, 0.0  ;;  %v2796_v59 = vmul.f32 %v6047_v43, %v6047_v43 }
 0x84c   :  { %2751 = vadd.xlane.f32.xlu1 %v2750_v38  ;;  %v2747_v24 = vsel %vm348_vm1, %v6050_v11, 0.0  ;;  %v2795_v26 = vmul.f32 %v6050_v11, %v6050_v11 }
 0x84d   :  { %2748 = vadd.xlane.f32.xlu0 %v2747_v24  ;;  %v2814_v42 = vsel %vm348_vm1, %v2796_v59, 0.0  ;;  %v3928_v59 = vld [vmem:[%s6531_s5 + $0x60] sm:$0xff]  ;;  %v3929_v24 = vld [vmem:[%s6531_s5 + $0x68] sm:$0xff] }
 0x84e   :  { %v4368_v31 = vpop.f32.mrb[44].mxu1  ;;  %v2811_v2 = vsel %vm348_vm1, %v2795_v26, 0.0 }
 0x84f   :  { %v2666_v41 = vadd.f32 %v4368_v31, %v6042_v28  ;;  %v2660_v33 = vpop.f32.mrb[45].mxu1 }
 0x850   :  { %v2661_v1 = vadd.f32 %v6042_v28, %v2660_v33  ;;  %2815 = vadd.xlane.f32.xlu1 %v2814_v42 }
 0x851   :  { %v6065_v62 = vadd.f32 %v2666_v41, %v5727_v23  ;;  %2812 = vadd.xlane.f32.xlu0 %v2811_v2  ;;  %v4515_v41 = vpack.c.bf16 %v3929_v24, %v3928_v59 }
 0x852   :  { %v6068_v48 = vadd.f32 %v2661_v1, %v5730_v53 }
 0x853   :  { %v2756_v51 = vsel %vm348_vm1, %v6065_v62, 0.0  ;;  %v2798_v54 = vmul.f32 %v6065_v62, %v6065_v62  ;;  %4516 = vmatprep.subr.bf16.mxu0 %v4515_v41 }
 0x854   :  { %2757 = vadd.xlane.f32.xlu1 %v2756_v51  ;;  %v2753_v9 = vsel %vm348_vm1, %v6068_v48, 0.0  ;;  %v2797_v16 = vmul.f32 %v6068_v48, %v6068_v48  ;;  %4518 = vmatpush3.bf16.msra.mxu0 %v4515_v41  ;;  %v3930_v51 = vld [vmem:[%s6531_s5 + $0x70] sm:$0xff] }
 0x855   :  { %2754 = vadd.xlane.f32.xlu0 %v2753_v9  ;;  %v2820_v53 = vsel %vm348_vm1, %v2798_v54, 0.0 }
 0x856   :  { %v4371_v23 = vpop.f32.mrb[46].mxu1  ;;  %v2817_v52 = vsel %vm348_vm1, %v2797_v16, 0.0 }
 0x857   :  { %v2676_v4 = vadd.f32 %v4371_v23, %v6042_v28  ;;  %v2670_v58 = vpop.f32.mrb[47].mxu1 }
 0x858   :  { %v2671_v29 = vadd.f32 %v6042_v28, %v2670_v58  ;;  %2821 = vadd.xlane.f32.xlu1 %v2820_v53 }
 0x859   :  { %v6083_v5 = vadd.f32 %v2676_v4, %v5745_v44  ;;  %2818 = vadd.xlane.f32.xlu0 %v2817_v52 }
 0x85a   :  { %v6086_v0 = vadd.f32 %v2671_v29, %v5748_v56 }
 0x85b   :  { %v2762_v47 = vsel %vm348_vm1, %v6083_v5, 0.0  ;;  %v2800_v25 = vmul.f32 %v6083_v5, %v6083_v5 }
 0x85c   :  { %2763 = vadd.xlane.f32.xlu1 %v2762_v47  ;;  %v2759_v46 = vsel %vm348_vm1, %v6086_v0, 0.0  ;;  %v2799_v12 = vmul.f32 %v6086_v0, %v6086_v0 }
 0x85d   :  { %2760 = vadd.xlane.f32.xlu0 %v2759_v46  ;;  %v2826_v56 = vsel %vm348_vm1, %v2800_v25, 0.0 }
 0x85e   :  { %v4374_v44 = vpop.f32.mrb[48].mxu1  ;;  %v2823_v35 = vsel %vm348_vm1, %v2799_v12, 0.0 }
 0x85f   :  { %v2686_v40 = vadd.f32 %v4374_v44, %v6042_v28  ;;  %v2680_v19 = vpop.f32.mrb[49].mxu1 }
 0x860   :  { %v2681_v10 = vadd.f32 %v6042_v28, %v2680_v19  ;;  %2827 = vadd.xlane.f32.xlu1 %v2826_v56 }
 0x861   :  { %v6101_v61 = vadd.f32 %v2686_v40, %v5763_v27  ;;  %2824 = vadd.xlane.f32.xlu0 %v2823_v35 }
 0x862   :  { %v6104_v7 = vadd.f32 %v2681_v10, %v5766_v63 }
 0x863   :  { %v2768_v15 = vsel %vm348_vm1, %v6101_v61, 0.0  ;;  %v2802_v45 = vmul.f32 %v6101_v61, %v6101_v61 }
 0x864   :  { %2769 = vadd.xlane.f32.xlu1 %v2768_v15  ;;  %v2765_v22 = vsel %vm348_vm1, %v6104_v7, 0.0  ;;  %v2801_v3 = vmul.f32 %v6104_v7, %v6104_v7 }
 0x865   :  { %2766 = vadd.xlane.f32.xlu0 %v2765_v22  ;;  %v2832_v63 = vsel %vm348_vm1, %v2802_v45, 0.0 }
 0x866   :  { %v4377_v27 = vpop.f32.mrb[50].mxu1  ;;  %v2829_v39 = vsel %vm348_vm1, %v2801_v3, 0.0 }
 0x867   :  { %v2696_v13 = vadd.f32 %v4377_v27, %v6042_v28  ;;  %v2690_v17 = vpop.f32.mrb[51].mxu1  ;;  %v3949_v27 = vld [vmem:[%s6533_s7 + $0x60] sm:$0xff] }
 0x868   :  { %v2691_v49 = vadd.f32 %v6042_v28, %v2690_v17  ;;  %2833 = vadd.xlane.f32.xlu1 %v2832_v63 }
 0x869   :  { %v6119_v34 = vadd.f32 %v2696_v13, %v5781_v30  ;;  %2830 = vadd.xlane.f32.xlu0 %v2829_v39  ;;  %v3950_v13 = vld [vmem:[%s6533_s7 + $0x68] sm:$0xff] }
 0x86a   :  { %v6122_v37 = vadd.f32 %v2691_v49, %v5784_v20  ;;  %v4523_v17 = vpack.c.bf16 %v3950_v13, %v3949_v27  ;;  %v6227_v27 = vld [vmem:[%s6529_s3 + $0x3] ss:$0 sm:$0xff] }
 0x86b   :  { %v2774_v21 = vsel %vm348_vm1, %v6119_v34, 0.0  ;;  %v2804_v60 = vmul.f32 %v6119_v34, %v6119_v34 }
 0x86c   :  { %2775 = vadd.xlane.f32.xlu1 %v2774_v21  ;;  %v2771_v57 = vsel %vm348_vm1, %v6122_v37, 0.0  ;;  %v2803_v55 = vmul.f32 %v6122_v37, %v6122_v37  ;;  %4524 = vmatprep.subr.bf16.mxu1 %v4523_v17 }
 0x86d   :  { %2772 = vadd.xlane.f32.xlu0 %v2771_v57  ;;  %v2838_v20 = vsel %vm348_vm1, %v2804_v60, 0.0  ;;  %4526 = vmatpush3.bf16.msra.mxu1 %v4523_v17 }
 0x86e   :  { %v4380_v30 = vpop.f32.mrb[52].mxu1  ;;  %v2835_v31 = vsel %vm348_vm1, %v2803_v55, 0.0 }
 0x86f   :  { %v2706_v32 = vadd.f32 %v4380_v30, %v6042_v28  ;;  %v2700_v38 = vpop.f32.mrb[53].mxu1 }
 0x870   :  { %v2701_v26 = vadd.f32 %v6042_v28, %v2700_v38  ;;  %2839 = vadd.xlane.f32.xlu1 %v2838_v20 }
 0x871   :  { %v6143_v33 = vadd.f32 %v2706_v32, %v5799_v36  ;;  %2836 = vadd.xlane.f32.xlu0 %v2835_v31  ;;  %v3931_v36 = vld [vmem:[%s6531_s5 + $0x78] sm:$0xff] }
 0x872   :  { %v6146_v42 = vadd.f32 %v2701_v26, %v5802_v50  ;;  %v4519_v9 = vpack.c.bf16 %v3931_v36, %v3930_v51 }
 0x873   :  { %v2780_v1 = vsel %vm348_vm1, %v6143_v33, 0.0  ;;  %v2806_v2 = vmul.f32 %v6143_v33, %v6143_v33 }
 0x874   :  { %2781 = vadd.xlane.f32.xlu1 %v2780_v1  ;;  %v2777_v50 = vsel %vm348_vm1, %v6146_v42, 0.0  ;;  %v2805_v54 = vmul.f32 %v6146_v42, %v6146_v42  ;;  %4520 = vmatprep.subr.bf16.mxu0 %v4519_v9 }
 0x875   :  { %2778 = vadd.xlane.f32.xlu0 %v2777_v50  ;;  %v2844_v58 = vsel %vm348_vm1, %v2806_v2, 0.0  ;;  %4522 = vmatpush3.bf16.msra.mxu0 %v4519_v9 }
 0x876   :  { %v4383_v16 = vpop.f32.mrb[54].mxu1  ;;  %v2841_v29 = vsel %vm348_vm1, %v2805_v54, 0.0 }
 0x877   :  { %v2716_v23 = vadd.f32 %v4383_v16, %v6042_v28  ;;  %v2710_v4 = vpop.f32.mrb[55].mxu1 }
 0x878   :  { %v2711_v53 = vadd.f32 %v6042_v28, %v2710_v4  ;;  %2845 = vadd.xlane.f32.xlu1 %v2844_v58 }
 0x879   :  { %v6167_v52 = vadd.f32 %v2716_v23, %v5823_v8  ;;  %2842 = vadd.xlane.f32.xlu0 %v2841_v29 }
 0x87a   :  { %v6170_v47 = vadd.f32 %v2711_v53, %v5826_v18 }
 0x87b   :  { %v2786_v25 = vsel %vm348_vm1, %v6167_v52, 0.0  ;;  %v2808_v46 = vmul.f32 %v6167_v52, %v6167_v52 }
 0x87c   :  { %2787 = vadd.xlane.f32.xlu1 %v2786_v25  ;;  %v2783_v12 = vsel %vm348_vm1, %v6170_v47, 0.0  ;;  %v2807_v44 = vmul.f32 %v6170_v47, %v6170_v47 }
 0x87d   :  { %2784 = vadd.xlane.f32.xlu0 %v2783_v12  ;;  %v2850_v18 = vsel %vm348_vm1, %v2808_v46, 0.0 }
 0x87e   :  { %v4386_v8 = vpop.f32.mrb[56].mxu1  ;;  %v2847_v10 = vsel %vm348_vm1, %v2807_v44, 0.0 }
 0x87f   :  { %v2726_v40 = vadd.f32 %v4386_v8, %v6042_v28  ;;  %v2720_v19 = vpop.f32.mrb[57].mxu1 }
 0x880   :  { %v2721_v56 = vadd.f32 %v6042_v28, %v2720_v19  ;;  %2851 = vadd.xlane.f32.xlu1 %v2850_v18 }
 0x881   :  { %v6185_v35 = vadd.f32 %v2726_v40, %v5841_v14  ;;  %2848 = vadd.xlane.f32.xlu0 %v2847_v10 }
 0x882   :  { %v6188_v15 = vadd.f32 %v2721_v56, %v5844_v6 }
 0x883   :  { %v2792_v45 = vsel %vm348_vm1, %v6185_v35, 0.0  ;;  %v2810_v22 = vmul.f32 %v6185_v35, %v6185_v35 }
 0x884   :  { %2793 = vadd.xlane.f32.xlu1 %v2792_v45  ;;  %v2789_v28 = vsel %vm348_vm1, %v6188_v15, 0.0  ;;  %v2809_v3 = vmul.f32 %v6188_v15, %v6188_v15 }
 0x885   :  { %2790 = vadd.xlane.f32.xlu0 %v2789_v28  ;;  %v2856_v14 = vsel %vm348_vm1, %v2810_v22, 0.0 }
 0x886   :  { %v2853_v6 = vsel %vm348_vm1, %v2809_v3, 0.0 }
 0x888   :  { %2857 = vadd.xlane.f32.xlu1 %v2856_v14 }
 0x889   :  { %2854 = vadd.xlane.f32.xlu0 %v2853_v6 }
 0x8d9   :  { %v2752_v63 = vpop.xlane.xlu1 %2751 }
 0x8da   :  { %v2860_v49 = vmul.f32 0.03125, %v2752_v63  ;;  %v2749_v39 = vpop.xlane.xlu0 %2748 }
 0x8db   :  { %v2859_v21 = vmul.f32 0.03125, %v2749_v39 }
 0x8dc   :  { %v2892_v57 = vmul.f32 %v2860_v49, %v2860_v49  ;;  %v2940_v22 = vsub.f32 %v6047_v43, %v2860_v49 }
 0x8dd   :  { %v2816_v60 = vpop.xlane.xlu1 %2815  ;;  %v2891_v32 = vmul.f32 %v2859_v21, %v2859_v21  ;;  %v2939_v6 = vsub.f32 %v6050_v11, %v2859_v21  ;;  %v6237_v21 = vld [vmem:[%s6530_s4 + $0x3] ss:$0 sm:$0xff] }
 0x8de   :  { %v2876_v55 = vmul.f32 0.03125, %v2816_v60  ;;  %v2813_v30 = vpop.xlane.xlu0 %2812 }
 0x8df   :  { %v2875_v38 = vmul.f32 0.03125, %v2813_v30 }
 0x8e0   :  { %v2908_v20 = vsub.f32 %v2876_v55, %v2892_v57 }
 0x8e1   :  { %v2907_v59 = vsub.f32 %v2875_v38, %v2891_v32  ;;  %v2758_v24 = vpop.xlane.xlu1 %2757 }
 0x8e2   :  { %v2924_v26 = vmax.f32 %v2908_v20, 0.0  ;;  %v6206_v31 = vmul.f32 0.03125, %v2758_v24  ;;  %v2755_v41 = vpop.xlane.xlu0 %2754 }
 0x8e3   :  { %v2923_v1 = vmax.f32 %v2907_v59, 0.0  ;;  %v6208_v2 = vmul.f32 0.03125, %v2755_v41 }
 0x8e4   :  { %v2956_v51 = vadd.f32 1e-05, %v2924_v26  ;;  %v2894_v54 = vmul.f32 %v6206_v31, %v6206_v31  ;;  %v2942_v26 = vsub.f32 %v6065_v62, %v6206_v31 }
 0x8e5   :  { %v2955_v36 = vadd.f32 1e-05, %v2923_v1  ;;  %v2822_v50 = vpop.xlane.xlu1 %2821  ;;  %v2893_v23 = vmul.f32 %v6208_v2, %v6208_v2  ;;  %v2941_v31 = vsub.f32 %v6068_v48, %v6208_v2 }
 0x8e6   :  { %4763 = vrsqrt.f32 %v2956_v51  ;;  %v2878_v9 = vmul.f32 0.03125, %v2822_v50  ;;  %v2819_v16 = vpop.xlane.xlu0 %2818 }
 0x8e7   :  { %4765 = vrsqrt.f32 %v2955_v36  ;;  %v2877_v4 = vmul.f32 0.03125, %v2819_v16 }
 0x8e8   :  { %v2910_v58 = vsub.f32 %v2878_v9, %v2894_v54 }
 0x8e9   :  { %v2909_v53 = vsub.f32 %v2877_v4, %v2893_v23  ;;  %v2764_v29 = vpop.xlane.xlu1 %2763 }
 0x8ea   :  { %v2926_v25 = vmax.f32 %v2910_v58, 0.0  ;;  %v6214_v46 = vmul.f32 0.03125, %v2764_v29  ;;  %v2761_v12 = vpop.xlane.xlu0 %2760 }
 0x8eb   :  { %v2925_v44 = vmax.f32 %v2909_v53, 0.0  ;;  %v6216_v8 = vmul.f32 0.03125, %v2761_v12 }
 0x8ec   :  { %v2958_v40 = vadd.f32 1e-05, %v2926_v25  ;;  %v2896_v56 = vmul.f32 %v6214_v46, %v6214_v46 }
 0x8ed   :  { %v2957_v19 = vadd.f32 1e-05, %v2925_v44  ;;  %v2828_v18 = vpop.xlane.xlu1 %2827  ;;  %v2895_v28 = vmul.f32 %v6216_v8, %v6216_v8 }
 0x8ee   :  { %4767 = vrsqrt.f32 %v2958_v40  ;;  %v2880_v10 = vmul.f32 0.03125, %v2828_v18  ;;  %v2825_v45 = vpop.xlane.xlu0 %2824 }
 0x8ef   :  { %4769 = vrsqrt.f32 %v2957_v19  ;;  %v2879_v3 = vmul.f32 0.03125, %v2825_v45 }
 0x8f0   :  { %v4764_v14 = vpop.eup %4763  ;;  %v2912_v13 = vsub.f32 %v2880_v10, %v2896_v56 }
 0x8f1   :  { %v4766_v17 = vpop.eup %4765  ;;  %v2988_v63 = vmul.f32 %v4764_v14, %v2940_v22  ;;  %v2911_v39 = vsub.f32 %v2879_v3, %v2895_v28  ;;  %v2770_v60 = vpop.xlane.xlu1 %2769  ;;  %v2944_v28 = vsub.f32 %v6083_v5, %v6214_v46  ;;  %v2943_v46 = vsub.f32 %v6086_v0, %v6216_v8 }
 0x8f2   :  { %v2928_v57 = vmax.f32 %v2912_v13, 0.0  ;;  %v6229_v49 = vmul.f32 0.03125, %v2770_v60  ;;  %v2767_v55 = vpop.xlane.xlu0 %2766  ;;  %v2987_v30 = vmul.f32 %v4766_v17, %v2939_v6 }
 0x8f3   :  { %v3008_v32 = vmul.f32 %v6227_v27, %v2988_v63  ;;  %v2927_v38 = vmax.f32 %v2911_v39, 0.0  ;;  %v6232_v20 = vmul.f32 0.03125, %v2767_v55 }
 0x8f4   :  { %v2960_v59 = vadd.f32 1e-05, %v2928_v57  ;;  %v3007_v24 = vmul.f32 %v6227_v27, %v2987_v30  ;;  %v2898_v51 = vmul.f32 %v6229_v49, %v6229_v49 }
 0x8f5   :  { %v2959_v41 = vadd.f32 1e-05, %v2927_v38  ;;  %v2834_v1 = vpop.xlane.xlu1 %2833  ;;  %v2897_v9 = vmul.f32 %v6232_v20, %v6232_v20  ;;  %v3028_v23 = vadd.f32 %v6237_v21, %v3008_v32 }
 0x8f6   :  { %4771 = vrsqrt.f32 %v2960_v59  ;;  %v2882_v36 = vmul.f32 0.03125, %v2834_v1  ;;  %v2831_v50 = vpop.xlane.xlu0 %2830  ;;  %v3027_v54 = vadd.f32 %v6237_v21, %v3007_v24 }
 0x8f7   :  { %4773 = vrsqrt.f32 %v2959_v41  ;;  %v2881_v16 = vmul.f32 0.03125, %v2831_v50 }
 0x8f8   :  { %v4768_v4 = vpop.eup %4767  ;;  %v2914_v58 = vsub.f32 %v2882_v36, %v2898_v51  ;;  %4395 = vmatprep.mubr.msk.f32.mxu0 %vm348_vm1, %v3027_v54 }
 0x8f9   :  { %v4770_v53 = vpop.eup %4769  ;;  %v2913_v29 = vsub.f32 %v2881_v16, %v2897_v9  ;;  %v2776_v25 = vpop.xlane.xlu1 %2775  ;;  %4396 = vmatmul.mubr.msk.f32.vlgmr.msra.gmra.mrb[54].mxu0 %vm348_vm1, %v3028_v23  ;;  %v2990_v12 = vmul.f32 %v4768_v4, %v2942_v26  ;;  %v2946_v16 = vsub.f32 %v6101_v61, %v6229_v49  ;;  %v2945_v49 = vsub.f32 %v6104_v7, %v6232_v20 }
 0x8fa   :  { %v2930_v44 = vmax.f32 %v2914_v58, 0.0  ;;  %v6252_v40 = vmul.f32 0.03125, %v2776_v25  ;;  %v2773_v19 = vpop.xlane.xlu0 %2772  ;;  %v2989_v18 = vmul.f32 %v4770_v53, %v2941_v31 }
 0x8fb   :  { %v2929_v56 = vmax.f32 %v2913_v29, 0.0  ;;  %v6254_v10 = vmul.f32 0.03125, %v2773_v19  ;;  %v3010_v45 = vmul.f32 %v6227_v27, %v2990_v12 }
 0x8fc   :  { %v2962_v2 = vadd.f32 1e-05, %v2930_v44  ;;  %v3009_v22 = vmul.f32 %v6227_v27, %v2989_v18  ;;  %v2900_v6 = vmul.f32 %v6252_v40, %v6252_v40 }
 0x8fd   :  { %v2961_v3 = vadd.f32 1e-05, %v2929_v56  ;;  %v2840_v14 = vpop.xlane.xlu1 %2839  ;;  %v2899_v39 = vmul.f32 %v6254_v10, %v6254_v10  ;;  %v3030_v57 = vadd.f32 %v6237_v21, %v3010_v45 }
 0x8fe   :  { %4775 = vrsqrt.f32 %v2962_v2  ;;  %v2884_v13 = vmul.f32 0.03125, %v2840_v14  ;;  %v2837_v17 = vpop.xlane.xlu0 %2836  ;;  %v3029_v63 = vadd.f32 %v6237_v21, %v3009_v22 }
 0x8ff   :  { %4777 = vrsqrt.f32 %v2961_v3  ;;  %v2883_v60 = vmul.f32 0.03125, %v2837_v17 }
 0x900   :  { %v4772_v55 = vpop.eup %4771  ;;  %v2916_v30 = vsub.f32 %v2884_v13, %v2900_v6  ;;  %4398 = vmatprep.mubr.msk.f32.mxu0 %vm348_vm1, %v3029_v63 }
 0x901   :  { %v4774_v32 = vpop.eup %4773  ;;  %v2915_v38 = vsub.f32 %v2883_v60, %v2899_v39  ;;  %v2782_v59 = vpop.xlane.xlu1 %2781  ;;  %4399 = vmatmul.mubr.msk.f32.gmra.mrb[56].mxu0 %vm348_vm1, %v3030_v57  ;;  %v2992_v24 = vmul.f32 %v4772_v55, %v2944_v28  ;;  %v2948_v60 = vsub.f32 %v6119_v34, %v6252_v40  ;;  %v2947_v40 = vsub.f32 %v6122_v37, %v6254_v10 }
 0x902   :  { %v2932_v26 = vmax.f32 %v2916_v30, 0.0  ;;  %v6270_v41 = vmul.f32 0.03125, %v2782_v59  ;;  %v2779_v1 = vpop.xlane.xlu0 %2778  ;;  %v2991_v51 = vmul.f32 %v4774_v32, %v2943_v46 }
 0x903   :  { %v2931_v36 = vmax.f32 %v2915_v38, 0.0  ;;  %v6272_v50 = vmul.f32 0.03125, %v2779_v1  ;;  %v3012_v54 = vmul.f32 %v6227_v27, %v2992_v24 }
 0x904   :  { %v2964_v8 = vadd.f32 1e-05, %v2932_v26  ;;  %v3011_v9 = vmul.f32 %v6227_v27, %v2991_v51  ;;  %v2902_v31 = vmul.f32 %v6270_v41, %v6270_v41 }
 0x905   :  { %v2963_v23 = vadd.f32 1e-05, %v2931_v36  ;;  %v2846_v4 = vpop.xlane.xlu1 %2845  ;;  %v2901_v25 = vmul.f32 %v6272_v50, %v6272_v50  ;;  %v3032_v44 = vadd.f32 %v6237_v21, %v3012_v54 }
 0x906   :  { %4779 = vrsqrt.f32 %v2964_v8  ;;  %v2886_v58 = vmul.f32 0.03125, %v2846_v4  ;;  %v2843_v53 = vpop.xlane.xlu0 %2842  ;;  %v3031_v29 = vadd.f32 %v6237_v21, %v3011_v9 }
 0x907   :  { %4781 = vrsqrt.f32 %v2963_v23  ;;  %v2885_v12 = vmul.f32 0.03125, %v2843_v53 }
 0x908   :  { %v4776_v19 = vpop.eup %4775  ;;  %v2918_v18 = vsub.f32 %v2886_v58, %v2902_v31  ;;  %4401 = vmatprep.mubr.msk.f32.mxu0 %vm348_vm1, %v3031_v29 }
 0x909   :  { %v4778_v56 = vpop.eup %4777  ;;  %v2917_v45 = vsub.f32 %v2885_v12, %v2901_v25  ;;  %v2788_v2 = vpop.xlane.xlu1 %2787  ;;  %4402 = vmatmul.mubr.msk.f32.gmra.mrb[58].mxu0 %vm348_vm1, %v3032_v44  ;;  %v2994_v22 = vmul.f32 %v4776_v19, %v2946_v16  ;;  %v2950_v12 = vsub.f32 %v6143_v33, %v6270_v41 }
 0x90a   :  { %v2934_v28 = vmax.f32 %v2918_v18, 0.0  ;;  %v6288_v3 = vmul.f32 0.03125, %v2788_v2  ;;  %v2785_v14 = vpop.xlane.xlu0 %2784  ;;  %v2993_v6 = vmul.f32 %v4778_v56, %v2945_v49 }
 0x90b   :  { %v2933_v13 = vmax.f32 %v2917_v45, 0.0  ;;  %v6290_v17 = vmul.f32 0.03125, %v2785_v14  ;;  %v3014_v63 = vmul.f32 %v6227_v27, %v2994_v22 }
 0x90c   :  { %v2966_v20 = vadd.f32 1e-05, %v2934_v28  ;;  %v3013_v39 = vmul.f32 %v6227_v27, %v2993_v6  ;;  %v2904_v46 = vmul.f32 %v6288_v3, %v6288_v3  ;;  %v2949_v6 = vsub.f32 %v6146_v42, %v6272_v50 }
 0x90d   :  { %v2965_v57 = vadd.f32 1e-05, %v2933_v13  ;;  %v2852_v55 = vpop.xlane.xlu1 %2851  ;;  %v2903_v59 = vmul.f32 %v6290_v17, %v6290_v17  ;;  %v3034_v26 = vadd.f32 %v6237_v21, %v3014_v63 }
 0x90e   :  { %4783 = vrsqrt.f32 %v2966_v20  ;;  %v2888_v30 = vmul.f32 0.03125, %v2852_v55  ;;  %v2849_v32 = vpop.xlane.xlu0 %2848  ;;  %v3033_v38 = vadd.f32 %v6237_v21, %v3013_v39 }
 0x90f   :  { %4785 = vrsqrt.f32 %v2965_v57  ;;  %v2887_v24 = vmul.f32 0.03125, %v2849_v32 }
 0x910   :  { %v4780_v1 = vpop.eup %4779  ;;  %v2920_v51 = vsub.f32 %v2888_v30, %v2904_v46  ;;  %4404 = vmatprep.mubr.msk.f32.mxu0 %vm348_vm1, %v3033_v38  ;;  %v2952_v38 = vsub.f32 %v6167_v52, %v6288_v3 }
 0x911   :  { %v4782_v36 = vpop.eup %4781  ;;  %v2919_v54 = vsub.f32 %v2887_v24, %v2903_v59  ;;  %v2794_v8 = vpop.xlane.xlu1 %2793  ;;  %4405 = vmatmul.mubr.msk.f32.gmra.mrb[60].mxu0 %vm348_vm1, %v3034_v26  ;;  %v2996_v9 = vmul.f32 %v4780_v1, %v2948_v60  ;;  %v2951_v26 = vsub.f32 %v6170_v47, %v6290_v17 }
 0x912   :  { %v2936_v16 = vmax.f32 %v2920_v51, 0.0  ;;  %v2874_v23 = vmul.f32 0.03125, %v2794_v8  ;;  %v2791_v4 = vpop.xlane.xlu0 %2790  ;;  %v2995_v31 = vmul.f32 %v4782_v36, %v2947_v40 }
 0x913   :  { %v2935_v58 = vmax.f32 %v2919_v54, 0.0  ;;  %v2873_v53 = vmul.f32 0.03125, %v2791_v4  ;;  %v3016_v29 = vmul.f32 %v6227_v27, %v2996_v9 }
 0x914   :  { %v2968_v25 = vadd.f32 1e-05, %v2936_v16  ;;  %v3015_v10 = vmul.f32 %v6227_v27, %v2995_v31  ;;  %v2906_v49 = vmul.f32 %v2874_v23, %v2874_v23  ;;  %v2954_v8 = vsub.f32 %v6185_v35, %v2874_v23 }
 0x915   :  { %v2967_v44 = vadd.f32 1e-05, %v2935_v58  ;;  %v2858_v19 = vpop.xlane.xlu1 %2857  ;;  %v2905_v2 = vmul.f32 %v2873_v53, %v2873_v53  ;;  %v3036_v28 = vadd.f32 %v6237_v21, %v3016_v29  ;;  %v2953_v17 = vsub.f32 %v6188_v15, %v2873_v53  ;;  %v3951_v53 = vld [vmem:[%s6533_s7 + $0x70] sm:$0xff] }
 0x916   :  { %4787 = vrsqrt.f32 %v2968_v25  ;;  %v2890_v18 = vmul.f32 0.03125, %v2858_v19  ;;  %v2855_v56 = vpop.xlane.xlu0 %2854  ;;  %v3035_v45 = vadd.f32 %v6237_v21, %v3015_v10 }
 0x917   :  { %4789 = vrsqrt.f32 %v2967_v44  ;;  %v2889_v22 = vmul.f32 0.03125, %v2855_v56 }
 0x918   :  { %v4784_v14 = vpop.eup %4783  ;;  %v2922_v13 = vsub.f32 %v2890_v18, %v2906_v49  ;;  %4407 = vmatprep.mubr.msk.f32.mxu0 %vm348_vm1, %v3035_v45 }
 0x919   :  { %v4786_v41 = vpop.eup %4785  ;;  %v2921_v63 = vsub.f32 %v2889_v22, %v2905_v2  ;;  %4408 = vmatmul.mubr.msk.f32.gmra.mrb[62].mxu0 %vm348_vm1, %v3036_v28  ;;  %v2998_v20 = vmul.f32 %v4784_v14, %v2950_v12  ;;  %v3952_v12 = vld [vmem:[%s6533_s7 + $0x78] sm:$0xff] }
 0x91a   :  { %v2938_v39 = vmax.f32 %v2922_v13, 0.0  ;;  %v2997_v60 = vmul.f32 %v4786_v41, %v2949_v6  ;;  %v4527_v44 = vpack.c.bf16 %v3952_v12, %v3951_v53 }
 0x91b   :  { %v2937_v57 = vmax.f32 %v2921_v63, 0.0  ;;  %v3018_v55 = vmul.f32 %v6227_v27, %v2998_v20 }
 0x91c   :  { %v2970_v46 = vadd.f32 1e-05, %v2938_v39  ;;  %v3017_v30 = vmul.f32 %v6227_v27, %v2997_v60  ;;  %4528 = vmatprep.subr.bf16.mxu1 %v4527_v44 }
 0x91d   :  { %v2969_v32 = vadd.f32 1e-05, %v2937_v57  ;;  %v3038_v59 = vadd.f32 %v6237_v21, %v3018_v55  ;;  %4530 = vmatpush3.bf16.msra.mxu1 %v4527_v44 }
 0x91e   :  { %4791 = vrsqrt.f32 %v2970_v46  ;;  %v3037_v50 = vadd.f32 %v6237_v21, %v3017_v30 }
 0x91f   :  { %4793 = vrsqrt.f32 %v2969_v32 }
 0x920   :  { %v4788_v24 = vpop.eup %4787  ;;  %4410 = vmatprep.mubr.msk.f32.mxu0 %vm348_vm1, %v3037_v50 }
 0x921   :  { %v4790_v1 = vpop.eup %4789  ;;  %4411 = vmatmul.mubr.msk.f32.gmra.mrb[64].mxu0 %vm348_vm1, %v3038_v59  ;;  %v3000_v40 = vmul.f32 %v4788_v24, %v2952_v38 }
 0x922   :  { %v2999_v51 = vmul.f32 %v4790_v1, %v2951_v26 }
 0x923   :  { %v3020_v36 = vmul.f32 %v6227_v27, %v3000_v40 }
 0x924   :  { %v3019_v54 = vmul.f32 %v6227_v27, %v2999_v51 }
 0x925   :  { %v3040_v9 = vadd.f32 %v6237_v21, %v3020_v36 }
 0x926   :  { %v3039_v3 = vadd.f32 %v6237_v21, %v3019_v54 }
 0x928   :  { %v4792_v16 = vpop.eup %4791  ;;  %4413 = vmatprep.mubr.msk.f32.mxu0 %vm348_vm1, %v3039_v3 }
 0x929   :  { %v4794_v4 = vpop.eup %4793  ;;  %4414 = vmatmul.mubr.msk.f32.gmra.mrb[66].mxu0 %vm348_vm1, %v3040_v9  ;;  %v3002_v31 = vmul.f32 %v4792_v16, %v2954_v8 }
 0x92a   :  { %v3001_v58 = vmul.f32 %v4794_v4, %v2953_v17 }
 0x92b   :  { %v3022_v29 = vmul.f32 %v6227_v27, %v3002_v31 }
 0x92c   :  { %v3021_v25 = vmul.f32 %v6227_v27, %v3001_v58  ;;  %v6349_v27 = vld [vmem:[%s6532_s6 + $0x3] ss:$0 sm:$0xff] }
 0x92d   :  { %v3042_v23 = vadd.f32 %v6237_v21, %v3022_v29 }
 0x92e   :  { %v3041_v10 = vadd.f32 %v6237_v21, %v3021_v25 }
 0x930   :  { %4416 = vmatprep.mubr.msk.f32.mxu0 %vm348_vm1, %v3041_v10 }
 0x931   :  { %4417 = vmatmul.mubr.msk.f32.gmra.mrb[68].mxu0 %vm348_vm1, %v3042_v23 }
 0x9cc   :  { %v4397_v21 = vpop.f32.mrb[54].mxu0 }
 0x9cd   :  { %v3173_v19 = vadd.f32 %v4397_v21, %v6349_v27  ;;  %v3167_v49 = vpop.f32.mrb[55].mxu0 }
 0x9ce   :  { %v3168_v18 = vadd.f32 %v6349_v27, %v3167_v49 }
 0x9cf   :  { %v3263_v56 = vmul.f32 0.70710677, %v3173_v19  ;;  %v3247_v30 = vmul.f32 0.5, %v3173_v19 }
 0x9d0   :  { %v3262_v45 = vmul.f32 0.70710677, %v3168_v18  ;;  %v3246_v60 = vmul.f32 0.5, %v3168_v18 }
 0x9d1   :  { %4795 = verf.f32 %v3263_v56 }
 0x9d2   :  { %4797 = verf.f32 %v3262_v45 }
 0x9d4   :  { %v4400_v2 = vpop.f32.mrb[56].mxu0 }
 0x9d5   :  { %v3183_v22 = vadd.f32 %v4400_v2, %v6349_v27  ;;  %v3177_v28 = vpop.f32.mrb[57].mxu0 }
 0x9d6   :  { %v3178_v14 = vadd.f32 %v6349_v27, %v3177_v28 }
 0x9d7   :  { %v3265_v6 = vmul.f32 0.70710677, %v3183_v22  ;;  %v3249_v9 = vmul.f32 0.5, %v3183_v22 }
 0x9d8   :  { %v3264_v13 = vmul.f32 0.70710677, %v3178_v14  ;;  %v3248_v36 = vmul.f32 0.5, %v3178_v14 }
 0x9d9   :  { %4799 = verf.f32 %v3265_v6 }
 0x9da   :  { %4801 = verf.f32 %v3264_v13 }
 0x9db   :  { %v4796_v41 = vpop.eup %4795 }
 0x9dc   :  { %v4798_v63 = vpop.eup %4797  ;;  %v3295_v20 = vadd.f32 1.0, %v4796_v41  ;;  %v4403_v39 = vpop.f32.mrb[58].mxu0 }
 0x9dd   :  { %v3294_v57 = vadd.f32 1.0, %v4798_v63  ;;  %v3193_v55 = vadd.f32 %v4403_v39, %v6349_v27  ;;  %v3187_v46 = vpop.f32.mrb[59].mxu0 }
 0x9de   :  { %v3188_v32 = vadd.f32 %v6349_v27, %v3187_v46  ;;  %v3311_v59 = vmul.f32 %v3295_v20, %v3247_v30 }
 0x9df   :  { %v3310_v50 = vmul.f32 %v3294_v57, %v3246_v60  ;;  %v3267_v38 = vmul.f32 0.70710677, %v3193_v55  ;;  %v3251_v19 = vmul.f32 0.5, %v3193_v55 }
 0x9e0   :  { %v3266_v24 = vmul.f32 0.70710677, %v3188_v32  ;;  %v3250_v53 = vmul.f32 0.5, %v3188_v32 }
 0x9e1   :  { %4803 = verf.f32 %v3267_v38  ;;  %4427 = vmatprep.mubr.msk.f32.mxu1 %vm348_vm1, %v3310_v50 }
 0x9e2   :  { %4805 = verf.f32 %v3266_v24  ;;  %4428 = vmatmul.mubr.msk.f32.vlgmr.msra.gmra.mrb[58].mxu1 %vm348_vm1, %v3311_v59 }
 0x9e3   :  { %v4800_v26 = vpop.eup %4799 }
 0x9e4   :  { %v4802_v1 = vpop.eup %4801  ;;  %v3297_v40 = vadd.f32 1.0, %v4800_v26  ;;  %v4406_v51 = vpop.f32.mrb[60].mxu0 }
 0x9e5   :  { %v3296_v54 = vadd.f32 1.0, %v4802_v1  ;;  %v3203_v3 = vadd.f32 %v4406_v51, %v6349_v27  ;;  %v3197_v8 = vpop.f32.mrb[61].mxu0 }
 0x9e6   :  { %v3198_v16 = vadd.f32 %v6349_v27, %v3197_v8  ;;  %v3313_v31 = vmul.f32 %v3297_v40, %v3249_v9 }
 0x9e7   :  { %v3312_v17 = vmul.f32 %v3296_v54, %v3248_v36  ;;  %v3269_v4 = vmul.f32 0.70710677, %v3203_v3  ;;  %v3253_v39 = vmul.f32 0.5, %v3203_v3 }
 0x9e8   :  { %v3268_v58 = vmul.f32 0.70710677, %v3198_v16  ;;  %v3252_v13 = vmul.f32 0.5, %v3198_v16 }
 0x9e9   :  { %4807 = verf.f32 %v3269_v4  ;;  %4430 = vmatprep.mubr.msk.f32.mxu1 %vm348_vm1, %v3312_v17 }
 0x9ea   :  { %4809 = verf.f32 %v3268_v58  ;;  %4431 = vmatmul.mubr.msk.f32.gmra.mrb[60].mxu1 %vm348_vm1, %v3313_v31 }
 0x9eb   :  { %v4804_v29 = vpop.eup %4803 }
 0x9ec   :  { %v4806_v25 = vpop.eup %4805  ;;  %v3299_v10 = vadd.f32 1.0, %v4804_v29  ;;  %v4409_v23 = vpop.f32.mrb[62].mxu0 }
 0x9ed   :  { %v3298_v12 = vadd.f32 1.0, %v4806_v25  ;;  %v3213_v44 = vadd.f32 %v4409_v23, %v6349_v27  ;;  %v3207_v21 = vpop.f32.mrb[63].mxu0 }
 0x9ee   :  { %v3208_v49 = vadd.f32 %v6349_v27, %v3207_v21  ;;  %v3315_v45 = vmul.f32 %v3299_v10, %v3251_v19 }
 0x9ef   :  { %v3314_v18 = vmul.f32 %v3298_v12, %v3250_v53  ;;  %v3271_v56 = vmul.f32 0.70710677, %v3213_v44  ;;  %v3255_v51 = vmul.f32 0.5, %v3213_v44 }
 0x9f0   :  { %v3270_v2 = vmul.f32 0.70710677, %v3208_v49  ;;  %v3254_v24 = vmul.f32 0.5, %v3208_v49 }
 0x9f1   :  { %4811 = verf.f32 %v3271_v56  ;;  %4433 = vmatprep.mubr.msk.f32.mxu1 %vm348_vm1, %v3314_v18 }
 0x9f2   :  { %4813 = verf.f32 %v3270_v2  ;;  %4434 = vmatmul.mubr.msk.f32.gmra.mrb[62].mxu1 %vm348_vm1, %v3315_v45 }
 0x9f3   :  { %v4808_v22 = vpop.eup %4807 }
 0x9f4   :  { %v4810_v28 = vpop.eup %4809  ;;  %v3301_v14 = vadd.f32 1.0, %v4808_v22  ;;  %v4412_v6 = vpop.f32.mrb[64].mxu0 }
 0x9f5   :  { %v3300_v41 = vadd.f32 1.0, %v4810_v28  ;;  %v3223_v63 = vadd.f32 %v4412_v6, %v6349_v27  ;;  %v3217_v20 = vpop.f32.mrb[65].mxu0 }
 0x9f6   :  { %v3218_v60 = vadd.f32 %v6349_v27, %v3217_v20  ;;  %v3317_v46 = vmul.f32 %v3301_v14, %v3253_v39 }
 0x9f7   :  { %v3316_v57 = vmul.f32 %v3300_v41, %v3252_v13  ;;  %v3273_v55 = vmul.f32 0.70710677, %v3223_v63  ;;  %v3257_v23 = vmul.f32 0.5, %v3223_v63 }
 0x9f8   :  { %v3272_v30 = vmul.f32 0.70710677, %v3218_v60  ;;  %v3256_v58 = vmul.f32 0.5, %v3218_v60 }
 0x9f9   :  { %4815 = verf.f32 %v3273_v55  ;;  %4436 = vmatprep.mubr.msk.f32.mxu1 %vm348_vm1, %v3316_v57  ;;  %v4851_v57 = vmov 0   ;;  %v6386_v55 = vld [vmem:[%s6534_s8 + $0x3] ss:$0 sm:$0xff]  ;;  %s4852_s8 = smov [#allocation3]  }
 0x9fa   :  { %4817 = verf.f32 %v3272_v30  ;;  %4437 = vmatmul.mubr.msk.f32.gmra.mrb[64].mxu1 %vm348_vm1, %v3317_v46  ;;  %4537 = vset.pattern.permute.xlu1 %v4851_v57 }
 0x9fb   :  { %v4812_v32 = vpop.eup %4811  ;;  %4538 = vset.pattern.permute.xlu0 %v4851_v57 }
 0x9fc   :  { %v4814_v50 = vpop.eup %4813  ;;  %v3303_v38 = vadd.f32 1.0, %v4812_v32  ;;  %v4415_v59 = vpop.f32.mrb[66].mxu0 }
 0x9fd   :  { %v3302_v26 = vadd.f32 1.0, %v4814_v50  ;;  %v3233_v1 = vadd.f32 %v4415_v59, %v6349_v27  ;;  %v3227_v40 = vpop.f32.mrb[67].mxu0 }
 0x9fe   :  { %v3228_v36 = vadd.f32 %v6349_v27, %v3227_v40  ;;  %v3319_v8 = vmul.f32 %v3303_v38, %v3255_v51  ;;  %v6393_v38 = vld [vmem:[%s6535_s9] ss:$0 sm:$0xff]  ;;  %s3777_s9 = sshll.u32 %s4852_s8, 4  ;;  %s3778_s9 = int_to_ptr.vmem [resolvable:$true] %s3777_s9 }
 0x9ff   :  { %v3318_v54 = vmul.f32 %v3302_v26, %v3254_v24  ;;  %v3275_v3 = vmul.f32 0.70710677, %v3233_v1  ;;  %v3259_v22 = vmul.f32 0.5, %v3233_v1  ;;  %s4827_s27 = scalar_lea.vmem %s3778_s9, 16  ;;  %s4831_s28 = scalar_lea.vmem %s3778_s9, 32 }
 0xa00   :  { %v3274_v9 = vmul.f32 0.70710677, %v3228_v36  ;;  %v3258_v45 = vmul.f32 0.5, %v3228_v36  ;;  %p4828_p0 = scmp.ne.s32.totalorder %s3778_s9, %s4827_s27  ;;  %p4832_p1 = scmp.lt.s32.totalorder %s3778_s9, %s3778_s9 }
 0xa01   :  { %4819 = verf.f32 %v3275_v3  ;;  %4439 = vmatprep.mubr.msk.f32.mxu1 %vm348_vm1, %v3318_v54  ;;  %p4833_p2 = scmp.lt.s32.totalorder %s4831_s28, %s4827_s27 }
 0xa02   :  { %4821 = verf.f32 %v3274_v9  ;;  %4440 = vmatmul.mubr.msk.f32.gmra.mrb[66].mxu1 %vm348_vm1, %v3319_v8 }
 0xa03   :  { %v4816_v16 = vpop.eup %4815  ;;  %p4834_p3 = por %p4833_p2, %p4832_p1 }
 0xa04   :  { %v4818_v17 = vpop.eup %4817  ;;  %v3305_v4 = vadd.f32 1.0, %v4816_v16  ;;  %v4418_v31 = vpop.f32.mrb[68].mxu0 }
 0xa05   :  { %v3304_v29 = vadd.f32 1.0, %v4818_v17  ;;  %v3243_v25 = vadd.f32 %v4418_v31, %v6349_v27  ;;  %v3237_v10 = vpop.f32.mrb[69].mxu0  ;;  %p4835_p4 = pnand %p4834_p3, %p4828_p0 }
 0xa06   :  { %v3238_v53 = vadd.f32 %v6349_v27, %v3237_v10  ;;  %v3321_v21 = vmul.f32 %v3305_v4, %v3257_v23 }
 0xa07   :  { %v3320_v12 = vmul.f32 %v3304_v29, %v3256_v58  ;;  %v3277_v44 = vmul.f32 0.70710677, %v3243_v25  ;;  %v3261_v20 = vmul.f32 0.5, %v3243_v25 }
 0xa08   :  { %v3276_v19 = vmul.f32 0.70710677, %v3238_v53  ;;  %v3260_v41 = vmul.f32 0.5, %v3238_v53 }
 0xa09   :  { %4823 = verf.f32 %v3277_v44  ;;  %4442 = vmatprep.mubr.msk.f32.mxu1 %vm348_vm1, %v3320_v12 }
 0xa0a   :  { %4825 = verf.f32 %v3276_v19  ;;  %4443 = vmatmul.mubr.msk.f32.gmra.mrb[68].mxu1 %vm348_vm1, %v3321_v21 }
 0xa0b   :  { %v4820_v49 = vpop.eup %4819 }
 0xa0c   :  { %v4822_v18 = vpop.eup %4821  ;;  %v3307_v56 = vadd.f32 1.0, %v4820_v49 }
 0xa0d   :  { %v3306_v2 = vadd.f32 1.0, %v4822_v18 }
 0xa0e   :  { %v3323_v14 = vmul.f32 %v3307_v56, %v3259_v22 }
 0xa0f   :  { %v3322_v28 = vmul.f32 %v3306_v2, %v3258_v45 }
 0xa11   :  { %4445 = vmatprep.mubr.msk.f32.mxu1 %vm348_vm1, %v3322_v28 }
 0xa12   :  { %4446 = vmatmul.mubr.msk.f32.gmra.mrb[70].mxu1 %vm348_vm1, %v3323_v14 }
 0xa13   :  { %v4824_v27 = vpop.eup %4823 }
 0xa14   :  { %v4826_v6 = vpop.eup %4825  ;;  %v3309_v13 = vadd.f32 1.0, %v4824_v27 }
 0xa15   :  { %v3308_v63 = vadd.f32 1.0, %v4826_v6 }
 0xa16   :  { %v3325_v60 = vmul.f32 %v3309_v13, %v3261_v20  ;;  %v3616_v13 = vld [vmem:[#allocation2] sm:$0x1] }
 0xa17   :  { %v3324_v39 = vmul.f32 %v3308_v63, %v3260_v41 }
 0xa19   :  { %4448 = vmatprep.mubr.msk.f32.mxu1 %vm348_vm1, %v3324_v39 }
 0xa1a   :  { %4449 = vmatmul.mubr.msk.f32.gmra.mrb[72].mxu1 %vm348_vm1, %v3325_v60 }
 0xab5   :  { %v4429_v46 = vpop.f32.mrb[58].mxu1 }
 0xab6   :  { %v3456_v30 = vadd.f32 %v4429_v46, %v6386_v55  ;;  %v3450_v32 = vpop.f32.mrb[59].mxu1 }
 0xab7   :  { %v3451_v50 = vadd.f32 %v6386_v55, %v3450_v32 }
 0xab8   :  { %v3530_v59 = vadd.f32 %v3456_v30, %v6047_v43 }
 0xab9   :  { %v3529_v24 = vadd.f32 %v3451_v50, %v6050_v11 }
 0xaba   :  { %v3553_v26 = vmul.f32 %v6393_v38, %v3530_v59 }
 0xabb   :  { %v3552_v1 = vmul.f32 %v6393_v38, %v3529_v24 }
 0xabc   :  { %v3571_v40 = vsel %vm348_vm1, %v3553_v26, 0.0 }
 0xabd   :  { %3572 = vadd.xlane.f32.xlu1 %v3571_v40  ;;  %v4432_v51 = vpop.f32.mrb[60].mxu1  ;;  %v3568_v36 = vsel %vm348_vm1, %v3552_v1, 0.0 }
 0xabe   :  { %v3466_v54 = vadd.f32 %v4432_v51, %v6386_v55  ;;  %3569 = vadd.xlane.f32.xlu0 %v3568_v36  ;;  %v3460_v3 = vpop.f32.mrb[61].mxu1 }
 0xabf   :  { %v3461_v8 = vadd.f32 %v6386_v55, %v3460_v3 }
 0xac0   :  { %v3532_v43 = vadd.f32 %v3466_v54, %v6065_v62 }
 0xac1   :  { %v3531_v11 = vadd.f32 %v3461_v8, %v6068_v48 }
 0xac2   :  { %v3555_v9 = vmul.f32 %v6393_v38, %v3532_v43 }
 0xac3   :  { %v3554_v16 = vmul.f32 %v6393_v38, %v3531_v11 }
 0xac4   :  { %v3577_v17 = vsel %vm348_vm1, %v3555_v9, 0.0 }
 0xac5   :  { %3578 = vadd.xlane.f32.xlu1 %v3577_v17  ;;  %v4435_v4 = vpop.f32.mrb[62].mxu1  ;;  %v3574_v31 = vsel %vm348_vm1, %v3554_v16, 0.0 }
 0xac6   :  { %v3476_v58 = vadd.f32 %v4435_v4, %v6386_v55  ;;  %3575 = vadd.xlane.f32.xlu0 %v3574_v31  ;;  %v3470_v29 = vpop.f32.mrb[63].mxu1 }
 0xac7   :  { %v3471_v25 = vadd.f32 %v6386_v55, %v3470_v29 }
 0xac8   :  { %v3534_v62 = vadd.f32 %v3476_v58, %v6083_v5 }
 0xac9   :  { %v3533_v48 = vadd.f32 %v3471_v25, %v6086_v0 }
 0xaca   :  { %v3557_v10 = vmul.f32 %v6393_v38, %v3534_v62  ;;  %v3622_v62 = vlaneseq }
 0xacb   :  { %v3556_v23 = vmul.f32 %v6393_v38, %v3533_v48 }
 0xacc   :  { %v3583_v53 = vsel %vm348_vm1, %v3557_v10, 0.0 }
 0xacd   :  { %3584 = vadd.xlane.f32.xlu1 %v3583_v53  ;;  %v4438_v12 = vpop.f32.mrb[64].mxu1  ;;  %v3580_v44 = vsel %vm348_vm1, %v3556_v23, 0.0  ;;  %v6457_v23 = vshrl.u32 %v3622_v62, 7  ;;  %v6460_v53 = vand.u32 127, %v3622_v62 }
 0xace   :  { %v3486_v21 = vadd.f32 %v4438_v12, %v6386_v55  ;;  %3581 = vadd.xlane.f32.xlu0 %v3580_v44  ;;  %v3480_v19 = vpop.f32.mrb[65].mxu1 }
 0xacf   :  { %v3481_v49 = vadd.f32 %v6386_v55, %v3480_v19  ;;  %v3664_v19 = vadd.s32 4294967288, %v6460_v53  ;;  %v3755_v62 = vadd.s32 4294967184, %v6460_v53 }
 0xad0   :  { %v3536_v5 = vadd.f32 %v3486_v21, %v6101_v61 }
 0xad1   :  { %v3535_v0 = vadd.f32 %v3481_v49, %v6104_v7  ;;  %v3671_v49 = vadd.s32 4294967280, %v6460_v53 }
 0xad2   :  { %v3559_v18 = vmul.f32 %v6393_v38, %v3536_v5 }
 0xad3   :  { %v3558_v45 = vmul.f32 %v6393_v38, %v3535_v0 }
 0xad4   :  { %v3589_v56 = vsel %vm348_vm1, %v3559_v18, 0.0 }
 0xad5   :  { %3590 = vadd.xlane.f32.xlu0 %v3589_v56  ;;  %v4441_v2 = vpop.f32.mrb[66].mxu1  ;;  %v3586_v6 = vsel %vm348_vm1, %v3558_v45, 0.0  ;;  %v3662_v56 = vsub.s32 %v6460_v53, %v6457_v23  ;;  %v3667_v45 = vsub.s32 %v3664_v19, %v6457_v23 }
 0xad6   :  { %v3496_v22 = vadd.f32 %v4441_v2, %v6386_v55  ;;  %v3490_v28 = vpop.f32.mrb[67].mxu1 }
 0xad7   :  { %v3491_v14 = vadd.f32 %v6386_v55, %v3490_v28 }
 0xad8   :  { %v3538_v27 = vadd.f32 %v3496_v22, %v6119_v34  ;;  %v3674_v22 = vsub.s32 %v3671_v49, %v6457_v23 }
 0xad9   :  { %v3537_v61 = vadd.f32 %v3491_v14, %v6122_v37  ;;  %3587 = vadd.xlane.f32.xlu0 %v3586_v6 }
 0xada   :  { %v3561_v7 = vmul.f32 %v6393_v38, %v3538_v27  ;;  %v3678_v27 = vadd.s32 4294967272, %v6460_v53 }
 0xadb   :  { %v3560_v63 = vmul.f32 %v6393_v38, %v3537_v61  ;;  %v3685_v61 = vadd.s32 4294967264, %v6460_v53 }
 0xadc   :  { %v3595_v41 = vsel %vm348_vm1, %v3561_v7, 0.0 }
 0xadd   :  { %3596 = vadd.xlane.f32.xlu0 %v3595_v41  ;;  %v4444_v20 = vpop.f32.mrb[68].mxu1  ;;  %v3592_v37 = vsel %vm348_vm1, %v3560_v63, 0.0  ;;  %v3681_v63 = vsub.s32 %v3678_v27, %v6457_v23 }
 0xade   :  { %v3506_v39 = vadd.f32 %v4444_v20, %v6386_v55  ;;  %3619 = vperm.xlu1 %4537, %v3616_v13   ;;  %v3500_v60 = vpop.f32.mrb[69].mxu1 }
 0xadf   :  { %v3501_v34 = vadd.f32 %v6386_v55, %v3500_v60  ;;  %v3692_v60 = vadd.s32 4294967256, %v6460_v53 }
 0xae0   :  { %v3540_v57 = vadd.f32 %v3506_v39, %v6143_v33  ;;  %v3688_v39 = vsub.s32 %v3685_v61, %v6457_v23 }
 0xae1   :  { %v3539_v46 = vadd.f32 %v3501_v34, %v6146_v42  ;;  %3593 = vadd.xlane.f32.xlu0 %v3592_v37  ;;  %v3699_v37 = vadd.s32 4294967248, %v6460_v53 }
 0xae2   :  { %v3563_v30 = vmul.f32 %v6393_v38, %v3540_v57 }
 0xae3   :  { %v3562_v32 = vmul.f32 %v6393_v38, %v3539_v46 }
 0xae4   :  { %v3601_v31 = vsel %vm348_vm1, %v3563_v30, 0.0 }
 0xae5   :  { %v4447_v50 = vpop.f32.mrb[70].mxu1  ;;  %v3598_v59 = vsel %vm348_vm1, %v3562_v32, 0.0 }
 0xae6   :  { %v3516_v24 = vadd.f32 %v4447_v50, %v6386_v55  ;;  %3599 = vadd.xlane.f32.xlu0 %v3598_v59  ;;  %v3510_v26 = vpop.f32.mrb[71].mxu1  ;;  %v3695_v50 = vsub.s32 %v3692_v60, %v6457_v23 }
 0xae7   :  { %v3511_v1 = vadd.f32 %v6386_v55, %v3510_v26 }
 0xae8   :  { %v3542_v33 = vadd.f32 %v3516_v24, %v6167_v52  ;;  %v3702_v24 = vsub.s32 %v3699_v37, %v6457_v23 }
 0xae9   :  { %v3541_v40 = vadd.f32 %v3511_v1, %v6170_v47  ;;  %v3713_v1 = vadd.s32 4294967232, %v6460_v53 }
 0xaea   :  { %v3565_v42 = vmul.f32 %v6393_v38, %v3542_v33 }
 0xaeb   :  { %v3564_v36 = vmul.f32 %v6393_v38, %v3541_v40  ;;  %v3706_v40 = vadd.s32 4294967240, %v6460_v53 }
 0xaec   :  { %v3607_v51 = vsel %vm348_vm1, %v3565_v42, 0.0 }
 0xaed   :  { %3608 = vadd.xlane.f32.xlu0 %v3607_v51  ;;  %v4450_v54 = vpop.f32.mrb[72].mxu1  ;;  %v3604_v11 = vsel %vm348_vm1, %v3564_v36, 0.0  ;;  %v3720_v36 = vadd.s32 4294967224, %v6460_v53 }
 0xaee   :  { %v3526_v3 = vadd.f32 %v4450_v54, %v6386_v55  ;;  %v3520_v8 = vpop.f32.mrb[73].mxu1  ;;  %v3727_v54 = vadd.s32 4294967216, %v6460_v53 }
 0xaef   :  { %v3521_v43 = vadd.f32 %v6386_v55, %v3520_v8  ;;  %v3716_v8 = vsub.s32 %v3713_v1, %v6457_v23 }
 0xaf0   :  { %v3544_v9 = vadd.f32 %v3526_v3, %v6185_v35 }
 0xaf1   :  { %v3543_v52 = vadd.f32 %v3521_v43, %v6188_v15  ;;  %3605 = vadd.xlane.f32.xlu0 %v3604_v11  ;;  %v3709_v11 = vsub.s32 %v3706_v40, %v6457_v23 }
 0xaf2   :  { %v3567_v17 = vmul.f32 %v6393_v38, %v3544_v9 }
 0xaf3   :  { %v3566_v47 = vmul.f32 %v6393_v38, %v3543_v52  ;;  %v3624_v38 = vsub.s32 0, %v6457_v23 }
 0xaf4   :  { %v3613_v4 = vsel %vm348_vm1, %v3567_v17, 0.0  ;;  %v3730_v17 = vsub.s32 %v3727_v54, %v6457_v23 }
 0xaf5   :  { %v3610_v16 = vsel %vm348_vm1, %v3566_v47, 0.0 }
 0xaf6   :  { %3611 = vadd.xlane.f32.xlu0 %v3610_v16  ;;  %v3723_v16 = vsub.s32 %v3720_v36, %v6457_v23 }
 0xafa   :  { %3614 = vadd.xlane.f32.xlu0 %v3613_v4  ;;  %v3734_v4 = vadd.s32 4294967208, %v6460_v53 }
 0xb02   :  { %3602 = vadd.xlane.f32.xlu1 %v3601_v31 }
 0xb4a   :  { %v3573_v35 = vpop.xlane.xlu1 %3572 }
 0xb4b   :  { %v3570_v55 = vpop.xlane.xlu0 %3569 }
 0xb52   :  { %v3579_v15 = vpop.xlane.xlu1 %3578 }
 0xb53   :  { %v3576_v58 = vpop.xlane.xlu0 %3575 }
 0xb5a   :  { %v3585_v48 = vpop.xlane.xlu1 %3584 }
 0xb5b   :  { %v3582_v29 = vpop.xlane.xlu0 %3581 }
 0xb5e   :  { %v3620_v12 = vpop.permute.xlu1 %3619 }
 0xb5f   :  { %v6462_v21 = vrot.slane %v3620_v12, %v3624_v38  ;;  %v3737_v38 = vsub.s32 %v3734_v4, %v6457_v23 }
 0xb61   :  { %v3626_v0 = vadd.f32 %v6462_v21, %v3570_v55  ;;  %v3627_v18 = vadd.f32 %v6462_v21, %v3573_v35  ;;  %v3628_v2 = vadd.f32 %v6462_v21, %v3576_v58  ;;  %v3629_v13 = vadd.f32 %v6462_v21, %v3579_v15 }
 0xb62   :  { %v3591_v25 = vpop.xlane.xlu0 %3590  ;;  %v3630_v34 = vadd.f32 %v6462_v21, %v3582_v29  ;;  %v3631_v30 = vadd.f32 %v6462_v21, %v3585_v48  ;;  %v3741_v29 = vadd.s32 4294967200, %v6460_v53  ;;  %v3762_v48 = vadd.s32 4294967176, %v6460_v53 }
 0xb63   :  { %v3663_v28 = vrot.slane %v3626_v0, %v3662_v56  ;;  %v3668_v14 = vrot.slane %v3627_v18, %v3667_v45  ;;  %v3675_v7 = vrot.slane %v3628_v2, %v3674_v22  ;;  %v3682_v46 = vrot.slane %v3629_v13, %v3681_v63 }
 0xb64   :  { %v3689_v59 = vrot.slane %v3630_v34, %v3688_v39  ;;  %v3696_v51 = vrot.slane %v3631_v30, %v3695_v50  ;;  %v3633_v9 = vadd.f32 %v6462_v21, %v3591_v25  ;;  %v3748_v25 = vadd.s32 4294967192, %v6460_v53 }
 0xb65   :  { %v3670_v41 = vsel %vm3669_vm2, %v3668_v14, %v3663_v28  ;;  %v3744_v49 = vsub.s32 %v3741_v29, %v6457_v23  ;;  %v3758_v2 = vsub.s32 %v3755_v62, %v6457_v23  ;;  %v3765_v28 = vsub.s32 %v3762_v48, %v6457_v23 }
 0xb66   :  { %v3588_v10 = vpop.xlane.xlu0 %3587  ;;  %v3677_v57 = vsel %vm3676_vm3, %v3675_v7, %v3670_v41  ;;  %v3710_v35 = vrot.slane %v3633_v9, %v3709_v11  ;;  %v3751_v56 = vsub.s32 %v3748_v25, %v6457_v23 }
 0xb67   :  { %v3684_v32 = vsel %vm3683_vm4, %v3682_v46, %v3677_v57  ;;  %v3632_v26 = vadd.f32 %v6462_v21, %v3588_v10 }
 0xb68   :  { %v3691_v42 = vsel %vm3690_vm5, %v3689_v59, %v3684_v32 }
 0xb69   :  { %v3703_v3 = vrot.slane %v3632_v26, %v3702_v24  ;;  %v3698_v52 = vsel %vm3697_vm6, %v3696_v51, %v3691_v42 }
 0xb6a   :  { %v3597_v44 = vpop.xlane.xlu0 %3596 }
 0xb6b   :  { %v3705_v31 = vsel %vm3704_vm7, %v3703_v3, %v3698_v52  ;;  %v3635_v15 = vadd.f32 %v6462_v21, %v3597_v44 }
 0xb6c   :  { %v3712_v10 = vsel %vm3711_vm8, %v3710_v35, %v3705_v31 }
 0xb6d   :  { %v3724_v18 = vrot.slane %v3635_v15, %v3723_v16 }
 0xb6e   :  { %v3594_v5 = vpop.xlane.xlu0 %3593 }
 0xb6f   :  { %v3634_v43 = vadd.f32 %v6462_v21, %v3594_v5 }
 0xb71   :  { %v3717_v55 = vrot.slane %v3634_v43, %v3716_v8 }
 0xb73   :  { %v3600_v6 = vpop.xlane.xlu0 %3599  ;;  %v3719_v12 = vsel %vm3718_vm9, %v3717_v55, %v3712_v10 }
 0xb74   :  { %v3636_v58 = vadd.f32 %v6462_v21, %v3600_v6  ;;  %v3726_v14 = vsel %vm3725_vm10, %v3724_v18, %v3719_v12 }
 0xb76   :  { %v3731_v19 = vrot.slane %v3636_v58, %v3730_v17 }
 0xb78   :  { %v3733_v61 = vsel %vm3732_vm11, %v3731_v19, %v3726_v14 }
 0xb7a   :  { %v3609_v20 = vpop.xlane.xlu0 %3608 }
 0xb7b   :  { %v3639_v45 = vadd.f32 %v6462_v21, %v3609_v20 }
 0xb7d   :  { %v3752_v13 = vrot.slane %v3639_v45, %v3751_v56 }
 0xb7e   :  { %v3606_v33 = vpop.xlane.xlu0 %3605 }
 0xb7f   :  { %v3638_v5 = vadd.f32 %v6462_v21, %v3606_v33 }
 0xb81   :  { %v3745_v7 = vrot.slane %v3638_v5, %v3744_v49 }
 0xb83   :  { %v3612_v47 = vpop.xlane.xlu0 %3611 }
 0xb84   :  { %v3640_v22 = vadd.f32 %v6462_v21, %v3612_v47 }
 0xb86   :  { %v3759_v63 = vrot.slane %v3640_v22, %v3758_v2 }
 0xb87   :  { %v3615_v0 = vpop.xlane.xlu0 %3614 }
 0xb88   :  { %v3641_v27 = vadd.f32 %v6462_v21, %v3615_v0 }
 0xb8a   :  { %v3766_v23 = vrot.slane %v3641_v27, %v3765_v28 }
 0xb8f   :  { %v3603_v44 = vpop.xlane.xlu1 %3602 }
 0xb90   :  { %v3637_v53 = vadd.f32 %v6462_v21, %v3603_v44 }
 0xb92   :  { %v3738_v6 = vrot.slane %v3637_v53, %v3737_v38 }
 0xb94   :  { %v3740_v41 = vsel %vm3739_vm12, %v3738_v6, %v3733_v61 }
 0xb95   :  { %v3747_v20 = vsel %vm3746_vm13, %v3745_v7, %v3740_v41 }
 0xb96   :  { %v3754_v39 = vsel %vm3753_vm14, %v3752_v13, %v3747_v20 }
 0xb97   :  { %v3761_v60 = vsel %vm3760_vm15, %v3759_v63, %v3754_v39 }
 0xb98   :  { %v3768_v34 = vsel %vm3767_vm0, %v3766_v23, %v3761_v60 }
 0xb99   :  { %3770 = vst [vmem:[#allocation3] sm:$0x1] %v3768_v34 }
 0xb9a   :  { %4838 = shalt.err (!%p4835_p4)
}
 0xb9b   :  { %s4839_s2 = scalar_lea.hbm %s6537_s11, 16 }
 0xb9c   :  { %p4840_p5 = scmp.ne.s32.totalorder %s6537_s11, %s4839_s2  ;;  %p4843_p6 = scmp.lt.u32.totalorder %s4839_s2, %s6537_s11 }
 0xb9e   :  { %p4845_p7 = pnand %p4843_p6, %p4840_p5 }
 0xba0   :  { %4848 = shalt.err (!%p4845_p7)
}
 0xba1   :  { %3780 = dma.vmem_to_hbm [thread:$0]  %s3778_s9, 16, %s6537_s11, [#allocation4]  }
 0xba2   :  { %4849 = dma.done.wait [#allocation4], 16  }
 0xba3   :  { %4850 = vsyncadd [#allocation4], 4294967280 }
 0xba4   :  { %3784 = vsyncpa [#allocation4], 1 }

</bundles_post_ra>
